<compile_context>
chip_gen: v7x
topology: tpu7x:2x2x1
jax: 0.10.0
libtpu: 0.0.40
codegen_flags: <defaults>
</compile_context>

<pallas_src>
import functools

import jax
import jax.numpy as jnp
from jax.experimental import pallas as pl
from jax.experimental.pallas import tpu as pltpu

IMAGES_H = 28
IMAGES_W = 28
IMAGES_DIM = IMAGES_H * IMAGES_W        # 784
HIDDEN_NEURONS_COUNT = 500
HIDDEN_PAD = 512                        # 500 zero-padded to a lane-aligned 512


def _rbm_kernel(x_ref, w1_ref, b1_ref, w2_ref, b2_ref, w3_ref, b3_ref, o_ref,
                *, eup_dtype):
    # In-kernel bf16 cast of the f32 input tile (avoids a separate XLA pass).
    xb = x_ref[...].astype(jnp.bfloat16)
    # Layer 1: (TB,784)bf16 @ (784,512)bf16 -> f32 MXU accumulation.
    h = jnp.dot(xb, w1_ref[...], preferred_element_type=jnp.float32)
    # Bias add in f32; sigmoid in eup_dtype (bf16 on v6e/v7x, f32 on v5e).
    h = jax.nn.sigmoid((h + b1_ref[...]).astype(eup_dtype))
    # dropout: identity (eval mode)
    # Layer 2: (TB,512) @ (512,512); activation cast to bf16 for the MXU.
    h = jnp.dot(h.astype(jnp.bfloat16), w2_ref[...],
                preferred_element_type=jnp.float32)
    h = jax.nn.sigmoid((h + b2_ref[...]).astype(eup_dtype))
    # dropout: identity (eval mode)
    # Layer 3: (TB,512) @ (512,784); final sigmoid + output kept in f32.
    h = jnp.dot(h.astype(jnp.bfloat16), w3_ref[...],
                preferred_element_type=jnp.float32)
    o_ref[...] = jax.nn.sigmoid(h + b3_ref[...]).astype(o_ref.dtype)


def _round_up(n, m):
    return ((n + m - 1) // m) * m


def prepare_params(params):
    """One-time weight prep, hoisted out of the per-call path.

    Transpose to (in, out), zero-pad the hidden dim 500 -> 512 (lane aligned),
    cast weights to bf16 for the MXU. Invariant for correctness: padded bias
    lanes are 0 and padded K-rows of w2/w3 are 0 (so the sigmoid(0)=0.5 of
    padded hidden lanes contributes nothing downstream).
    """
    pad_h = HIDDEN_PAD - HIDDEN_NEURONS_COUNT
    w1 = jnp.pad(jnp.asarray(params["w1"], jnp.float32).T,
                 ((0, 0), (0, pad_h))).astype(jnp.bfloat16)            # (784,512)
    w2 = jnp.pad(jnp.asarray(params["w2"], jnp.float32).T,
                 ((0, pad_h), (0, pad_h))).astype(jnp.bfloat16)        # (512,512)
    w3 = jnp.pad(jnp.asarray(params["w3"], jnp.float32).T,
                 ((0, pad_h), (0, 0))).astype(jnp.bfloat16)            # (512,784)
    b1 = jnp.pad(jnp.asarray(params["b1"], jnp.float32), (0, pad_h)).reshape(1, HIDDEN_PAD)
    b2 = jnp.pad(jnp.asarray(params["b2"], jnp.float32), (0, pad_h)).reshape(1, HIDDEN_PAD)
    b3 = jnp.asarray(params["b3"], jnp.float32).reshape(1, IMAGES_DIM)
    return {"w1": w1, "b1": b1, "w2": w2, "b2": b2, "w3": w3, "b3": b3}


def make_rbm_forward(prepared, *, batch_tile=None, bf16_eup=None,
                     vmem_limit_bytes=None):
    """Build a jitted forward fn. x: (B, 1, 28, 28) f32 -> (B, 784) f32."""
    kind = ""
    try:
        kind = jax.devices()[0].device_kind.lower()
    except Exception:
        pass
    is_v7 = ("v7" in kind) or ("7x" in kind)
    if bf16_eup is None:
        # v6e/v7x: bf16-capable VPU/EUP. v5e and older: keep f32 elementwise.
        bf16_eup = is_v7 or ("v6" in kind)
    if batch_tile is None:
        batch_tile = 1024 if is_v7 else 2048      # generation-capped tile
    if vmem_limit_bytes is None:
        vmem_limit_bytes = (48 << 20) if is_v7 else (64 << 20)
    eup_dtype = jnp.bfloat16 if bf16_eup else jnp.float32

    kernel = functools.partial(_rbm_kernel, eup_dtype=eup_dtype)

    @jax.jit
    def forward(x_nchw, p):
        B = x_nchw.shape[0]
        x = x_nchw.reshape(B, IMAGES_DIM).astype(jnp.float32)   # x.view(-1, 784)

        # Batch tiling: sublane-aligned, capped so the grid has >= 2 steps
        # whenever B allows it (keeps both v7x TensorCores busy).
        b_pad = _round_up(B, 8)
        tb = max(8, min(batch_tile, _round_up(pl.cdiv(b_pad, 2), 8)))
        if b_pad != B:
            x = jnp.pad(x, ((0, b_pad - B), (0, 0)))
        grid = (pl.cdiv(b_pad, tb),)

        def resident(arr):   # weights/biases: same block every grid step
            return pl.BlockSpec(arr.shape, lambda i: (0, 0))

        flops = 2 * b_pad * (IMAGES_DIM * HIDDEN_PAD
                             + HIDDEN_PAD * HIDDEN_PAD
                             + HIDDEN_PAD * IMAGES_DIM)
        transcendentals = b_pad * (2 * HIDDEN_PAD + IMAGES_DIM)
        w_bytes = sum(int(v.size) * v.dtype.itemsize for v in p.values())
        bytes_accessed = 2 * b_pad * IMAGES_DIM * 4 + w_bytes   # x + out + weights

        out = pl.pallas_call(
            kernel,
            out_shape=jax.ShapeDtypeStruct((b_pad, IMAGES_DIM), jnp.float32),
            grid=grid,
            in_specs=[
                pl.BlockSpec((tb, IMAGES_DIM), lambda i: (i, 0)),   # x: batch-tiled
                resident(p["w1"]), resident(p["b1"]),
                resident(p["w2"]), resident(p["b2"]),
                resident(p["w3"]), resident(p["b3"]),
            ],
            out_specs=pl.BlockSpec((tb, IMAGES_DIM), lambda i: (i, 0)),
            compiler_params=pltpu.CompilerParams(
                dimension_semantics=("parallel",),   # shard batch tiles over TCs
                vmem_limit_bytes=vmem_limit_bytes,
            ),
            cost_estimate=pl.CostEstimate(
                flops=flops,
                transcendentals=transcendentals,
                bytes_accessed=bytes_accessed,
            ),
        )(x, p["w1"], p["b1"], p["w2"], p["b2"], p["w3"], p["b3"])
        return out[:B]

    return lambda x_nchw: forward(x_nchw, prepared)


def _reference(x_nchw, params):
    x = x_nchw.reshape(x_nchw.shape[0], IMAGES_DIM)
    h = jax.nn.sigmoid(x @ params["w1"].T + params["b1"])
    h = jax.nn.sigmoid(h @ params["w2"].T + params["b2"])
    return jax.nn.sigmoid(h @ params["w3"].T + params["b3"])


def _init_params(key):
    # Deterministic init mimicking torch Linear default (uniform +/- 1/sqrt(fan_in)).
    ks = jax.random.split(key, 6)

    def lin(kw, kb, fan_in, fan_out):
        bound = 1.0 / jnp.sqrt(fan_in)
        w = jax.random.uniform(kw, (fan_out, fan_in), jnp.float32, -bound, bound)
        b = jax.random.uniform(kb, (fan_out,), jnp.float32, -bound, bound)
        return w, b

    w1, b1 = lin(ks[0], ks[1], IMAGES_DIM, HIDDEN_NEURONS_COUNT)
    w2, b2 = lin(ks[2], ks[3], HIDDEN_NEURONS_COUNT, HIDDEN_NEURONS_COUNT)
    w3, b3 = lin(ks[4], ks[5], HIDDEN_NEURONS_COUNT, IMAGES_DIM)
    return {"w1": w1, "b1": b1, "w2": w2, "b2": b2, "w3": w3, "b3": b3}


if __name__ == "__main__":
    key = jax.random.PRNGKey(0)
    k_x, k_p = jax.random.split(key)
    B = 32   # small demo batch; exercises a 2-step grid (tb capped at ceil(B/2))
    x = jax.random.uniform(k_x, (B, 1, IMAGES_H, IMAGES_W), jnp.float32)
    params = _init_params(k_p)

    prepared = prepare_params(params)          # one-time weight prep
    rbm_forward = make_rbm_forward(prepared)   # jitted fused kernel

    out = rbm_forward(x)
    jax.block_until_ready(out)

    ref = _reference(x, params)
    assert out.shape == (B, IMAGES_DIM)
    # bf16 matmul operands (and bf16 hidden sigmoids on v6e/v7x) with f32
    # accumulation: loosen tolerance vs the f32 reference.
    max_err = float(jnp.max(jnp.abs(out - ref)))
    assert max_err < 1e-2, f"max abs error {max_err}"
    print("KERNEL_OK")
</pallas_src>

<mosaic_0001>
module attributes {stable_mosaic.version = 11 : i64} {
  func.func @_rbm_kernel(%arg0: i32, %arg1: memref<16x784xf32, #tpu.memory_space<vmem>>, %arg2: memref<784x512xbf16, #tpu.memory_space<vmem>>, %arg3: memref<1x512xf32, #tpu.memory_space<vmem>>, %arg4: memref<512x512xbf16, #tpu.memory_space<vmem>>, %arg5: memref<1x512xf32, #tpu.memory_space<vmem>>, %arg6: memref<512x784xbf16, #tpu.memory_space<vmem>>, %arg7: memref<1x784xf32, #tpu.memory_space<vmem>>, %arg8: memref<16x784xf32, #tpu.memory_space<vmem>>) attributes {dimension_semantics = [#tpu.dimension_semantics<parallel>], iteration_bounds = array<i64: 2>, scalar_prefetch = 0 : i64, scratch_operands = 0 : i64, tpu.core_type = #tpu.core_type<tc>, window_params = [{transform_indices = @transform_0, window_bounds = array<i64: 16, 784>}, {pipeline_mode = #tpu.pipeline_mode<synchronous>, transform_indices = @transform_1, window_bounds = array<i64: 784, 512>}, {pipeline_mode = #tpu.pipeline_mode<synchronous>, transform_indices = @transform_2, window_bounds = array<i64: 1, 512>}, {pipeline_mode = #tpu.pipeline_mode<synchronous>, transform_indices = @transform_3, window_bounds = array<i64: 512, 512>}, {pipeline_mode = #tpu.pipeline_mode<synchronous>, transform_indices = @transform_4, window_bounds = array<i64: 1, 512>}, {pipeline_mode = #tpu.pipeline_mode<synchronous>, transform_indices = @transform_5, window_bounds = array<i64: 512, 784>}, {pipeline_mode = #tpu.pipeline_mode<synchronous>, transform_indices = @transform_6, window_bounds = array<i64: 1, 784>}, {transform_indices = @transform_7, window_bounds = array<i64: 16, 784>}]} {
    %c0 = arith.constant 0 : index
    %c0_0 = arith.constant 0 : index
    %0 = vector.load %arg1[%c0, %c0_0] : memref<16x784xf32, #tpu.memory_space<vmem>>, vector<16x784xf32>
    %1 = arith.truncf %0 : vector<16x784xf32> to vector<16x784xbf16>
    %c0_1 = arith.constant 0 : index
    %c0_2 = arith.constant 0 : index
    %2 = vector.load %arg2[%c0_1, %c0_2] : memref<784x512xbf16, #tpu.memory_space<vmem>>, vector<784x512xbf16>
    %cst = arith.constant dense<0.000000e+00> : vector<16x512xf32>
    %3 = tpu.matmul %1, %2, %cst {dimension_numbers = #tpu.dot_dimension_numbers<[1], [0], [0], [1], [0, 0, 1, 1], [], []>} : vector<16x784xbf16>, vector<784x512xbf16>, vector<16x512xf32> -> vector<16x512xf32>
    %c0_3 = arith.constant 0 : index
    %c0_4 = arith.constant 0 : index
    %4 = vector.load %arg3[%c0_3, %c0_4] : memref<1x512xf32, #tpu.memory_space<vmem>>, vector<1x512xf32>
    %5 = vector.broadcast %4 : vector<1x512xf32> to vector<16x512xf32>
    %6 = arith.addf %3, %5 : vector<16x512xf32>
    %7 = arith.negf %6 : vector<16x512xf32>
    %8 = math.exp %7 : vector<16x512xf32>
    %cst_5 = arith.constant 1.000000e+00 : f32
    %9 = vector.broadcast %cst_5 : f32 to vector<16x512xf32>
    %10 = arith.addf %9, %8 : vector<16x512xf32>
    %11 = arith.divf %9, %10 : vector<16x512xf32>
    %12 = arith.truncf %11 : vector<16x512xf32> to vector<16x512xbf16>
    %c0_6 = arith.constant 0 : index
    %c0_7 = arith.constant 0 : index
    %13 = vector.load %arg4[%c0_6, %c0_7] : memref<512x512xbf16, #tpu.memory_space<vmem>>, vector<512x512xbf16>
    %cst_8 = arith.constant dense<0.000000e+00> : vector<16x512xf32>
    %14 = tpu.matmul %12, %13, %cst_8 {dimension_numbers = #tpu.dot_dimension_numbers<[1], [0], [0], [1], [0, 0, 1, 1], [], []>} : vector<16x512xbf16>, vector<512x512xbf16>, vector<16x512xf32> -> vector<16x512xf32>
    %c0_9 = arith.constant 0 : index
    %c0_10 = arith.constant 0 : index
    %15 = vector.load %arg5[%c0_9, %c0_10] : memref<1x512xf32, #tpu.memory_space<vmem>>, vector<1x512xf32>
    %16 = vector.broadcast %15 : vector<1x512xf32> to vector<16x512xf32>
    %17 = arith.addf %14, %16 : vector<16x512xf32>
    %18 = arith.negf %17 : vector<16x512xf32>
    %19 = math.exp %18 : vector<16x512xf32>
    %cst_11 = arith.constant 1.000000e+00 : f32
    %20 = vector.broadcast %cst_11 : f32 to vector<16x512xf32>
    %21 = arith.addf %20, %19 : vector<16x512xf32>
    %22 = arith.divf %20, %21 : vector<16x512xf32>
    %23 = arith.truncf %22 : vector<16x512xf32> to vector<16x512xbf16>
    %c0_12 = arith.constant 0 : index
    %c0_13 = arith.constant 0 : index
    %24 = vector.load %arg6[%c0_12, %c0_13] : memref<512x784xbf16, #tpu.memory_space<vmem>>, vector<512x784xbf16>
    %cst_14 = arith.constant dense<0.000000e+00> : vector<16x784xf32>
    %25 = tpu.matmul %23, %24, %cst_14 {dimension_numbers = #tpu.dot_dimension_numbers<[1], [0], [0], [1], [0, 0, 1, 1], [], []>} : vector<16x512xbf16>, vector<512x784xbf16>, vector<16x784xf32> -> vector<16x784xf32>
    %c0_15 = arith.constant 0 : index
    %c0_16 = arith.constant 0 : index
    %26 = vector.load %arg7[%c0_15, %c0_16] : memref<1x784xf32, #tpu.memory_space<vmem>>, vector<1x784xf32>
    %27 = vector.broadcast %26 : vector<1x784xf32> to vector<16x784xf32>
    %28 = arith.addf %25, %27 : vector<16x784xf32>
    %29 = arith.negf %28 : vector<16x784xf32>
    %30 = math.exp %29 : vector<16x784xf32>
    %cst_17 = arith.constant 1.000000e+00 : f32
    %31 = vector.broadcast %cst_17 : f32 to vector<16x784xf32>
    %32 = arith.addf %31, %30 : vector<16x784xf32>
    %33 = arith.divf %31, %32 : vector<16x784xf32>
    %c0_18 = arith.constant 0 : index
    %c0_19 = arith.constant 0 : index
    %34 = vector.load %arg8[%c0_18, %c0_19] : memref<16x784xf32, #tpu.memory_space<vmem>>, vector<16x784xf32>
    tpu.vector_store %arg8[%c0_18, %c0_19], %33 {strides = array<i32>} : memref<16x784xf32, #tpu.memory_space<vmem>>, vector<16x784xf32>,
    return
  }
  func.func @transform_0(%arg0: i32) -> (i32, i32) {
    %c0_i32 = arith.constant 0 : i32
    %c0_i32_0 = arith.constant 0 : i32
    return %arg0, %c0_i32 : i32, i32
  }
  func.func @transform_1(%arg0: i32) -> (i32, i32) {
    %c0_i32 = arith.constant 0 : i32
    %c0_i32_0 = arith.constant 0 : i32
    %c0_i32_1 = arith.constant 0 : i32
    return %c0_i32, %c0_i32_0 : i32, i32
  }
  func.func @transform_2(%arg0: i32) -> (i32, i32) {
    %c0_i32 = arith.constant 0 : i32
    %c0_i32_0 = arith.constant 0 : i32
    %c0_i32_1 = arith.constant 0 : i32
    return %c0_i32, %c0_i32_0 : i32, i32
  }
  func.func @transform_3(%arg0: i32) -> (i32, i32) {
    %c0_i32 = arith.constant 0 : i32
    %c0_i32_0 = arith.constant 0 : i32
    %c0_i32_1 = arith.constant 0 : i32
    return %c0_i32, %c0_i32_0 : i32, i32
  }
  func.func @transform_4(%arg0: i32) -> (i32, i32) {
    %c0_i32 = arith.constant 0 : i32
    %c0_i32_0 = arith.constant 0 : i32
    %c0_i32_1 = arith.constant 0 : i32
    return %c0_i32, %c0_i32_0 : i32, i32
  }
  func.func @transform_5(%arg0: i32) -> (i32, i32) {
    %c0_i32 = arith.constant 0 : i32
    %c0_i32_0 = arith.constant 0 : i32
    %c0_i32_1 = arith.constant 0 : i32
    return %c0_i32, %c0_i32_0 : i32, i32
  }
  func.func @transform_6(%arg0: i32) -> (i32, i32) {
    %c0_i32 = arith.constant 0 : i32
    %c0_i32_0 = arith.constant 0 : i32
    %c0_i32_1 = arith.constant 0 : i32
    return %c0_i32, %c0_i32_0 : i32, i32
  }
  func.func @transform_7(%arg0: i32) -> (i32, i32) {
    %c0_i32 = arith.constant 0 : i32
    %c0_i32_0 = arith.constant 0 : i32
    return %arg0, %c0_i32 : i32, i32
  }
}

</mosaic_0001>

<bundles_post_ra>
// kernel: forward.1
= control target key start
LH: loop header
LB: loop body
LE: loop exit
PB: predicated region body
PF: predicated region fallthrough
CT: control target
= control target key end

     0   :  { %s7588_s0 = inlined_call_operand.hbm [shape: f32[32,784], index: 0, kind: input, shape index: {}]   ;;  %s7589_s1 = inlined_call_operand.hbm [shape: bf16[784,512], index: 1, kind: input, shape index: {}]   ;;  %s7590_s2 = inlined_call_operand.hbm [shape: f32[1,512], index: 2, kind: input, shape index: {}]   ;;  %s7591_s3 = inlined_call_operand.hbm [shape: bf16[512,512], index: 3, kind: input, shape index: {}]   ;;  %s7592_s4 = inlined_call_operand.hbm [shape: f32[1,512], index: 4, kind: input, shape index: {}]   ;;  %s7593_s5 = inlined_call_operand.hbm [shape: bf16[512,784], index: 5, kind: input, shape index: {}]   ;;  %s7594_s6 = inlined_call_operand.hbm [shape: f32[1,784], index: 6, kind: input, shape index: {}]   ;;  %s7595_s7 = inlined_call_operand.hbm [shape: f32[32,784], index: 7, kind: output, shape index: {}]  }
   0x1   :  { %7599 = sst [smem:[#allocation20_spill]] %s7589_s1 }
   0x2   :  { %12 = vsyncpa [#allocation3], 0 }
   0x3   :  { %14 = vsyncpa [#allocation3 + $0x1], 0 }
   0x4   :  { %15 = vsyncpa [#allocation6], 0 }
   0x5   :  { %16 = vsyncpa [#allocation9], 0 }
   0x6   :  { %17 = vsyncpa [#allocation12], 0 }
   0x7   :  { %18 = vsyncpa [#allocation4], 0 }
   0x8   :  { %20 = vsyncpa [#allocation4 + $0x1], 0  ;;  %s7144_s24 = smov 0   ;;  %s7146_s25 = smov 0  }
   0x9   :  { %s7148_s26 = smov 0   ;;  %s7150_s27 = smov 0  }
   0xa LB: > { %s7087_s28 = smov [#allocation5]   ;;  %s7165_s30 = sadd.s32 4294967295, %s7085_s27   ;;  %s7085_s27 = sphi %s7150_s27, %s7622_s27   ;;  %s7081_s26 = sphi %s7148_s26, %s7621_s26   ;;  %s7077_s25 = sphi %s7146_s25, %s7620_s25   ;;  %s7073_s24 = sphi %s7144_s24, %s7619_s24  }
   0xb   : > { %s221_s29 = sshll.u32 %s7087_s28, 4  ;;  %p5044_p0 = scmp.ge.s32.totalorder %s7085_s27, 1  ;;  %s7170_s29 = int_to_ptr.vmem [resolvable:$true] %s221_s29 }
   0xc   : > { %p7596_p1 = scmp.eq.s32.totalorder %s7165_s30, 0  ;;  %p209_p2 = scmp.lt.s32.totalorder %s7085_s27, 3 }
   0xd   : > { %s7088_s9 = smov [#allocation8]   ;;  %s7089_s12 = smov [#allocation11]  }
   0xe   : > { %p7172_p3 = pnand %p5044_p0, %p209_p2  ;;  %s245_s10 = sshll.u32 %s7088_s9, 4  ;;  %s7185_s10 = int_to_ptr.vmem [resolvable:$true] %s245_s10 }
   0xf   : > { %s269_s13 = sshll.u32 %s7089_s12, 4  ;;  %s7602_s1 = sld [smem:[#allocation20_spill]]  ;;  %s7187_s13 = int_to_ptr.vmem [resolvable:$true] %s269_s13 }
  0x10   : > { %s7600_s8 = scalar_select %p7172_p3, 1, 0 }
  0x11   : > { %p5795_p5 = pneg %p7172_p3 }
  0x13   : > { %p7181_p6 = pnand %p5795_p5, %p7596_p1 }
  0x15   : > { %s6809_s16 = scalar_lea.hbm %s7602_s1, 25088  ;;  %p7197_p8 = pneg %p7181_p6 }
  0x16   : > { %p6810_p7 = scmp.ne.s32.totalorder %s7602_s1, %s6809_s16  ;;  %p6816_p11 = scmp.lt.u32.totalorder %s6809_s16, %s7602_s1 }
  0x18   : > { %p6812_p9 = pnand %p7197_p8, %p6810_p7 }
  0x1a   : > { %p6813_p10 = pneg %p6812_p9 }
  0x1c   : > { %p6818_p12 = pnand %p6816_p11, %p6813_p10 }
  0x1e   : > { %6821 = shalt.err (!%p6818_p12)
}
  0x1f   : > { %s6822_s22 = scalar_lea.vmem %s7170_s29, 25088  ;;  %p6830_p5 = scmp.lt.s32.totalorder %s7170_s29, %s7170_s29 }
  0x20   : > { %p6823_p13 = scmp.ne.s32.totalorder %s7170_s29, %s6822_s22  ;;  %p6831_p4 = scmp.lt.s32.totalorder %s6822_s22, %s6822_s22 }
  0x22   : > { %p6825_p0 = pnand %p6823_p13, %p7197_p8  ;;  %p6832_p7 = por %p6831_p4, %p6830_p5 }
  0x24   : > { %p6826_p2 = pneg %p6825_p0 }
  0x26   : > { %p6833_p9 = pnand %p6832_p7, %p6826_p2 }
  0x28   : > { %6836 = shalt.err (!%p6833_p9)
}
  0x29   : > { %s7090_s23 = smov 256   ;;  %s7091_s28 = smov 16  }
  0x2a   : > { %5798 = dma.hbm_to_vmem [thread:$0]  (!%p7181_p6), %s7602_s1, 25088, %s7170_s29, [#allocation6], %s7090_s23, %s7090_s23, %s7091_s28  }
  0x2b   : > { %s6837_s16 = scalar_lea.hbm %s7591_s3, 16384 }
  0x2c   : > { %p6838_p4 = scmp.ne.s32.totalorder %s7591_s3, %s6837_s16  ;;  %p6844_p12 = scmp.lt.u32.totalorder %s6837_s16, %s7591_s3 }
  0x2e   : > { %p6840_p10 = pnand %p6838_p4, %p7197_p8 }
  0x30   : > { %p6841_p11 = pneg %p6840_p10 }
  0x32   : > { %p6846_p13 = pnand %p6844_p12, %p6841_p11 }
  0x34   : > { %6849 = shalt.err (!%p6846_p13)
}
  0x35   : > { %s6850_s29 = scalar_lea.vmem %s7185_s10, 16384  ;;  %p6858_p7 = scmp.lt.s32.totalorder %s7185_s10, %s7185_s10 }
  0x36   : > { %p6851_p0 = scmp.ne.s32.totalorder %s7185_s10, %s6850_s29  ;;  %p6859_p9 = scmp.lt.s32.totalorder %s6850_s29, %s6850_s29 }
  0x38   : > { %p6853_p2 = pnand %p6851_p0, %p7197_p8  ;;  %p6860_p4 = por %p6859_p9, %p6858_p7 }
  0x3a   : > { %p6854_p5 = pneg %p6853_p2 }
  0x3c   : > { %p6861_p10 = pnand %p6860_p4, %p6854_p5 }
  0x3e   : > { %6864 = shalt.err (!%p6861_p10)
}
  0x3f   : > { %5804 = dma.hbm_to_vmem [thread:$0]  (!%p7181_p6), %s7591_s3, 16384, %s7185_s10, [#allocation9], %s7090_s23, %s7090_s23, %s7091_s28  }
  0x40   : > { %s6865_s15 = scalar_lea.hbm %s7593_s5, 28672 }
  0x41   : > { %p6866_p11 = scmp.ne.s32.totalorder %s7593_s5, %s6865_s15  ;;  %p6872_p0 = scmp.lt.u32.totalorder %s6865_s15, %s7593_s5 }
  0x43   : > { %p6868_p12 = pnand %p6866_p11, %p7197_p8 }
  0x45   : > { %p6869_p13 = pneg %p6868_p12 }
  0x47   : > { %p6874_p2 = pnand %p6872_p0, %p6869_p13 }
  0x49   : > { %6877 = shalt.err (!%p6874_p2)
}
  0x4a   : > { %s6878_s10 = scalar_lea.vmem %s7187_s13, 28672  ;;  %p6886_p4 = scmp.lt.s32.totalorder %s7187_s13, %s7187_s13 }
  0x4b   : > { %p6879_p5 = scmp.ne.s32.totalorder %s7187_s13, %s6878_s10  ;;  %p6887_p10 = scmp.lt.s32.totalorder %s6878_s10, %s6878_s10 }
  0x4d   : > { %p6881_p7 = pnand %p6879_p5, %p7197_p8  ;;  %p6888_p11 = por %p6887_p10, %p6886_p4 }
  0x4f   : > { %p6882_p9 = pneg %p6881_p7 }
  0x51   : > { %p6889_p12 = pnand %p6888_p11, %p6882_p9 }
  0x53   : > { %6892 = shalt.err (!%p6889_p12)
}
  0x54   : > { %s7092_s23 = smov 448   ;;  %s7093_s28 = smov 28  }
  0x55   : > { %5810 = dma.hbm_to_vmem [thread:$0]  (!%p7181_p6), %s7593_s5, 28672, %s7187_s13, [#allocation12], %s7092_s23, %s7092_s23, %s7093_s28  }
  0x56   : > { %s7094_s22 = smov [#allocation7]   ;;  %s7095_s12 = smov [#allocation10]  }
  0x57   : > { %s235_s9 = sshll.u32 %s7094_s22, 4  ;;  %s259_s14 = sshll.u32 %s7095_s12, 4  ;;  %s236_s9 = int_to_ptr.vmem [resolvable:$true] %s235_s9  ;;  %s260_s14 = int_to_ptr.vmem [resolvable:$true] %s259_s14 }
  0x58   : > { %s6893_s17 = scalar_lea.hbm %s7590_s2, 64 }
  0x59   : > { %p6894_p13 = scmp.ne.s32.totalorder %s7590_s2, %s6893_s17  ;;  %p6900_p5 = scmp.lt.u32.totalorder %s6893_s17, %s7590_s2 }
  0x5b   : > { %p6896_p0 = pnand %p6894_p13, %p7197_p8 }
  0x5d   : > { %p6897_p2 = pneg %p6896_p0 }
  0x5f   : > { %p6902_p7 = pnand %p6900_p5, %p6897_p2 }
  0x61   : > { %6905 = shalt.err (!%p6902_p7)
}
  0x62   : > { %s6906_s13 = scalar_lea.vmem %s236_s9, 64  ;;  %p6914_p11 = scmp.lt.s32.totalorder %s236_s9, %s236_s9 }
  0x63   : > { %p6907_p9 = scmp.ne.s32.totalorder %s236_s9, %s6906_s13  ;;  %p6915_p12 = scmp.lt.s32.totalorder %s6906_s13, %s6906_s13 }
  0x65   : > { %p6909_p4 = pnand %p6907_p9, %p7197_p8  ;;  %p6916_p1 = por %p6915_p12, %p6914_p11 }
  0x67   : > { %p6910_p10 = pneg %p6909_p4 }
  0x69   : > { %p6917_p3 = pnand %p6916_p1, %p6910_p10 }
  0x6b   : > { %6920 = shalt.err (!%p6917_p3)
}
  0x6c   : > { %5801 = dma.hbm_to_vmem [thread:$0]  (!%p7181_p6), %s7590_s2, 64, %s236_s9, [#allocation6]  }
  0x6d   : > { %s6921_s29 = scalar_lea.hbm %s7592_s4, 64 }
  0x6e   : > { %p6922_p13 = scmp.ne.s32.totalorder %s7592_s4, %s6921_s29  ;;  %p6928_p3 = scmp.lt.u32.totalorder %s6921_s29, %s7592_s4 }
  0x70   : > { %p6924_p0 = pnand %p6922_p13, %p7197_p8 }
  0x72   : > { %p6925_p1 = pneg %p6924_p0 }
  0x74   : > { %p6930_p2 = pnand %p6928_p3, %p6925_p1 }
  0x76   : > { %6933 = shalt.err (!%p6930_p2)
}
  0x77   : > { %s6934_s17 = scalar_lea.vmem %s260_s14, 64  ;;  %p6942_p4 = scmp.lt.s32.totalorder %s260_s14, %s260_s14 }
  0x78   : > { %p6935_p5 = scmp.ne.s32.totalorder %s260_s14, %s6934_s17  ;;  %p6943_p10 = scmp.lt.s32.totalorder %s6934_s17, %s6934_s17 }
  0x7a   : > { %p6937_p7 = pnand %p6935_p5, %p7197_p8  ;;  %p6944_p11 = por %p6943_p10, %p6942_p4 }
  0x7c   : > { %p6938_p9 = pneg %p6937_p7 }
  0x7e   : > { %p6945_p12 = pnand %p6944_p11, %p6938_p9 }
  0x80   : > { %6948 = shalt.err (!%p6945_p12)
}
  0x81   : > { %5807 = dma.hbm_to_vmem [thread:$0]  (!%p7181_p6), %s7592_s4, 64, %s260_s14, [#allocation9]  }
  0x82   : > { %s7096_s20 = smov [#allocation13]   ;;  %s6949_s28 = scalar_lea.hbm %s7594_s6, 112 }
  0x83   : > { %s283_s10 = sshll.u32 %s7096_s20, 4  ;;  %p6950_p13 = scmp.ne.s32.totalorder %s7594_s6, %s6949_s28  ;;  %s284_s10 = int_to_ptr.vmem [resolvable:$true] %s283_s10 }
  0x84   : > { %p6956_p3 = scmp.lt.u32.totalorder %s6949_s28, %s7594_s6 }
  0x85   : > { %p6952_p0 = pnand %p6950_p13, %p7197_p8 }
  0x87   : > { %p6953_p1 = pneg %p6952_p0 }
  0x89   : > { %p6958_p2 = pnand %p6956_p3, %p6953_p1 }
  0x8b   : > { %6961 = shalt.err (!%p6958_p2)
}
  0x8c   : > { %s6962_s14 = scalar_lea.vmem %s284_s10, 112  ;;  %s6969_s12 = scalar_lea.vmem %s284_s10, 128 }
  0x8d   : > { %p6963_p5 = scmp.ne.s32.totalorder %s284_s10, %s6962_s14  ;;  %p6970_p4 = scmp.lt.s32.totalorder %s284_s10, %s284_s10 }
  0x8e   : > { %p6971_p10 = scmp.lt.s32.totalorder %s6969_s12, %s6962_s14 }
  0x8f   : > { %p6965_p7 = pnand %p6963_p5, %p7197_p8 }
  0x90   : > { %p6972_p11 = por %p6971_p10, %p6970_p4 }
  0x91   : > { %p6966_p9 = pneg %p6965_p7 }
  0x93   : > { %p6973_p12 = pnand %p6972_p11, %p6966_p9 }
  0x95   : > { %6976 = shalt.err (!%p6973_p12)
}
  0x96   : > { %5813 = dma.hbm_to_vmem [thread:$0]  (!%p7181_p6), %s7594_s6, 112, %s284_s10, [#allocation12]  }
  0x97   : > { %s5043_s19 = sadd.s32 4294967294, %s7085_s27   ;;  %s7320_s11 = sadd.s32 1, %s7085_s27  }
  0x98   : > { %s30_s17 = ssub.s32 %s7085_s27, %s7320_s11  ;;  %s33_s9 = sadd.s32 1, %s7081_s26 }
  0x99   : > { %p31_p8 = scmp.eq.s32.totalorder %s30_s17, 0  ;;  %p40_p13 = scmp.ne.s32.totalorder %s7081_s26, %s7077_s25 }
  0x9a   : > { %p41_p0 = scmp.eq.s32.totalorder %s7085_s27, 0  ;;  %p46_p1 = scmp.ne.s32.totalorder %s7077_s25, %s7073_s24 }
  0x9b   : > { %s7331_s18 = scalar_select %p31_p8, %s7081_s26, %s33_s9  }
  0x9c   : > { %p42_p3 = por %p41_p0, %p40_p13  ;;  %p7604_p2 = scmp.eq.s32.totalorder %s7165_s30, 0 }
  0x9d   : > { %p196_p6 = scmp.eq.s32.totalorder %s7165_s30, 1  ;;  %p202_p7 = scmp.eq.s32.totalorder %s5043_s19, 1 }
  0x9e   : > { %p7335_p5 = por %p7604_p2, %p46_p1  ;;  %p5828_p9 = scmp.lt.s32.totalorder %s7085_s27, 2 }
  0x9f   : > { %s294_s10 = sand.u32 1, %s7081_s26   ;;  %p7342_p4 = por %p196_p6, %p40_p13 }
  0xa0   : > { %p7346_p10 = por %p202_p7, %p46_p1  ;;  %s5763_s28 = smul.u32 112, %s294_s10 }
  0xa1   : > { %s7606_s13 = scalar_select %p7342_p4, 1, 0 }
  0xa2   : > { %s7607_s23 = scalar_select %p7346_p10, 1, 0 }
  0xa3   : > { %s5764_s1 = smul.u32 1792, %s7085_s27  ;;  %p7351_p11 = pnand %p5828_p9, %p42_p3 }
  0xa4   : > { %s298_s12 = scalar_lea.vmem [#allocation2], %s5763_s28  ;;  %s7362_s16 = scalar_lea.sflag [#allocation3], %s294_s10 }
  0xa5   : > { %s7358_s14 = scalar_lea.hbm %s7588_s0, %s5764_s1  ;;  %s306_s15 = sshll.u32 %s298_s12, 4  ;;  %s7360_s15 = int_to_ptr.vmem [resolvable:$true] %s306_s15 }
  0xa6   : > { %s6977_s19 = scalar_lea.hbm %s7358_s14, 1792  ;;  %p6979_p8 = pneg %p7351_p11 }
  0xa7   : > { %p6978_p12 = scmp.ne.s32.totalorder %s7358_s14, %s6977_s19  ;;  %s6982_s1 = scalar_lea.hbm %s7588_s0, 3584 }
  0xa8   : > { %p6983_p1 = scmp.lt.u32.totalorder %s7358_s14, %s7588_s0  ;;  %p6984_p3 = scmp.lt.u32.totalorder %s6982_s1, %s6977_s19 }
  0xa9   : > { %p6980_p13 = pnand %p6979_p8, %p6978_p12  ;;  %p6986_p6 = scmp.lt.u32.totalorder %s6977_s19, %s7358_s14 }
  0xaa   : > { %p6985_p2 = por %p6984_p3, %p6983_p1 }
  0xab   : > { %p6981_p0 = pneg %p6980_p13 }
  0xac   : > { %p6987_p7 = por %p6986_p6, %p6985_p2 }
  0xae   : > { %p6988_p9 = pnand %p6987_p7, %p6981_p0 }
  0xb0   : > { %6991 = shalt.err (!%p6988_p9)
}
  0xb1   : > { %s6992_s10 = scalar_lea.vmem %s7360_s15, 1792  ;;  %s7097_s28 = smov [#allocation2]  }
  0xb2   : > { %p6993_p12 = scmp.ne.s32.totalorder %s7360_s15, %s6992_s10  ;;  %s6997_s12 = sshll.u32 %s7097_s28, 4  ;;  %s6998_s12 = int_to_ptr.vmem [resolvable:$false] %s6997_s12 }
  0xb3   : > { %s6999_s17 = scalar_lea.vmem %s6998_s12, 3584  ;;  %p7000_p4 = scmp.lt.s32.totalorder %s7360_s15, %s6998_s12 }
  0xb4   : > { %p6995_p13 = pnand %p6993_p12, %p6979_p8  ;;  %p7001_p1 = scmp.lt.s32.totalorder %s6999_s17, %s6992_s10 }
  0xb6   : > { %p6996_p10 = pneg %p6995_p13  ;;  %p7002_p3 = por %p7001_p1, %p7000_p4 }
  0xb8   : > { %p7003_p2 = pnand %p7002_p3, %p6996_p10 }
  0xba   : > { %7006 = shalt.err (!%p7003_p2)
}
  0xbb   : > { %s7098_s19 = smov 896   ;;  %s7099_s9 = smov 56  }
  0xbc   : > { %5817 = dma.hbm_to_vmem [thread:$0]  (!%p7351_p11), %s7358_s14, 1792, %s7360_s15, %s7362_s16, %s7098_s19, %s7098_s19, %s7099_s9  }
  0xbd   : > { %p7609_p8 = scmp.ne.s32.totalorder %s7600_s8, 0 }
  0xbe   : > { %s7393_s1 = sand.u32 (!%p7609_p8), 1, %s7077_s25  }
  0xbf   : > { %318 = sbr.rel (%p7609_p8) target bundleno = 1413 (0x585), region = 48  ;;  %s321_s22 = scalar_lea.sflag (!%p7609_p8), [#allocation3], %s7393_s1 }
  0xc0   : > { %s5765_s29 = smul.u32 (!%p7609_p8), 112, %s7393_s1 }
  0xc2   : > { %s7399_s10 = scalar_lea.vmem (!%p7609_p8), [#allocation2], %s5765_s29 }
  0xc6   : > { %7052 = dma.done.wait (%p7335_p5), %s321_s22, 1792  }
  0xc7   : > { %7054 = vsyncadd (%p7335_p5), %s321_s22, 4294965504  ;;  %p7610_p4 = scmp.eq.s32.totalorder %s7165_s30, 0 }
  0xc9   : > { %7056 = dma.done.wait (%p7610_p4), [#allocation6], 25152   ;;  %p7611_p10 = pmov %p7610_p4 }
  0xca   : > { %p7612_p11 = pmov %p7610_p4 }
  0xcb   : > { %7058 = vsyncadd (%p7611_p10), [#allocation6], 4294942144 }
  0xcc   : > { %7060 = dma.done.wait (%p7612_p11), [#allocation9], 16448   ;;  %p7613_p0 = pmov %p7610_p4 }
  0xce   : > { %7062 = vsyncadd (%p7613_p0), [#allocation9], 4294950848  ;;  %p7614_p6 = pmov %p7613_p0 }
  0xcf   : > { %p7615_p7 = pmov %p7613_p0 }
  0xd0   : > { %7064 = dma.done.wait (%p7614_p6), [#allocation12], 28784  }
  0xd1   : > { %7066 = vsyncadd (%p7615_p7), [#allocation12], 4294938512  ;;  %v7100_v0 = vmov 0   ;;  %v5883_v1 = vld [vmem:[#allocation5 + $0x4] ss:$16 sps:$4 sm:$0xff]   ;;  %v395_v10 = vld [vmem:[%s7399_s10 + $0x68] sm:$0xff] }
  0xd2   : > { %1766 = vmatprep.mubr.bf16.mxu1 %v7100_v0  ;;  %v5885_v2 = vld [vmem:[#allocation5 + $0x604] ss:$16 sps:$4 sm:$0xff]   ;;  %1605 = vmatprep.subr.bf16.mxu0 %v5883_v1  ;;  %v5887_v3 = vld [vmem:[#allocation5] ss:$16 sps:$4 sm:$0xff]   ;;  %v5891_v6 = vld [vmem:[#allocation5 + $0x8] ss:$16 sps:$4 sm:$0xff]  }
  0xd3   : > { %v5888_v4 = vld [vmem:[#allocation5 + $0x600] ss:$16 sps:$4 sm:$0xff]   ;;  %1734 = vmatprep.subr.bf16.mxu1 %v5885_v2  ;;  %v5889_v5 = vld [vmem:[#allocation5 + $0x24] ss:$16 sps:$4 sm:$0xff]   ;;  %1606 = vmatpush1.bf16.msra.mxu0 %v5887_v3  ;;  %v5893_v7 = vld [vmem:[#allocation5 + $0xc] ss:$16 sps:$4 sm:$0xff]  }
  0xd4   : > { %1735 = vmatpush1.bf16.msra.mxu1 %v5888_v4  ;;  %1607 = vmatprep.subr.bf16.mxu0 %v5889_v5  ;;  %v5894_v8 = vld [vmem:[#allocation5 + $0x20] ss:$16 sps:$4 sm:$0xff]   ;;  %vm1601_vm0 = vcmask 130048   ;;  %v5895_v12 = vld [vmem:[#allocation5 + $0x44] ss:$16 sps:$4 sm:$0xff]   ;;  %v383_v51 = vld [vmem:[%s7399_s10 + $0x8] sm:$0xff] }
  0xd5   : > { %v388_v9 = vld [vmem:[%s7399_s10 + $0x30] sm:$0xff]  ;;  %1777 = vmatprep.subr.bf16.mxu1 %v5893_v7  ;;  %v5897_v13 = vld [vmem:[#allocation5 + $0x28] ss:$16 sps:$4 sm:$0xff]   ;;  %v5899_v14 = vld [vmem:[#allocation5 + $0x2c] ss:$16 sps:$4 sm:$0xff]   ;;  %s7513_s8 = scalar_lea.vmem [#allocation14], %s5765_s29 }
  0xd6   : > { %v7420_v11 = vpack.c.bf16 %v395_v10, %v388_v9  ;;  %v5900_v15 = vld [vmem:[#allocation5 + $0x40] ss:$16 sps:$4 sm:$0xff]   ;;  %v5901_v16 = vld [vmem:[#allocation5 + $0x64] ss:$16 sps:$4 sm:$0xff]   ;;  %v5905_v17 = vld [vmem:[#allocation5 + $0x4c] ss:$16 sps:$4 sm:$0xff]  }
  0xd7   : > { %1608 = vmatpush1.bf16.msra.mxu0 %v5894_v8  ;;  %v5906_v18 = vld [vmem:[#allocation5 + $0x60] ss:$16 sps:$4 sm:$0xff]   ;;  %v5903_v19 = vld [vmem:[#allocation5 + $0x48] ss:$16 sps:$4 sm:$0xff]   ;;  %v5907_v20 = vld [vmem:[#allocation5 + $0x84] ss:$16 sps:$4 sm:$0xff]  }
  0xd8   : > { %5258 = vmatmul.mubr.msk.bf16.vlgmr.msra.gmra.mrb[0].mxu1 %vm1601_vm0, %v7420_v11  ;;  %1609 = vmatprep.subr.bf16.mxu0 %v5895_v12  ;;  %v5911_v21 = vld [vmem:[#allocation5 + $0x6c] ss:$16 sps:$4 sm:$0xff]   ;;  %v5909_v22 = vld [vmem:[#allocation5 + $0x68] ss:$16 sps:$4 sm:$0xff]   ;;  %v5912_v23 = vld [vmem:[#allocation5 + $0x80] ss:$16 sps:$4 sm:$0xff]  }
  0xd9   : > { %1778 = vmatpush1.bf16.msra.mxu1 %v5891_v6  ;;  %v5913_v24 = vld [vmem:[#allocation5 + $0xa4] ss:$16 sps:$4 sm:$0xff]   ;;  %v5917_v25 = vld [vmem:[#allocation5 + $0x8c] ss:$16 sps:$4 sm:$0xff]   ;;  %v5918_v26 = vld [vmem:[#allocation5 + $0xa0] ss:$16 sps:$4 sm:$0xff]  }
  0xda   : > { %1779 = vmatprep.subr.bf16.mxu1 %v5899_v14  ;;  %v5915_v27 = vld [vmem:[#allocation5 + $0x88] ss:$16 sps:$4 sm:$0xff]   ;;  %v5919_v28 = vld [vmem:[#allocation5 + $0xc4] ss:$16 sps:$4 sm:$0xff]   ;;  %v5923_v29 = vld [vmem:[#allocation5 + $0xac] ss:$16 sps:$4 sm:$0xff]  }
  0xdb   : > { %1610 = vmatpush1.bf16.msra.mxu0 %v5900_v15  ;;  %v5921_v30 = vld [vmem:[#allocation5 + $0xa8] ss:$16 sps:$4 sm:$0xff]   ;;  %v5924_v31 = vld [vmem:[#allocation5 + $0xc0] ss:$16 sps:$4 sm:$0xff]   ;;  %v5925_v32 = vld [vmem:[#allocation5 + $0xe4] ss:$16 sps:$4 sm:$0xff]  }
  0xdc   : > { %1611 = vmatprep.subr.bf16.mxu0 %v5901_v16  ;;  %v5929_v33 = vld [vmem:[#allocation5 + $0xcc] ss:$16 sps:$4 sm:$0xff]   ;;  %v5930_v34 = vld [vmem:[#allocation5 + $0xe0] ss:$16 sps:$4 sm:$0xff]   ;;  %v5927_v35 = vld [vmem:[#allocation5 + $0xc8] ss:$16 sps:$4 sm:$0xff]  }
  0xdd   : > { %1780 = vmatpush1.bf16.msra.mxu1 %v5897_v13  ;;  %v5931_v36 = vld [vmem:[#allocation5 + $0x104] ss:$16 sps:$4 sm:$0xff]   ;;  %v5935_v37 = vld [vmem:[#allocation5 + $0xec] ss:$16 sps:$4 sm:$0xff]   ;;  %v5933_v38 = vld [vmem:[#allocation5 + $0xe8] ss:$16 sps:$4 sm:$0xff]  }
  0xde   : > { %1781 = vmatprep.subr.bf16.mxu1 %v5905_v17  ;;  %v5936_v39 = vld [vmem:[#allocation5 + $0x100] ss:$16 sps:$4 sm:$0xff]   ;;  %v5937_v40 = vld [vmem:[#allocation5 + $0x124] ss:$16 sps:$4 sm:$0xff]   ;;  %v5941_v41 = vld [vmem:[#allocation5 + $0x10c] ss:$16 sps:$4 sm:$0xff]  }
  0xdf   : > { %1612 = vmatpush1.bf16.msra.mxu0 %v5906_v18  ;;  %v5942_v42 = vld [vmem:[#allocation5 + $0x120] ss:$16 sps:$4 sm:$0xff]   ;;  %v5939_v43 = vld [vmem:[#allocation5 + $0x108] ss:$16 sps:$4 sm:$0xff]   ;;  %v5943_v44 = vld [vmem:[#allocation5 + $0x144] ss:$16 sps:$4 sm:$0xff]  }
  0xe0   : > { %1613 = vmatprep.subr.bf16.mxu0 %v5907_v20  ;;  %v5947_v45 = vld [vmem:[#allocation5 + $0x12c] ss:$16 sps:$4 sm:$0xff]   ;;  %v5945_v46 = vld [vmem:[#allocation5 + $0x128] ss:$16 sps:$4 sm:$0xff]   ;;  %v5948_v47 = vld [vmem:[#allocation5 + $0x140] ss:$16 sps:$4 sm:$0xff]  }
  0xe1   : > { %1782 = vmatpush1.bf16.msra.mxu1 %v5903_v19  ;;  %v5949_v48 = vld [vmem:[#allocation5 + $0x164] ss:$16 sps:$4 sm:$0xff]   ;;  %v5953_v49 = vld [vmem:[#allocation5 + $0x14c] ss:$16 sps:$4 sm:$0xff]   ;;  %v5951_v50 = vld [vmem:[#allocation5 + $0x148] ss:$16 sps:$4 sm:$0xff]  }
  0xe2   : > { %1783 = vmatprep.subr.bf16.mxu1 %v5911_v21  ;;  %v390_v52 = vld [vmem:[%s7399_s10 + $0x40] sm:$0xff]  ;;  %v5959_v56 = vld [vmem:[#allocation5 + $0x16c] ss:$16 sps:$4 sm:$0xff]   ;;  %v5957_v58 = vld [vmem:[#allocation5 + $0x168] ss:$16 sps:$4 sm:$0xff]   ;;  %s5766_s20 = smul.u32 1792, %s7165_s30 }
  0xe3   : > { %1614 = vmatpush1.bf16.msra.mxu0 %v5912_v23  ;;  %v5954_v53 = vld [vmem:[#allocation5 + $0x160] ss:$16 sps:$4 sm:$0xff]   ;;  %v397_v54 = vpack.c.bf16 %v390_v52, %v383_v51  ;;  %v5955_v55 = vld [vmem:[#allocation5 + $0x184] ss:$16 sps:$4 sm:$0xff]   ;;  %v5965_v60 = vld [vmem:[#allocation5 + $0x18c] ss:$16 sps:$4 sm:$0xff]  }
  0xe4   : > { %1615 = vmatprep.subr.bf16.mxu0 %v5913_v24  ;;  %v5960_v57 = vld [vmem:[#allocation5 + $0x180] ss:$16 sps:$4 sm:$0xff]   ;;  %v5961_v59 = vld [vmem:[#allocation5 + $0x1a4] ss:$16 sps:$4 sm:$0xff]   ;;  %v5963_v62 = vld [vmem:[#allocation5 + $0x188] ss:$16 sps:$4 sm:$0xff]   ;;  %s7539_s16 = scalar_lea.hbm %s7595_s7, %s5766_s20 }
  0xe5   : > { %1784 = vmatpush1.bf16.msra.mxu1 %v5909_v22  ;;  %1637 = vmatprep.mubr.bf16.mxu0 %v397_v54  ;;  %v5966_v61 = vld [vmem:[#allocation5 + $0x1a0] ss:$16 sps:$4 sm:$0xff]   ;;  %v5967_v63 = vld [vmem:[#allocation5 + $0x1c4] ss:$16 sps:$4 sm:$0xff]   ;;  %v5971_v1 = vld [vmem:[#allocation5 + $0x1ac] ss:$16 sps:$4 sm:$0xff]  }
  0xe6   : > { %1785 = vmatprep.subr.bf16.mxu1 %v5917_v25  ;;  %1809 = vmatprep.mubr.bf16.mxu1 %v397_v54  ;;  %v5972_v2 = vld [vmem:[#allocation5 + $0x1c0] ss:$16 sps:$4 sm:$0xff]   ;;  %v5969_v3 = vld [vmem:[#allocation5 + $0x1a8] ss:$16 sps:$4 sm:$0xff]   ;;  %v5973_v4 = vld [vmem:[#allocation5 + $0x1e4] ss:$16 sps:$4 sm:$0xff]  }
  0xe7   : > { %1616 = vmatpush1.bf16.msra.mxu0 %v5918_v26  ;;  %v5977_v5 = vld [vmem:[#allocation5 + $0x1cc] ss:$16 sps:$4 sm:$0xff]   ;;  %v5978_v6 = vld [vmem:[#allocation5 + $0x1e0] ss:$16 sps:$4 sm:$0xff]   ;;  %v5975_v9 = vld [vmem:[#allocation5 + $0x1c8] ss:$16 sps:$4 sm:$0xff]  }
  0xe8   : > { %1617 = vmatprep.subr.bf16.mxu0 %v5919_v28  ;;  %v382_v7 = vld [vmem:[%s7399_s10] sm:$0xff]  ;;  %v389_v8 = vld [vmem:[%s7399_s10 + $0x38] sm:$0xff]  ;;  %s4913_s21 = sshll.u32 %s7513_s8, 4  ;;  %s4899_s30 = scalar_lea.sflag [#allocation4], %s7393_s1  ;;  %s7542_s21 = int_to_ptr.vmem [resolvable:$true] %s4913_s21 }
  0xe9   : > { %1786 = vmatpush1.bf16.msra.mxu1 %v5915_v27  ;;  %v5981_v10 = vld [vmem:[#allocation5 + $0x204] ss:$16 sps:$4 sm:$0xff]   ;;  %v5984_v12 = vld [vmem:[#allocation5 + $0x1ec] ss:$16 sps:$4 sm:$0xff]   ;;  %v396_v13 = vpack.c.bf16 %v389_v8, %v382_v7  ;;  %v5979_v14 = vld [vmem:[#allocation5 + $0x200] ss:$16 sps:$4 sm:$0xff]  }
  0xea   : > { %1787 = vmatprep.subr.bf16.mxu1 %v5923_v29  ;;  %v5982_v15 = vld [vmem:[#allocation5 + $0x1e8] ss:$16 sps:$4 sm:$0xff]   ;;  %v5987_v16 = vld [vmem:[#allocation5 + $0x224] ss:$16 sps:$4 sm:$0xff]   ;;  %v5990_v17 = vld [vmem:[#allocation5 + $0x20c] ss:$16 sps:$4 sm:$0xff]  }
  0xeb   : > { %1618 = vmatpush1.bf16.msra.mxu0 %v5924_v31  ;;  %v5985_v18 = vld [vmem:[#allocation5 + $0x220] ss:$16 sps:$4 sm:$0xff]   ;;  %v5988_v19 = vld [vmem:[#allocation5 + $0x208] ss:$16 sps:$4 sm:$0xff]   ;;  %v5993_v20 = vld [vmem:[#allocation5 + $0x244] ss:$16 sps:$4 sm:$0xff]  }
  0xec   : > { %1619 = vmatprep.subr.bf16.mxu0 %v5925_v32  ;;  %v5996_v21 = vld [vmem:[#allocation5 + $0x22c] ss:$16 sps:$4 sm:$0xff]   ;;  %v5991_v22 = vld [vmem:[#allocation5 + $0x240] ss:$16 sps:$4 sm:$0xff]   ;;  %v5994_v23 = vld [vmem:[#allocation5 + $0x228] ss:$16 sps:$4 sm:$0xff]  }
  0xed   : > { %1788 = vmatpush1.bf16.msra.mxu1 %v5921_v30  ;;  %v5999_v24 = vld [vmem:[#allocation5 + $0x264] ss:$16 sps:$4 sm:$0xff]   ;;  %v6002_v25 = vld [vmem:[#allocation5 + $0x24c] ss:$16 sps:$4 sm:$0xff]   ;;  %v5997_v26 = vld [vmem:[#allocation5 + $0x260] ss:$16 sps:$4 sm:$0xff]  }
  0xee   : > { %1789 = vmatprep.subr.bf16.mxu1 %v5929_v33  ;;  %v6000_v27 = vld [vmem:[#allocation5 + $0x248] ss:$16 sps:$4 sm:$0xff]   ;;  %v6005_v28 = vld [vmem:[#allocation5 + $0x284] ss:$16 sps:$4 sm:$0xff]   ;;  %v6008_v29 = vld [vmem:[#allocation5 + $0x26c] ss:$16 sps:$4 sm:$0xff]  }
  0xef   : > { %1620 = vmatpush1.bf16.msra.mxu0 %v5930_v34  ;;  %v6003_v30 = vld [vmem:[#allocation5 + $0x280] ss:$16 sps:$4 sm:$0xff]   ;;  %v6006_v31 = vld [vmem:[#allocation5 + $0x268] ss:$16 sps:$4 sm:$0xff]   ;;  %v6011_v32 = vld [vmem:[#allocation5 + $0x2a4] ss:$16 sps:$4 sm:$0xff]  }
  0xf0   : > { %1621 = vmatprep.subr.bf16.mxu0 %v5931_v36  ;;  %v6014_v33 = vld [vmem:[#allocation5 + $0x28c] ss:$16 sps:$4 sm:$0xff]   ;;  %v6009_v34 = vld [vmem:[#allocation5 + $0x2a0] ss:$16 sps:$4 sm:$0xff]   ;;  %v6017_v36 = vld [vmem:[#allocation5 + $0x2c4] ss:$16 sps:$4 sm:$0xff]  }
  0xf1   : > { %1790 = vmatpush1.bf16.msra.mxu1 %v5927_v35  ;;  %v6012_v35 = vld [vmem:[#allocation5 + $0x288] ss:$16 sps:$4 sm:$0xff]   ;;  %v6035_v51 = vld [vmem:[#allocation5 + $0x324] ss:$16 sps:$4 sm:$0xff]   ;;  %v6038_v52 = vld [vmem:[#allocation5 + $0x30c] ss:$16 sps:$4 sm:$0xff]  }
  0xf2   : > { %1791 = vmatprep.subr.bf16.mxu1 %v5935_v37  ;;  %v6020_v37 = vld [vmem:[#allocation5 + $0x2ac] ss:$16 sps:$4 sm:$0xff]   ;;  %v6036_v54 = vld [vmem:[#allocation5 + $0x308] ss:$16 sps:$4 sm:$0xff]   ;;  %v6065_v8 = vld [vmem:[#allocation5 + $0x3c4] ss:$16 sps:$4 sm:$0xff]  }
  0xf3   : > { %1622 = vmatpush1.bf16.msra.mxu0 %v5936_v39  ;;  %v385_v39 = vld [vmem:[%s7399_s10 + $0x18] sm:$0xff]  ;;  %s7007_s28 = scalar_lea.vmem %s7542_s21, 1792  ;;  %p7616_p9 = scmp.ne.s32.totalorder %s7606_s13, 0 }
  0xf4   : > { %1623 = vmatprep.subr.bf16.mxu0 %v5937_v40  ;;  %v392_v40 = vld [vmem:[%s7399_s10 + $0x50] sm:$0xff]  ;;  %v6060_v7 = vld [vmem:[#allocation5 + $0x388] ss:$16 sps:$4 sm:$0xff]   ;;  %p7008_p5 = scmp.ne.s32.totalorder %s7542_s21, %s7007_s28  ;;  %s7101_s12 = smov [#allocation14]  }
  0xf5   : > { %1792 = vmatpush1.bf16.msra.mxu1 %v5933_v38  ;;  %v6015_v38 = vld [vmem:[#allocation5 + $0x2c0] ss:$16 sps:$4 sm:$0xff]   ;;  %s7011_s17 = sshll.u32 %s7101_s12, 4  ;;  %s7012_s17 = int_to_ptr.vmem [resolvable:$false] %s7011_s17 }
  0xf6   : > { %1793 = vmatprep.subr.bf16.mxu1 %v5941_v41  ;;  %v6018_v41 = vld [vmem:[#allocation5 + $0x2a8] ss:$16 sps:$4 sm:$0xff]   ;;  %p7009_p12 = pnand %p7008_p5, %p7616_p9  ;;  %s7013_s19 = scalar_lea.vmem %s7012_s17, 3584 }
  0xf7   : > { %1624 = vmatpush1.bf16.msra.mxu0 %v5942_v42  ;;  %v399_v42 = vpack.c.bf16 %v392_v40, %v385_v39  ;;  %v6101_v39 = vld [vmem:[#allocation5 + $0x484] ss:$16 sps:$4 sm:$0xff]   ;;  %v6104_v40 = vld [vmem:[#allocation5 + $0x46c] ss:$16 sps:$4 sm:$0xff]   ;;  %p7014_p1 = scmp.lt.s32.totalorder %s7542_s21, %s7012_s17  ;;  %p7015_p3 = scmp.lt.s32.totalorder %s7013_s19, %s7007_s28 }
  0xf8   : > { %1625 = vmatprep.subr.bf16.mxu0 %v5943_v44  ;;  %v6026_v44 = vld [vmem:[#allocation5 + $0x2cc] ss:$16 sps:$4 sm:$0xff]   ;;  %p7010_p13 = pneg %p7009_p12 }
  0xf9   : > { %1794 = vmatpush1.bf16.msra.mxu1 %v5939_v43  ;;  %v6023_v43 = vld [vmem:[#allocation5 + $0x2e4] ss:$16 sps:$4 sm:$0xff]   ;;  %p7016_p2 = por %p7015_p3, %p7014_p1 }
  0xfa   : > { %1795 = vmatprep.subr.bf16.mxu1 %v5947_v45  ;;  %v6021_v45 = vld [vmem:[#allocation5 + $0x2e0] ss:$16 sps:$4 sm:$0xff]  }
  0xfb   : > { %1626 = vmatpush1.bf16.msra.mxu0 %v5948_v47  ;;  %v6029_v47 = vld [vmem:[#allocation5 + $0x304] ss:$16 sps:$4 sm:$0xff]   ;;  %p7017_p8 = pnand %p7016_p2, %p7010_p13 }
  0xfc   : > { %1627 = vmatprep.subr.bf16.mxu0 %v5949_v48  ;;  %v6032_v48 = vld [vmem:[#allocation5 + $0x2ec] ss:$16 sps:$4 sm:$0xff]  }
  0xfd   : > { %1796 = vmatpush1.bf16.msra.mxu1 %v5945_v46  ;;  %v6024_v46 = vld [vmem:[#allocation5 + $0x2c8] ss:$16 sps:$4 sm:$0xff]  }
  0xfe   : > { %1797 = vmatprep.subr.bf16.mxu1 %v5953_v49  ;;  %v6027_v49 = vld [vmem:[#allocation5 + $0x300] ss:$16 sps:$4 sm:$0xff]  }
  0xff   : > { %1628 = vmatpush1.bf16.msra.mxu0 %v5954_v53  ;;  %v6033_v53 = vld [vmem:[#allocation5 + $0x320] ss:$16 sps:$4 sm:$0xff]  }
 0x100   : > { %1629 = vmatprep.subr.bf16.mxu0 %v5955_v55  ;;  %v6041_v55 = vld [vmem:[#allocation5 + $0x344] ss:$16 sps:$4 sm:$0xff]  }
 0x101   : > { %1798 = vmatpush1.bf16.msra.mxu1 %v5951_v50  ;;  %v6030_v50 = vld [vmem:[#allocation5 + $0x2e8] ss:$16 sps:$4 sm:$0xff]  }
 0x102   : > { %1799 = vmatprep.subr.bf16.mxu1 %v5959_v56  ;;  %v6044_v56 = vld [vmem:[#allocation5 + $0x32c] ss:$16 sps:$4 sm:$0xff]  }
 0x103   : > { %1630 = vmatpush1.bf16.msra.mxu0 %v5960_v57  ;;  %v6039_v57 = vld [vmem:[#allocation5 + $0x340] ss:$16 sps:$4 sm:$0xff]  }
 0x104   : > { %1631 = vmatprep.subr.bf16.mxu0 %v5961_v59  ;;  %v6047_v59 = vld [vmem:[#allocation5 + $0x364] ss:$16 sps:$4 sm:$0xff]  }
 0x105   : > { %1800 = vmatpush1.bf16.msra.mxu1 %v5957_v58  ;;  %v6042_v58 = vld [vmem:[#allocation5 + $0x328] ss:$16 sps:$4 sm:$0xff]  }
 0x106   : > { %1801 = vmatprep.subr.bf16.mxu1 %v5965_v60  ;;  %v6050_v60 = vld [vmem:[#allocation5 + $0x34c] ss:$16 sps:$4 sm:$0xff]  }
 0x107   : > { %1632 = vmatpush1.bf16.msra.mxu0 %v5966_v61  ;;  %v6045_v61 = vld [vmem:[#allocation5 + $0x360] ss:$16 sps:$4 sm:$0xff]  }
 0x108   : > { %1633 = vmatprep.subr.bf16.mxu0 %v5967_v63  ;;  %v6053_v63 = vld [vmem:[#allocation5 + $0x384] ss:$16 sps:$4 sm:$0xff]  }
 0x109   : > { %1802 = vmatpush1.bf16.msra.mxu1 %v5963_v62  ;;  %v6048_v62 = vld [vmem:[#allocation5 + $0x348] ss:$16 sps:$4 sm:$0xff]  }
 0x10a   : > { %1803 = vmatprep.subr.bf16.mxu1 %v5971_v1  ;;  %v6056_v1 = vld [vmem:[#allocation5 + $0x36c] ss:$16 sps:$4 sm:$0xff]  }
 0x10b   : > { %1634 = vmatpush1.bf16.msra.mxu0 %v5972_v2  ;;  %v6051_v2 = vld [vmem:[#allocation5 + $0x380] ss:$16 sps:$4 sm:$0xff]  }
 0x10c   : > { %1635 = vmatprep.subr.bf16.mxu0 %v5973_v4  ;;  %v6059_v4 = vld [vmem:[#allocation5 + $0x3a4] ss:$16 sps:$4 sm:$0xff]  }
 0x10d   : > { %1804 = vmatpush1.bf16.msra.mxu1 %v5969_v3  ;;  %v6054_v3 = vld [vmem:[#allocation5 + $0x368] ss:$16 sps:$4 sm:$0xff]  }
 0x10e   : > { %1805 = vmatprep.subr.bf16.mxu1 %v5977_v5  ;;  %v6062_v5 = vld [vmem:[#allocation5 + $0x38c] ss:$16 sps:$4 sm:$0xff]  }
 0x10f   : > { %1636 = vmatpush1.bf16.msra.mxu0 %v5978_v6  ;;  %v6057_v6 = vld [vmem:[#allocation5 + $0x3a0] ss:$16 sps:$4 sm:$0xff]  }
 0x110   : > { %1648 = vmatprep.subr.bf16.mxu0 %v5981_v10  ;;  %v6063_v10 = vld [vmem:[#allocation5 + $0x3c0] ss:$16 sps:$4 sm:$0xff]  }
 0x111   : > { %1806 = vmatpush1.bf16.msra.mxu1 %v5975_v9  ;;  %v6068_v9 = vld [vmem:[#allocation5 + $0x3ac] ss:$16 sps:$4 sm:$0xff]  }
 0x112   : > { %1807 = vmatprep.subr.bf16.mxu1 %v5984_v12  ;;  %1638 = vmatmul.mubr.bf16.vlgmr.msra.gmra.mrb[0].mxu0 %v396_v13  ;;  %v6066_v12 = vld [vmem:[#allocation5 + $0x3a8] ss:$16 sps:$4 sm:$0xff]  }
 0x113   : > { %1649 = vmatpush1.bf16.msra.mxu0 %v5979_v14  ;;  %1680 = vmatprep.mubr.bf16.mxu0 %v399_v42  ;;  %v6074_v14 = vld [vmem:[#allocation5 + $0x3cc] ss:$16 sps:$4 sm:$0xff]  }
 0x114   : > { %1650 = vmatprep.subr.bf16.mxu0 %v5987_v16  ;;  %v384_v16 = vld [vmem:[%s7399_s10 + $0x10] sm:$0xff] }
 0x115   : > { %1808 = vmatpush1.bf16.msra.mxu1 %v5982_v15  ;;  %v6069_v15 = vld [vmem:[#allocation5 + $0x3e0] ss:$16 sps:$4 sm:$0xff]  }
 0x116   : > { %1820 = vmatprep.subr.bf16.mxu1 %v5990_v17  ;;  %v391_v17 = vld [vmem:[%s7399_s10 + $0x48] sm:$0xff] }
 0x117   : > { %1651 = vmatpush1.bf16.msra.mxu0 %v5985_v18  ;;  %v6072_v18 = vld [vmem:[#allocation5 + $0x3c8] ss:$16 sps:$4 sm:$0xff]  }
 0x118   : > { %1810 = vmatmul.mubr.bf16.vlgmr.msra.gmra.mrb[4].mxu1 %v396_v13  ;;  %1652 = vmatprep.subr.bf16.mxu0 %v5993_v20  ;;  %v6071_v13 = vld [vmem:[#allocation5 + $0x3e4] ss:$16 sps:$4 sm:$0xff]   ;;  %v6080_v20 = vld [vmem:[#allocation5 + $0x3ec] ss:$16 sps:$4 sm:$0xff]  }
 0x119   : > { %1821 = vmatpush1.bf16.msra.mxu1 %v5988_v19  ;;  %1852 = vmatprep.mubr.bf16.mxu1 %v399_v42  ;;  %v6077_v19 = vld [vmem:[#allocation5 + $0x404] ss:$16 sps:$4 sm:$0xff]   ;;  %v6102_v42 = vld [vmem:[#allocation5 + $0x468] ss:$16 sps:$4 sm:$0xff]  }
 0x11a   : > { %1822 = vmatprep.subr.bf16.mxu1 %v5996_v21  ;;  %v398_v21 = vpack.c.bf16 %v391_v17, %v384_v16  ;;  %v6156_v16 = vld [vmem:[#allocation5 + $0x588] ss:$16 sps:$4 sm:$0xff]   ;;  %v6161_v17 = vld [vmem:[#allocation5 + $0x5c4] ss:$16 sps:$4 sm:$0xff]  }
 0x11b   : > { %1653 = vmatpush1.bf16.msra.mxu0 %v5991_v22  ;;  %v6075_v22 = vld [vmem:[#allocation5 + $0x400] ss:$16 sps:$4 sm:$0xff]  }
 0x11c   : > { %1654 = vmatprep.subr.bf16.mxu0 %v5999_v24  ;;  %v6083_v24 = vld [vmem:[#allocation5 + $0x424] ss:$16 sps:$4 sm:$0xff]  }
 0x11d   : > { %1823 = vmatpush1.bf16.msra.mxu1 %v5994_v23  ;;  %v6078_v23 = vld [vmem:[#allocation5 + $0x3e8] ss:$16 sps:$4 sm:$0xff]  }
 0x11e   : > { %1824 = vmatprep.subr.bf16.mxu1 %v6002_v25  ;;  %v6086_v25 = vld [vmem:[#allocation5 + $0x40c] ss:$16 sps:$4 sm:$0xff]  }
 0x11f   : > { %1655 = vmatpush1.bf16.msra.mxu0 %v5997_v26  ;;  %v387_v26 = vld [vmem:[%s7399_s10 + $0x28] sm:$0xff] }
 0x120   : > { %1656 = vmatprep.subr.bf16.mxu0 %v6005_v28  ;;  %v6081_v28 = vld [vmem:[#allocation5 + $0x420] ss:$16 sps:$4 sm:$0xff]  }
 0x121   : > { %1825 = vmatpush1.bf16.msra.mxu1 %v6000_v27  ;;  %v394_v27 = vld [vmem:[%s7399_s10 + $0x60] sm:$0xff] }
 0x122   : > { %1826 = vmatprep.subr.bf16.mxu1 %v6008_v29  ;;  %v401_v29 = vpack.c.bf16 %v394_v27, %v387_v26  ;;  %v6168_v26 = vld [vmem:[#allocation5 + $0x5c8] ss:$16 sps:$4 sm:$0xff]  }
 0x123   : > { %1657 = vmatpush1.bf16.msra.mxu0 %v6003_v30  ;;  %v6084_v30 = vld [vmem:[#allocation5 + $0x408] ss:$16 sps:$4 sm:$0xff]  }
 0x124   : > { %1658 = vmatprep.subr.bf16.mxu0 %v6011_v32  ;;  %v6092_v32 = vld [vmem:[#allocation5 + $0x42c] ss:$16 sps:$4 sm:$0xff]   ;;  %v6179_v27 = vld [vmem:[#allocation8 + $0x4] ss:$16 sps:$4 sm:$0xff]  }
 0x125   : > { %1827 = vmatpush1.bf16.msra.mxu1 %v6006_v31  ;;  %v6089_v31 = vld [vmem:[#allocation5 + $0x444] ss:$16 sps:$4 sm:$0xff]  }
 0x126   : > { %1828 = vmatprep.subr.bf16.mxu1 %v6014_v33  ;;  %v6087_v33 = vld [vmem:[#allocation5 + $0x440] ss:$16 sps:$4 sm:$0xff]  }
 0x127   : > { %1659 = vmatpush1.bf16.msra.mxu0 %v6009_v34  ;;  %v6090_v34 = vld [vmem:[#allocation5 + $0x428] ss:$16 sps:$4 sm:$0xff]  }
 0x128   : > { %1660 = vmatprep.subr.bf16.mxu0 %v6017_v36  ;;  %v6098_v36 = vld [vmem:[#allocation5 + $0x44c] ss:$16 sps:$4 sm:$0xff]  }
 0x129   : > { %1829 = vmatpush1.bf16.msra.mxu1 %v6012_v35  ;;  %v6095_v35 = vld [vmem:[#allocation5 + $0x464] ss:$16 sps:$4 sm:$0xff]  }
 0x12a   : > { %1830 = vmatprep.subr.bf16.mxu1 %v6020_v37  ;;  %v6093_v37 = vld [vmem:[#allocation5 + $0x460] ss:$16 sps:$4 sm:$0xff]  }
 0x12b   : > { %1661 = vmatpush1.bf16.msra.mxu0 %v6015_v38  ;;  %v6096_v38 = vld [vmem:[#allocation5 + $0x448] ss:$16 sps:$4 sm:$0xff]  }
 0x12c   : > { %1662 = vmatprep.subr.bf16.mxu0 %v6023_v43  ;;  %v6107_v43 = vld [vmem:[#allocation5 + $0x4a4] ss:$16 sps:$4 sm:$0xff]  }
 0x12d   : > { %1831 = vmatpush1.bf16.msra.mxu1 %v6018_v41  ;;  %v6099_v41 = vld [vmem:[#allocation5 + $0x480] ss:$16 sps:$4 sm:$0xff]  }
 0x12e   : > { %1832 = vmatprep.subr.bf16.mxu1 %v6026_v44  ;;  %v6110_v44 = vld [vmem:[#allocation5 + $0x48c] ss:$16 sps:$4 sm:$0xff]  }
 0x12f   : > { %1663 = vmatpush1.bf16.msra.mxu0 %v6021_v45  ;;  %v6105_v45 = vld [vmem:[#allocation5 + $0x4a0] ss:$16 sps:$4 sm:$0xff]  }
 0x130   : > { %1664 = vmatprep.subr.bf16.mxu0 %v6029_v47  ;;  %v6113_v47 = vld [vmem:[#allocation5 + $0x4c4] ss:$16 sps:$4 sm:$0xff]  }
 0x131   : > { %1833 = vmatpush1.bf16.msra.mxu1 %v6024_v46  ;;  %v6108_v46 = vld [vmem:[#allocation5 + $0x488] ss:$16 sps:$4 sm:$0xff]  }
 0x132   : > { %1834 = vmatprep.subr.bf16.mxu1 %v6032_v48  ;;  %v6116_v48 = vld [vmem:[#allocation5 + $0x4ac] ss:$16 sps:$4 sm:$0xff]  }
 0x133   : > { %1665 = vmatpush1.bf16.msra.mxu0 %v6027_v49  ;;  %v6111_v49 = vld [vmem:[#allocation5 + $0x4c0] ss:$16 sps:$4 sm:$0xff]  }
 0x134   : > { %1666 = vmatprep.subr.bf16.mxu0 %v6035_v51  ;;  %v6119_v51 = vld [vmem:[#allocation5 + $0x4e4] ss:$16 sps:$4 sm:$0xff]  }
 0x135   : > { %1835 = vmatpush1.bf16.msra.mxu1 %v6030_v50  ;;  %v6114_v50 = vld [vmem:[#allocation5 + $0x4a8] ss:$16 sps:$4 sm:$0xff]  }
 0x136   : > { %1836 = vmatprep.subr.bf16.mxu1 %v6038_v52  ;;  %v6117_v52 = vld [vmem:[#allocation5 + $0x4e0] ss:$16 sps:$4 sm:$0xff]  }
 0x137   : > { %1667 = vmatpush1.bf16.msra.mxu0 %v6033_v53  ;;  %v6122_v53 = vld [vmem:[#allocation5 + $0x4cc] ss:$16 sps:$4 sm:$0xff]  }
 0x138   : > { %1668 = vmatprep.subr.bf16.mxu0 %v6041_v55  ;;  %v6125_v55 = vld [vmem:[#allocation5 + $0x504] ss:$16 sps:$4 sm:$0xff]  }
 0x139   : > { %1837 = vmatpush1.bf16.msra.mxu1 %v6036_v54  ;;  %v6120_v54 = vld [vmem:[#allocation5 + $0x4c8] ss:$16 sps:$4 sm:$0xff]  }
 0x13a   : > { %1838 = vmatprep.subr.bf16.mxu1 %v6044_v56  ;;  %v6128_v56 = vld [vmem:[#allocation5 + $0x4ec] ss:$16 sps:$4 sm:$0xff]  }
 0x13b   : > { %1669 = vmatpush1.bf16.msra.mxu0 %v6039_v57  ;;  %v6123_v57 = vld [vmem:[#allocation5 + $0x500] ss:$16 sps:$4 sm:$0xff]  }
 0x13c   : > { %1670 = vmatprep.subr.bf16.mxu0 %v6047_v59  ;;  %v6131_v59 = vld [vmem:[#allocation5 + $0x524] ss:$16 sps:$4 sm:$0xff]  }
 0x13d   : > { %1839 = vmatpush1.bf16.msra.mxu1 %v6042_v58  ;;  %v6126_v58 = vld [vmem:[#allocation5 + $0x4e8] ss:$16 sps:$4 sm:$0xff]  }
 0x13e   : > { %1840 = vmatprep.subr.bf16.mxu1 %v6050_v60  ;;  %v6134_v60 = vld [vmem:[#allocation5 + $0x50c] ss:$16 sps:$4 sm:$0xff]  }
 0x13f   : > { %1671 = vmatpush1.bf16.msra.mxu0 %v6045_v61  ;;  %v6129_v61 = vld [vmem:[#allocation5 + $0x520] ss:$16 sps:$4 sm:$0xff]  }
 0x140   : > { %1672 = vmatprep.subr.bf16.mxu0 %v6053_v63  ;;  %v6137_v63 = vld [vmem:[#allocation5 + $0x544] ss:$16 sps:$4 sm:$0xff]  }
 0x141   : > { %1841 = vmatpush1.bf16.msra.mxu1 %v6048_v62  ;;  %v6132_v62 = vld [vmem:[#allocation5 + $0x508] ss:$16 sps:$4 sm:$0xff]  }
 0x142   : > { %1842 = vmatprep.subr.bf16.mxu1 %v6056_v1  ;;  %v6140_v1 = vld [vmem:[#allocation5 + $0x52c] ss:$16 sps:$4 sm:$0xff]  }
 0x143   : > { %1673 = vmatpush1.bf16.msra.mxu0 %v6051_v2  ;;  %v6135_v2 = vld [vmem:[#allocation5 + $0x540] ss:$16 sps:$4 sm:$0xff]  }
 0x144   : > { %1674 = vmatprep.subr.bf16.mxu0 %v6059_v4  ;;  %v6143_v4 = vld [vmem:[#allocation5 + $0x564] ss:$16 sps:$4 sm:$0xff]  }
 0x145   : > { %1843 = vmatpush1.bf16.msra.mxu1 %v6054_v3  ;;  %v6138_v3 = vld [vmem:[#allocation5 + $0x528] ss:$16 sps:$4 sm:$0xff]  }
 0x146   : > { %1844 = vmatprep.subr.bf16.mxu1 %v6062_v5  ;;  %v6146_v5 = vld [vmem:[#allocation5 + $0x54c] ss:$16 sps:$4 sm:$0xff]  }
 0x147   : > { %1675 = vmatpush1.bf16.msra.mxu0 %v6057_v6  ;;  %v6141_v6 = vld [vmem:[#allocation5 + $0x560] ss:$16 sps:$4 sm:$0xff]  }
 0x148   : > { %1676 = vmatprep.subr.bf16.mxu0 %v6065_v8  ;;  %v6149_v8 = vld [vmem:[#allocation5 + $0x584] ss:$16 sps:$4 sm:$0xff]  }
 0x149   : > { %1845 = vmatpush1.bf16.msra.mxu1 %v6060_v7  ;;  %v6144_v7 = vld [vmem:[#allocation5 + $0x548] ss:$16 sps:$4 sm:$0xff]  }
 0x14a   : > { %1846 = vmatprep.subr.bf16.mxu1 %v6068_v9  ;;  %v6152_v9 = vld [vmem:[#allocation5 + $0x56c] ss:$16 sps:$4 sm:$0xff]  }
 0x14b   : > { %1677 = vmatpush1.bf16.msra.mxu0 %v6063_v10  ;;  %v6147_v10 = vld [vmem:[#allocation5 + $0x580] ss:$16 sps:$4 sm:$0xff]  }
 0x14c   : > { %1678 = vmatprep.subr.bf16.mxu0 %v6071_v13  ;;  %v6155_v13 = vld [vmem:[#allocation5 + $0x5a4] ss:$16 sps:$4 sm:$0xff]  }
 0x14d   : > { %1847 = vmatpush1.bf16.msra.mxu1 %v6066_v12  ;;  %v6150_v12 = vld [vmem:[#allocation5 + $0x568] ss:$16 sps:$4 sm:$0xff]  }
 0x14e   : > { %1848 = vmatprep.subr.bf16.mxu1 %v6074_v14  ;;  %v6158_v14 = vld [vmem:[#allocation5 + $0x58c] ss:$16 sps:$4 sm:$0xff]  }
 0x14f   : > { %1679 = vmatpush1.bf16.msra.mxu0 %v6069_v15  ;;  %v6153_v15 = vld [vmem:[#allocation5 + $0x5a0] ss:$16 sps:$4 sm:$0xff]  }
 0x150   : > { %1691 = vmatprep.subr.bf16.mxu0 %v6077_v19  ;;  %v6159_v19 = vld [vmem:[#allocation5 + $0x5c0] ss:$16 sps:$4 sm:$0xff]  }
 0x151   : > { %1849 = vmatpush1.bf16.msra.mxu1 %v6072_v18  ;;  %v6164_v18 = vld [vmem:[#allocation5 + $0x5ac] ss:$16 sps:$4 sm:$0xff]  }
 0x152   : > { %1850 = vmatprep.subr.bf16.mxu1 %v6080_v20  ;;  %1681 = vmatmul.mubr.bf16.vlgmr.msra.gmra.mrb[0].mxu0 %v398_v21  ;;  %v6162_v20 = vld [vmem:[#allocation5 + $0x5a8] ss:$16 sps:$4 sm:$0xff]  }
 0x153   : > { %1692 = vmatpush1.bf16.msra.mxu0 %v6075_v22  ;;  %1723 = vmatprep.mubr.bf16.mxu0 %v401_v29  ;;  %v6170_v22 = vld [vmem:[#allocation5 + $0x5cc] ss:$16 sps:$4 sm:$0xff]  }
 0x154   : > { %1693 = vmatprep.subr.bf16.mxu0 %v6083_v24  ;;  %v386_v24 = vld [vmem:[%s7399_s10 + $0x20] sm:$0xff] }
 0x155   : > { %1851 = vmatpush1.bf16.msra.mxu1 %v6078_v23  ;;  %v6165_v23 = vld [vmem:[#allocation5 + $0x5e0] ss:$16 sps:$4 sm:$0xff]  }
 0x156   : > { %1863 = vmatprep.subr.bf16.mxu1 %v6086_v25  ;;  %v393_v25 = vld [vmem:[%s7399_s10 + $0x58] sm:$0xff] }
 0x157   : > { %1694 = vmatpush1.bf16.msra.mxu0 %v6081_v28  ;;  %v6173_v28 = vld [vmem:[#allocation5 + $0x5ec] ss:$16 sps:$4 sm:$0xff]  }
 0x158   : > { %1853 = vmatmul.mubr.bf16.vlgmr.msra.gmra.mrb[4].mxu1 %v398_v21  ;;  %1695 = vmatprep.subr.bf16.mxu0 %v6089_v31  ;;  %v6167_v21 = vld [vmem:[#allocation5 + $0x5e4] ss:$16 sps:$4 sm:$0xff]   ;;  %v6171_v31 = vld [vmem:[#allocation5 + $0x5e8] ss:$16 sps:$4 sm:$0xff]  }
 0x159   : > { %1864 = vmatpush1.bf16.msra.mxu1 %v6084_v30  ;;  %1895 = vmatprep.mubr.bf16.mxu1 %v401_v29  ;;  %v6177_v29 = vld [vmem:[#allocation8] ss:$16 sps:$4 sm:$0xff]   ;;  %v400_v30 = vpack.c.bf16 %v393_v25, %v386_v24  ;;  %v6257_v24 = vld [vmem:[#allocation8 + $0x1a4] ss:$16 sps:$4 sm:$0xff]   ;;  %v6260_v25 = vld [vmem:[#allocation8 + $0x1ac] ss:$16 sps:$4 sm:$0xff]  }
 0x15a   : > { %1865 = vmatprep.subr.bf16.mxu1 %v6092_v32  ;;  %v6185_v32 = vld [vmem:[#allocation8 + $0x24] ss:$16 sps:$4 sm:$0xff]  }
 0x15b   : > { %1696 = vmatpush1.bf16.msra.mxu0 %v6087_v33  ;;  %v6176_v33 = vld [vmem:[#allocation5 + $0x60c] ss:$16 sps:$4 sm:$0xff]  }
 0x15c   : > { %1697 = vmatprep.subr.bf16.mxu0 %v6095_v35  ;;  %v6174_v35 = vld [vmem:[#allocation5 + $0x608] ss:$16 sps:$4 sm:$0xff]  }
 0x15d   : > { %1866 = vmatpush1.bf16.msra.mxu1 %v6090_v34  ;;  %v6183_v34 = vld [vmem:[#allocation8 + $0x20] ss:$16 sps:$4 sm:$0xff]  }
 0x15e   : > { %1867 = vmatprep.subr.bf16.mxu1 %v6098_v36  ;;  %v6182_v36 = vld [vmem:[#allocation8 + $0xc] ss:$16 sps:$4 sm:$0xff]  }
 0x15f   : > { %1698 = vmatpush1.bf16.msra.mxu0 %v6093_v37  ;;  %v6191_v37 = vld [vmem:[#allocation8 + $0x44] ss:$16 sps:$4 sm:$0xff]  }
 0x160   : > { %1699 = vmatprep.subr.bf16.mxu0 %v6101_v39  ;;  %v6197_v39 = vld [vmem:[#allocation8 + $0x64] ss:$16 sps:$4 sm:$0xff]  }
 0x161   : > { %1868 = vmatpush1.bf16.msra.mxu1 %v6096_v38  ;;  %v6189_v38 = vld [vmem:[#allocation8 + $0x40] ss:$16 sps:$4 sm:$0xff]  }
 0x162   : > { %1869 = vmatprep.subr.bf16.mxu1 %v6104_v40  ;;  %v6195_v40 = vld [vmem:[#allocation8 + $0x60] ss:$16 sps:$4 sm:$0xff]  }
 0x163   : > { %1700 = vmatpush1.bf16.msra.mxu0 %v6099_v41  ;;  %v6203_v41 = vld [vmem:[#allocation8 + $0x84] ss:$16 sps:$4 sm:$0xff]  }
 0x164   : > { %1701 = vmatprep.subr.bf16.mxu0 %v6107_v43  ;;  %v6180_v43 = vld [vmem:[#allocation8 + $0x8] ss:$16 sps:$4 sm:$0xff]  }
 0x165   : > { %1870 = vmatpush1.bf16.msra.mxu1 %v6102_v42  ;;  %v6201_v42 = vld [vmem:[#allocation8 + $0x80] ss:$16 sps:$4 sm:$0xff]  }
 0x166   : > { %1871 = vmatprep.subr.bf16.mxu1 %v6110_v44  ;;  %v6209_v44 = vld [vmem:[#allocation8 + $0xa4] ss:$16 sps:$4 sm:$0xff]  }
 0x167   : > { %1702 = vmatpush1.bf16.msra.mxu0 %v6105_v45  ;;  %v6188_v45 = vld [vmem:[#allocation8 + $0x2c] ss:$16 sps:$4 sm:$0xff]  }
 0x168   : > { %1703 = vmatprep.subr.bf16.mxu0 %v6113_v47  ;;  %v6186_v47 = vld [vmem:[#allocation8 + $0x28] ss:$16 sps:$4 sm:$0xff]  }
 0x169   : > { %1872 = vmatpush1.bf16.msra.mxu1 %v6108_v46  ;;  %v6207_v46 = vld [vmem:[#allocation8 + $0xa0] ss:$16 sps:$4 sm:$0xff]  }
 0x16a   : > { %1873 = vmatprep.subr.bf16.mxu1 %v6116_v48  ;;  %v6215_v48 = vld [vmem:[#allocation8 + $0xc4] ss:$16 sps:$4 sm:$0xff]  }
 0x16b   : > { %1704 = vmatpush1.bf16.msra.mxu0 %v6111_v49  ;;  %v6194_v49 = vld [vmem:[#allocation8 + $0x4c] ss:$16 sps:$4 sm:$0xff]  }
 0x16c   : > { %1705 = vmatprep.subr.bf16.mxu0 %v6119_v51  ;;  %v6200_v51 = vld [vmem:[#allocation8 + $0x6c] ss:$16 sps:$4 sm:$0xff]  }
 0x16d   : > { %1874 = vmatpush1.bf16.msra.mxu1 %v6114_v50  ;;  %v6192_v50 = vld [vmem:[#allocation8 + $0x48] ss:$16 sps:$4 sm:$0xff]  }
 0x16e   : > { %1875 = vmatprep.subr.bf16.mxu1 %v6122_v53  ;;  %v6198_v53 = vld [vmem:[#allocation8 + $0x68] ss:$16 sps:$4 sm:$0xff]  }
 0x16f   : > { %1706 = vmatpush1.bf16.msra.mxu0 %v6117_v52 }
 0x170   : > { %1707 = vmatprep.subr.bf16.mxu0 %v6125_v55  ;;  %v6206_v55 = vld [vmem:[#allocation8 + $0x8c] ss:$16 sps:$4 sm:$0xff]  }
 0x171   : > { %1876 = vmatpush1.bf16.msra.mxu1 %v6120_v54 }
 0x172   : > { %1877 = vmatprep.subr.bf16.mxu1 %v6128_v56 }
 0x173   : > { %1708 = vmatpush1.bf16.msra.mxu0 %v6123_v57  ;;  %v6204_v57 = vld [vmem:[#allocation8 + $0x88] ss:$16 sps:$4 sm:$0xff]  }
 0x174   : > { %1709 = vmatprep.subr.bf16.mxu0 %v6131_v59  ;;  %v6210_v59 = vld [vmem:[#allocation8 + $0xa8] ss:$16 sps:$4 sm:$0xff]  }
 0x175   : > { %1878 = vmatpush1.bf16.msra.mxu1 %v6126_v58  ;;  %v6212_v58 = vld [vmem:[#allocation8 + $0xac] ss:$16 sps:$4 sm:$0xff]  }
 0x176   : > { %1879 = vmatprep.subr.bf16.mxu1 %v6134_v60  ;;  %v6218_v60 = vld [vmem:[#allocation8 + $0xcc] ss:$16 sps:$4 sm:$0xff]  }
 0x177   : > { %1710 = vmatpush1.bf16.msra.mxu0 %v6129_v61  ;;  %v6216_v61 = vld [vmem:[#allocation8 + $0xc8] ss:$16 sps:$4 sm:$0xff]  }
 0x178   : > { %1711 = vmatprep.subr.bf16.mxu0 %v6137_v63  ;;  %v6224_v63 = vld [vmem:[#allocation8 + $0xec] ss:$16 sps:$4 sm:$0xff]  }
 0x179   : > { %1880 = vmatpush1.bf16.msra.mxu1 %v6132_v62  ;;  %v6221_v62 = vld [vmem:[#allocation8 + $0xe4] ss:$16 sps:$4 sm:$0xff]  }
 0x17a   : > { %1881 = vmatprep.subr.bf16.mxu1 %v6140_v1  ;;  %v6219_v1 = vld [vmem:[#allocation8 + $0xe0] ss:$16 sps:$4 sm:$0xff]  }
 0x17b   : > { %1712 = vmatpush1.bf16.msra.mxu0 %v6135_v2  ;;  %v6222_v2 = vld [vmem:[#allocation8 + $0xe8] ss:$16 sps:$4 sm:$0xff]  }
 0x17c   : > { %1713 = vmatprep.subr.bf16.mxu0 %v6143_v4  ;;  %v6230_v4 = vld [vmem:[#allocation8 + $0x10c] ss:$16 sps:$4 sm:$0xff]  }
 0x17d   : > { %1882 = vmatpush1.bf16.msra.mxu1 %v6138_v3  ;;  %v6227_v3 = vld [vmem:[#allocation8 + $0x104] ss:$16 sps:$4 sm:$0xff]  }
 0x17e   : > { %1883 = vmatprep.subr.bf16.mxu1 %v6146_v5  ;;  %v6225_v5 = vld [vmem:[#allocation8 + $0x100] ss:$16 sps:$4 sm:$0xff]  }
 0x17f   : > { %1714 = vmatpush1.bf16.msra.mxu0 %v6141_v6  ;;  %v6228_v6 = vld [vmem:[#allocation8 + $0x108] ss:$16 sps:$4 sm:$0xff]  }
 0x180   : > { %1715 = vmatprep.subr.bf16.mxu0 %v6149_v8  ;;  %v6236_v8 = vld [vmem:[#allocation8 + $0x12c] ss:$16 sps:$4 sm:$0xff]  }
 0x181   : > { %1884 = vmatpush1.bf16.msra.mxu1 %v6144_v7  ;;  %v6233_v7 = vld [vmem:[#allocation8 + $0x124] ss:$16 sps:$4 sm:$0xff]  }
 0x182   : > { %1885 = vmatprep.subr.bf16.mxu1 %v6152_v9  ;;  %v6231_v9 = vld [vmem:[#allocation8 + $0x120] ss:$16 sps:$4 sm:$0xff]  }
 0x183   : > { %1716 = vmatpush1.bf16.msra.mxu0 %v6147_v10  ;;  %v6234_v10 = vld [vmem:[#allocation8 + $0x128] ss:$16 sps:$4 sm:$0xff]  }
 0x184   : > { %1717 = vmatprep.subr.bf16.mxu0 %v6155_v13  ;;  %v6242_v13 = vld [vmem:[#allocation8 + $0x14c] ss:$16 sps:$4 sm:$0xff]  }
 0x185   : > { %1886 = vmatpush1.bf16.msra.mxu1 %v6150_v12  ;;  %v6239_v12 = vld [vmem:[#allocation8 + $0x144] ss:$16 sps:$4 sm:$0xff]  }
 0x186   : > { %1887 = vmatprep.subr.bf16.mxu1 %v6158_v14  ;;  %v6237_v14 = vld [vmem:[#allocation8 + $0x140] ss:$16 sps:$4 sm:$0xff]  }
 0x187   : > { %1718 = vmatpush1.bf16.msra.mxu0 %v6153_v15  ;;  %v6240_v15 = vld [vmem:[#allocation8 + $0x148] ss:$16 sps:$4 sm:$0xff]  }
 0x188   : > { %1719 = vmatprep.subr.bf16.mxu0 %v6161_v17  ;;  %v6248_v17 = vld [vmem:[#allocation8 + $0x16c] ss:$16 sps:$4 sm:$0xff]  }
 0x189   : > { %1888 = vmatpush1.bf16.msra.mxu1 %v6156_v16  ;;  %v6245_v16 = vld [vmem:[#allocation8 + $0x164] ss:$16 sps:$4 sm:$0xff]  }
 0x18a   : > { %1889 = vmatprep.subr.bf16.mxu1 %v6164_v18  ;;  %v6243_v18 = vld [vmem:[#allocation8 + $0x160] ss:$16 sps:$4 sm:$0xff]  }
 0x18b   : > { %1720 = vmatpush1.bf16.msra.mxu0 %v6159_v19  ;;  %v6246_v19 = vld [vmem:[#allocation8 + $0x168] ss:$16 sps:$4 sm:$0xff]  }
 0x18c   : > { %1721 = vmatprep.subr.bf16.mxu0 %v6167_v21  ;;  %v6254_v21 = vld [vmem:[#allocation8 + $0x18c] ss:$16 sps:$4 sm:$0xff]  }
 0x18d   : > { %1890 = vmatpush1.bf16.msra.mxu1 %v6162_v20  ;;  %v6251_v20 = vld [vmem:[#allocation8 + $0x184] ss:$16 sps:$4 sm:$0xff]  }
 0x18e   : > { %1891 = vmatprep.subr.bf16.mxu1 %v6170_v22  ;;  %v6249_v22 = vld [vmem:[#allocation8 + $0x180] ss:$16 sps:$4 sm:$0xff]  }
 0x18f   : > { %1722 = vmatpush1.bf16.msra.mxu0 %v6165_v23  ;;  %v6252_v23 = vld [vmem:[#allocation8 + $0x188] ss:$16 sps:$4 sm:$0xff]  }
 0x190   : > { %2791 = vmatprep.subr.bf16.mxu0 %v6179_v27  ;;  %v6258_v27 = vld [vmem:[#allocation8 + $0x1a8] ss:$16 sps:$4 sm:$0xff]  }
 0x191   : > { %1892 = vmatpush1.bf16.msra.mxu1 %v6168_v26  ;;  %v6255_v26 = vld [vmem:[#allocation8 + $0x1a0] ss:$16 sps:$4 sm:$0xff]  }
 0x192   : > { %1893 = vmatprep.subr.bf16.mxu1 %v6173_v28  ;;  %1724 = vmatmul.mubr.bf16.vlgmr.msra.gmra.mrb[0].mxu0 %v400_v30  ;;  %v6263_v28 = vld [vmem:[#allocation8 + $0x1c4] ss:$16 sps:$4 sm:$0xff]  }
 0x193   : > { %2792 = vmatpush1.bf16.msra.mxu0 %v6177_v29  ;;  %v6266_v29 = vld [vmem:[#allocation8 + $0x1cc] ss:$16 sps:$4 sm:$0xff]  }
 0x194   : > { %2793 = vmatprep.subr.bf16.mxu0 %v6185_v32  ;;  %v6269_v32 = vld [vmem:[#allocation8 + $0x1e4] ss:$16 sps:$4 sm:$0xff]  }
 0x195   : > { %1894 = vmatpush1.bf16.msra.mxu1 %v6171_v31  ;;  %v6264_v31 = vld [vmem:[#allocation8 + $0x1c8] ss:$16 sps:$4 sm:$0xff]  }
 0x196   : > { %1906 = vmatprep.subr.bf16.mxu1 %v6176_v33  ;;  %v6272_v33 = vld [vmem:[#allocation8 + $0x1ec] ss:$16 sps:$4 sm:$0xff]  }
 0x197   : > { %2794 = vmatpush1.bf16.msra.mxu0 %v6183_v34  ;;  %v6267_v34 = vld [vmem:[#allocation8 + $0x1e0] ss:$16 sps:$4 sm:$0xff]  }
 0x198   : > { %1896 = vmatmul.mubr.bf16.vlgmr.msra.gmra.mrb[4].mxu1 %v400_v30  ;;  %2795 = vmatprep.subr.bf16.mxu0 %v6191_v37  ;;  %v6261_v30 = vld [vmem:[#allocation8 + $0x1c0] ss:$16 sps:$4 sm:$0xff]   ;;  %v6278_v37 = vld [vmem:[#allocation8 + $0x20c] ss:$16 sps:$4 sm:$0xff]  }
 0x199   : > { %1907 = vmatpush1.bf16.msra.mxu1 %v6174_v35  ;;  %1938 = vmatprep.mubr.bf16.mxu1 %v7100_v0  ;;  %v6213_v0 = vld [vmem:[#allocation8 + $0xc0] ss:$16 sps:$4 sm:$0xff]   ;;  %v6270_v35 = vld [vmem:[#allocation8 + $0x1e8] ss:$16 sps:$4 sm:$0xff]  }
 0x19a   : > { %2877 = vmatprep.subr.bf16.mxu1 %v6182_v36  ;;  %v6275_v36 = vld [vmem:[#allocation8 + $0x204] ss:$16 sps:$4 sm:$0xff]  }
 0x19b   : > { %2796 = vmatpush1.bf16.msra.mxu0 %v6189_v38  ;;  %v601_v38 = vlaneseq }
 0x19c   : > { %2797 = vmatprep.subr.bf16.mxu0 %v6197_v39 }
 0x19d   : > { %v7447_v39 = vshrl.u32 %v601_v38, 7 }
 0x19f   : > { %2798 = vmatpush1.bf16.msra.mxu0 %v6195_v40  ;;  %v7450_v40 = vsub.s32 0, %v7447_v39 }
 0x1a0   : > { %2799 = vmatprep.subr.bf16.mxu0 %v6203_v41  ;;  %v599_v41 = vld [vmem:[#allocation7] sm:$0xf] }
 0x1a3   : > { %2800 = vmatpush1.bf16.msra.mxu0 %v6201_v42  ;;  %v7453_v42 = vsub.s32 1, %v7447_v39 }
 0x1a4   : > { %5259 = vmatmul.mubr.msk.bf16.vlgmr.msra.gmra.mrb[4].mxu1 %vm1601_vm0, %v7420_v11  ;;  %2801 = vmatprep.subr.bf16.mxu0 %v6209_v44 }
 0x1a5   : > { %2878 = vmatpush1.bf16.msra.mxu1 %v6180_v43  ;;  %v604_v43 = vrot.slane %v599_v41, %v7450_v40  ;;  %v608_v44 = vrot.slane %v599_v41, %v7453_v42 }
 0x1a6   : > { %2879 = vmatprep.subr.bf16.mxu1 %v6188_v45 }
 0x1a7   : > { %2802 = vmatpush1.bf16.msra.mxu0 %v6207_v46 }
 0x1a8   : > { %2803 = vmatprep.subr.bf16.mxu0 %v6215_v48 }
 0x1a9   : > { %2880 = vmatpush1.bf16.msra.mxu1 %v6186_v47 }
 0x1aa   : > { %2881 = vmatprep.subr.bf16.mxu1 %v6194_v49 }
 0x1ab   : > { %v7439_v52 = vpop.f32.mrb[0].mxu1  ;;  %2804 = vmatpush1.bf16.msra.mxu0 %v6213_v0 }
 0x1ac   : > { %v7441_v54 = vpop.f32.mrb[1].mxu1  ;;  %2805 = vmatprep.subr.bf16.mxu0 %v6221_v62 }
 0x1ad   : > { %v7443_v11 = vpop.f32.mrb[2].mxu1  ;;  %2882 = vmatpush1.bf16.msra.mxu1 %v6192_v50 }
 0x1ae   : > { %v7445_v56 = vpop.f32.mrb[3].mxu1  ;;  %2883 = vmatprep.subr.bf16.mxu1 %v6200_v51 }
 0x1af   : > { %2806 = vmatpush1.bf16.msra.mxu0 %v6219_v1 }
 0x1b0   : > { %2807 = vmatprep.subr.bf16.mxu0 %v6227_v3 }
 0x1b1   : > { %2884 = vmatpush1.bf16.msra.mxu1 %v6198_v53 }
 0x1b2   : > { %2885 = vmatprep.subr.bf16.mxu1 %v6206_v55 }
 0x1b3   : > { %2808 = vmatpush1.bf16.msra.mxu0 %v6225_v5 }
 0x1b4   : > { %2809 = vmatprep.subr.bf16.mxu0 %v6233_v7 }
 0x1b5   : > { %2886 = vmatpush1.bf16.msra.mxu1 %v6204_v57 }
 0x1b6   : > { %2887 = vmatprep.subr.bf16.mxu1 %v6212_v58 }
 0x1b7   : > { %2810 = vmatpush1.bf16.msra.mxu0 %v6231_v9 }
 0x1b8   : > { %2811 = vmatprep.subr.bf16.mxu0 %v6239_v12 }
 0x1b9   : > { %2888 = vmatpush1.bf16.msra.mxu1 %v6210_v59 }
 0x1ba   : > { %2889 = vmatprep.subr.bf16.mxu1 %v6218_v60 }
 0x1bb   : > { %2812 = vmatpush1.bf16.msra.mxu0 %v6237_v14 }
 0x1bc   : > { %2813 = vmatprep.subr.bf16.mxu0 %v6245_v16 }
 0x1bd   : > { %2890 = vmatpush1.bf16.msra.mxu1 %v6216_v61 }
 0x1be   : > { %2891 = vmatprep.subr.bf16.mxu1 %v6224_v63  ;;  %v7462_v63 = vsub.s32 2, %v7447_v39 }
 0x1bf   : > { %2814 = vmatpush1.bf16.msra.mxu0 %v6243_v18 }
 0x1c0   : > { %2815 = vmatprep.subr.bf16.mxu0 %v6251_v20 }
 0x1c1   : > { %2892 = vmatpush1.bf16.msra.mxu1 %v6222_v2 }
 0x1c2   : > { %2893 = vmatprep.subr.bf16.mxu1 %v6230_v4 }
 0x1c3   : > { %2816 = vmatpush1.bf16.msra.mxu0 %v6249_v22 }
 0x1c4   : > { %2817 = vmatprep.subr.bf16.mxu0 %v6257_v24 }
 0x1c5   : > { %2894 = vmatpush1.bf16.msra.mxu1 %v6228_v6 }
 0x1c6   : > { %2895 = vmatprep.subr.bf16.mxu1 %v6236_v8 }
 0x1c7   : > { %2818 = vmatpush1.bf16.msra.mxu0 %v6255_v26 }
 0x1c8   : > { %2819 = vmatprep.subr.bf16.mxu0 %v6263_v28  ;;  %v6273_v28 = vld [vmem:[#allocation8 + $0x200] ss:$16 sps:$4 sm:$0xff]  }
 0x1c9   : > { %2896 = vmatpush1.bf16.msra.mxu1 %v6234_v10 }
 0x1ca   : > { %2897 = vmatprep.subr.bf16.mxu1 %v6242_v13 }
 0x1cb   : > { %2820 = vmatpush1.bf16.msra.mxu0 %v6261_v30 }
 0x1cc   : > { %2821 = vmatprep.subr.bf16.mxu0 %v6269_v32  ;;  %v6281_v32 = vld [vmem:[#allocation8 + $0x224] ss:$16 sps:$4 sm:$0xff]  }
 0x1cd   : > { %2898 = vmatpush1.bf16.msra.mxu1 %v6240_v15 }
 0x1ce   : > { %2899 = vmatprep.subr.bf16.mxu1 %v6248_v17 }
 0x1cf   : > { %2822 = vmatpush1.bf16.msra.mxu0 %v6267_v34 }
 0x1d0   : > { %2834 = vmatprep.subr.bf16.mxu0 %v6275_v36 }
 0x1d1   : > { %2900 = vmatpush1.bf16.msra.mxu1 %v6246_v19 }
 0x1d2   : > { %2901 = vmatprep.subr.bf16.mxu1 %v6254_v21 }
 0x1d5   : > { %2902 = vmatpush1.bf16.msra.mxu1 %v6252_v23 }
 0x1d6   : > { %2903 = vmatprep.subr.bf16.mxu1 %v6260_v25 }
 0x1d9   : > { %2904 = vmatpush1.bf16.msra.mxu1 %v6258_v27 }
 0x1da   : > { %2905 = vmatprep.subr.bf16.mxu1 %v6266_v29  ;;  %v6276_v29 = vld [vmem:[#allocation8 + $0x208] ss:$16 sps:$4 sm:$0xff]  }
 0x1dd   : > { %2906 = vmatpush1.bf16.msra.mxu1 %v6264_v31 }
 0x1de   : > { %2907 = vmatprep.subr.bf16.mxu1 %v6272_v33  ;;  %v6284_v33 = vld [vmem:[#allocation8 + $0x22c] ss:$16 sps:$4 sm:$0xff]  }
 0x1e1   : > { %2908 = vmatpush1.bf16.msra.mxu1 %v6270_v35 }
 0x1e2   : > { %2920 = vmatprep.subr.bf16.mxu1 %v6278_v37 }
 0x265   : > { %v1725_v45 = vpop.f32.mrb[0].mxu0 }
 0x266   : > { %v5691_v46 = vadd.f32 %v1725_v45, %v604_v43  ;;  %v1727_v47 = vpop.f32.mrb[1].mxu0  ;;  %v6290_v45 = vld [vmem:[#allocation8 + $0x24c] ss:$16 sps:$4 sm:$0xff]  }
 0x267   : > { %v5693_v48 = vadd.f32 %v1727_v47, %v608_v44  ;;  %v1729_v49 = vpop.f32.mrb[2].mxu0  ;;  %v6288_v47 = vld [vmem:[#allocation8 + $0x248] ss:$16 sps:$4 sm:$0xff]  }
 0x268   : > { %v5692_v0 = vadd.f32 %v5691_v46, %v7439_v52  ;;  %v5695_v50 = vadd.f32 %v1729_v49, %v604_v43  ;;  %v1731_v51 = vpop.f32.mrb[3].mxu0  ;;  %v7465_v52 = vsub.s32 3, %v7447_v39  ;;  %v6282_v43 = vld [vmem:[#allocation8 + $0x228] ss:$16 sps:$4 sm:$0xff]   ;;  %v6285_v46 = vld [vmem:[#allocation8 + $0x240] ss:$16 sps:$4 sm:$0xff]  }
 0x269   : > { %v5694_v53 = vadd.f32 %v5693_v48, %v7441_v54  ;;  %v5697_v55 = vadd.f32 %v1731_v51, %v608_v44  ;;  %v612_v54 = vrot.slane %v599_v41, %v7462_v63  ;;  %v6287_v44 = vld [vmem:[#allocation8 + $0x244] ss:$16 sps:$4 sm:$0xff]   ;;  %v6296_v49 = vld [vmem:[#allocation8 + $0x26c] ss:$16 sps:$4 sm:$0xff]  }
 0x26a   : > { %v5260_v57 = vmul.f32 -1.442695, %v5692_v0  ;;  %v5696_v58 = vadd.f32 %v5695_v50, %v7443_v11  ;;  %v616_v1 = vrot.slane %v599_v41, %v7465_v52  ;;  %v6279_v41 = vld [vmem:[#allocation8 + $0x220] ss:$16 sps:$4 sm:$0xff]   ;;  %v6293_v48 = vld [vmem:[#allocation8 + $0x264] ss:$16 sps:$4 sm:$0xff]  }
 0x26b   : > { %v5261_v59 = vmul.f32 -1.442695, %v5694_v53  ;;  %v5698_v60 = vadd.f32 %v5697_v55, %v7445_v56  ;;  %v6291_v0 = vld [vmem:[#allocation8 + $0x260] ss:$16 sps:$4 sm:$0xff]   ;;  %v6294_v50 = vld [vmem:[#allocation8 + $0x268] ss:$16 sps:$4 sm:$0xff]  }
 0x26c   : > { %6689 = vpow2.f32 %v5260_v57  ;;  %v5264_v61 = vmul.f32 -1.442695, %v5696_v58  ;;  %v6299_v53 = vld [vmem:[#allocation8 + $0x284] ss:$16 sps:$4 sm:$0xff]   ;;  %v6302_v55 = vld [vmem:[#allocation8 + $0x28c] ss:$16 sps:$4 sm:$0xff]  }
 0x26d   : > { %6691 = vpow2.f32 %v5261_v59  ;;  %v5265_v62 = vmul.f32 -1.442695, %v5698_v60  ;;  %v6297_v60 = vld [vmem:[#allocation8 + $0x280] ss:$16 sps:$4 sm:$0xff]  }
 0x26e   : > { %6693 = vpow2.f32 %v5264_v61  ;;  %v6300_v61 = vld [vmem:[#allocation8 + $0x288] ss:$16 sps:$4 sm:$0xff]  }
 0x26f   : > { %6695 = vpow2.f32 %v5265_v62 }
 0x276   : > { %v6690_v11 = vpop.eup %6689 }
 0x277   : > { %v1940_v2 = vpop.f32.mrb[4].mxu1  ;;  %v6692_v3 = vpop.eup %6691  ;;  %v1973_v56 = vadd.f32 1.0, %v6690_v11  ;;  %v6308_v11 = vld [vmem:[#allocation8 + $0x2ac] ss:$16 sps:$4 sm:$0xff]  }
 0x278   : > { %v5699_v4 = vadd.f32 %v1940_v2, %v612_v54  ;;  %v1942_v5 = vpop.f32.mrb[5].mxu1  ;;  %v6694_v6 = vpop.eup %6693  ;;  %v1974_v7 = vadd.f32 1.0, %v6692_v3  ;;  %v6303_v2 = vld [vmem:[#allocation8 + $0x2a0] ss:$16 sps:$4 sm:$0xff]   ;;  %v6306_v3 = vld [vmem:[#allocation8 + $0x2a8] ss:$16 sps:$4 sm:$0xff]  }
 0x279   : > { %v5700_v8 = vadd.f32 %v1942_v5, %v616_v1  ;;  %v1944_v9 = vpop.f32.mrb[6].mxu1  ;;  %v6696_v10 = vpop.eup %6695  ;;  %6697 = vrcp.f32 %v1973_v56  ;;  %v1977_v12 = vadd.f32 1.0, %v6694_v6  ;;  %v6311_v56 = vld [vmem:[#allocation8 + $0x2c4] ss:$16 sps:$4 sm:$0xff]   ;;  %v6309_v5 = vld [vmem:[#allocation8 + $0x2c0] ss:$16 sps:$4 sm:$0xff]  }
 0x27a   : > { %v5262_v13 = vmul.f32 -1.442695, %v5699_v4  ;;  %v5701_v14 = vadd.f32 %v1944_v9, %v612_v54  ;;  %v1946_v15 = vpop.f32.mrb[7].mxu1  ;;  %6699 = vrcp.f32 %v1974_v7  ;;  %v1978_v16 = vadd.f32 1.0, %v6696_v10  ;;  %v6314_v4 = vld [vmem:[#allocation8 + $0x2cc] ss:$16 sps:$4 sm:$0xff]  }
 0x27b   : > { %v5263_v17 = vmul.f32 -1.442695, %v5700_v8  ;;  %v5702_v18 = vadd.f32 %v1946_v15, %v616_v1  ;;  %6701 = vrcp.f32 %v1977_v12  ;;  %v6305_v1 = vld [vmem:[#allocation8 + $0x2a4] ss:$16 sps:$4 sm:$0xff]   ;;  %v6312_v6 = vld [vmem:[#allocation8 + $0x2c8] ss:$16 sps:$4 sm:$0xff]  }
 0x27c   : > { %v5266_v19 = vmul.f32 -1.442695, %v5701_v14  ;;  %6703 = vrcp.f32 %v1978_v16  ;;  %v6317_v7 = vld [vmem:[#allocation8 + $0x2e4] ss:$16 sps:$4 sm:$0xff]   ;;  %v6320_v8 = vld [vmem:[#allocation8 + $0x2ec] ss:$16 sps:$4 sm:$0xff]  }
 0x27d   : > { %v5267_v20 = vmul.f32 -1.442695, %v5702_v18  ;;  %6705 = vpow2.f32 %v5262_v13  ;;  %v6315_v9 = vld [vmem:[#allocation8 + $0x2e0] ss:$16 sps:$4 sm:$0xff]   ;;  %v6318_v10 = vld [vmem:[#allocation8 + $0x2e8] ss:$16 sps:$4 sm:$0xff]  }
 0x27e   : > { %6707 = vpow2.f32 %v5263_v17  ;;  %v6323_v12 = vld [vmem:[#allocation8 + $0x304] ss:$16 sps:$4 sm:$0xff]   ;;  %v6326_v13 = vld [vmem:[#allocation8 + $0x30c] ss:$16 sps:$4 sm:$0xff]   ;;  %v6321_v14 = vld [vmem:[#allocation8 + $0x300] ss:$16 sps:$4 sm:$0xff]  }
 0x27f   : > { %6709 = vpow2.f32 %v5266_v19  ;;  %v6324_v15 = vld [vmem:[#allocation8 + $0x308] ss:$16 sps:$4 sm:$0xff]   ;;  %v6329_v16 = vld [vmem:[#allocation8 + $0x324] ss:$16 sps:$4 sm:$0xff]   ;;  %v6332_v17 = vld [vmem:[#allocation8 + $0x32c] ss:$16 sps:$4 sm:$0xff]  }
 0x280   : > { %6711 = vpow2.f32 %v5267_v20  ;;  %v6327_v18 = vld [vmem:[#allocation8 + $0x320] ss:$16 sps:$4 sm:$0xff]   ;;  %v6330_v19 = vld [vmem:[#allocation8 + $0x328] ss:$16 sps:$4 sm:$0xff]   ;;  %v6335_v20 = vld [vmem:[#allocation8 + $0x344] ss:$16 sps:$4 sm:$0xff]  }
 0x283   : > { %v6698_v21 = vpop.eup %6697 }
 0x284   : > { %v6700_v22 = vpop.eup %6699 }
 0x285   : > { %v6702_v23 = vpop.eup %6701 }
 0x286   : > { %v6704_v24 = vpop.eup %6703  ;;  %v1997_v25 = vpack.c.bf16 %v6702_v23, %v6698_v21  ;;  %v6338_v21 = vld [vmem:[#allocation8 + $0x34c] ss:$16 sps:$4 sm:$0xff]   ;;  %v6336_v23 = vld [vmem:[#allocation8 + $0x348] ss:$16 sps:$4 sm:$0xff]  }
 0x287   : > { %v6706_v26 = vpop.eup %6705  ;;  %v1998_v27 = vpack.c.bf16 %v6704_v24, %v6700_v22  ;;  %v6333_v22 = vld [vmem:[#allocation8 + $0x340] ss:$16 sps:$4 sm:$0xff]   ;;  %v6341_v24 = vld [vmem:[#allocation8 + $0x364] ss:$16 sps:$4 sm:$0xff]  }
 0x288   : > { %v6708_v30 = vpop.eup %6707  ;;  %v1975_v31 = vadd.f32 1.0, %v6706_v26  ;;  %v6339_v26 = vld [vmem:[#allocation8 + $0x360] ss:$16 sps:$4 sm:$0xff]  }
 0x289   : > { %v6710_v34 = vpop.eup %6709  ;;  %v1976_v35 = vadd.f32 1.0, %v6708_v30  ;;  %2823 = vmatprep.mubr.bf16.mxu0 %v1998_v27  ;;  %2909 = vmatprep.mubr.bf16.mxu1 %v1998_v27  ;;  %v6342_v27 = vld [vmem:[#allocation8 + $0x368] ss:$16 sps:$4 sm:$0xff]   ;;  %v6345_v30 = vld [vmem:[#allocation8 + $0x380] ss:$16 sps:$4 sm:$0xff]  }
 0x28a   : > { %v6712_v36 = vpop.eup %6711  ;;  %6713 = vrcp.f32 %v1975_v31  ;;  %v1979_v37 = vadd.f32 1.0, %v6710_v34  ;;  %2824 = vmatmul.mubr.bf16.vlgmr.msra.gmra.mrb[4].mxu0 %v1997_v25  ;;  %2910 = vmatmul.mubr.bf16.vlgmr.msra.gmra.mrb[8].mxu1 %v1997_v25  ;;  %v6344_v25 = vld [vmem:[#allocation8 + $0x36c] ss:$16 sps:$4 sm:$0xff]   ;;  %v6348_v31 = vld [vmem:[#allocation8 + $0x388] ss:$16 sps:$4 sm:$0xff]  }
 0x28b   : > { %6715 = vrcp.f32 %v1976_v35  ;;  %v1980_v38 = vadd.f32 1.0, %v6712_v36  ;;  %2835 = vmatpush1.bf16.msra.mxu0 %v6273_v28  ;;  %2921 = vmatpush1.bf16.msra.mxu1 %v6276_v29  ;;  %v6347_v28 = vld [vmem:[#allocation8 + $0x384] ss:$16 sps:$4 sm:$0xff]   ;;  %v6350_v29 = vld [vmem:[#allocation8 + $0x38c] ss:$16 sps:$4 sm:$0xff]  }
 0x28c   : > { %6717 = vrcp.f32 %v1979_v37  ;;  %2836 = vmatprep.subr.bf16.mxu0 %v6281_v32  ;;  %2922 = vmatprep.subr.bf16.mxu1 %v6284_v33  ;;  %v6353_v32 = vld [vmem:[#allocation8 + $0x3a4] ss:$16 sps:$4 sm:$0xff]   ;;  %v6356_v33 = vld [vmem:[#allocation8 + $0x3ac] ss:$16 sps:$4 sm:$0xff]   ;;  %v6351_v34 = vld [vmem:[#allocation8 + $0x3a0] ss:$16 sps:$4 sm:$0xff]  }
 0x28d   : > { %6719 = vrcp.f32 %v1980_v38  ;;  %v6354_v35 = vld [vmem:[#allocation8 + $0x3a8] ss:$16 sps:$4 sm:$0xff]   ;;  %v6359_v36 = vld [vmem:[#allocation8 + $0x3c4] ss:$16 sps:$4 sm:$0xff]   ;;  %v6362_v37 = vld [vmem:[#allocation8 + $0x3cc] ss:$16 sps:$4 sm:$0xff]  }
 0x28e   : > { %v6357_v38 = vld [vmem:[#allocation8 + $0x3c0] ss:$16 sps:$4 sm:$0xff]  }
 0x28f   : > { %2837 = vmatpush1.bf16.msra.mxu0 %v6279_v41  ;;  %2923 = vmatpush1.bf16.msra.mxu1 %v6282_v43  ;;  %v6360_v41 = vld [vmem:[#allocation8 + $0x3c8] ss:$16 sps:$4 sm:$0xff]   ;;  %v6365_v43 = vld [vmem:[#allocation8 + $0x3e4] ss:$16 sps:$4 sm:$0xff]  }
 0x290   : > { %2838 = vmatprep.subr.bf16.mxu0 %v6287_v44  ;;  %2924 = vmatprep.subr.bf16.mxu1 %v6290_v45  ;;  %v6368_v44 = vld [vmem:[#allocation8 + $0x3ec] ss:$16 sps:$4 sm:$0xff]   ;;  %v6363_v45 = vld [vmem:[#allocation8 + $0x3e0] ss:$16 sps:$4 sm:$0xff]  }
 0x293   : > { %2839 = vmatpush1.bf16.msra.mxu0 %v6285_v46  ;;  %2925 = vmatpush1.bf16.msra.mxu1 %v6288_v47  ;;  %v6366_v46 = vld [vmem:[#allocation8 + $0x3e8] ss:$16 sps:$4 sm:$0xff]  }
 0x294   : > { %v6714_v51 = vpop.eup %6713  ;;  %2840 = vmatprep.subr.bf16.mxu0 %v6293_v48  ;;  %2926 = vmatprep.subr.bf16.mxu1 %v6296_v49  ;;  %v6371_v47 = vld [vmem:[#allocation11 + $0x4] ss:$28 sps:$4 sm:$0xff]   ;;  %v6374_v48 = vld [vmem:[#allocation11 + $0xc] ss:$28 sps:$4 sm:$0xff]  }
 0x295   : > { %v6716_v57 = vpop.eup %6715  ;;  %v6369_v49 = vld [vmem:[#allocation11] ss:$28 sps:$4 sm:$0xff]  }
 0x296   : > { %v6718_v58 = vpop.eup %6717 }
 0x297   : > { %v6720_v59 = vpop.eup %6719  ;;  %2841 = vmatpush1.bf16.msra.mxu0 %v6291_v0  ;;  %2927 = vmatpush1.bf16.msra.mxu1 %v6294_v50  ;;  %v7469_v62 = vpack.c.bf16 %v6718_v58, %v6714_v51  ;;  %v6372_v0 = vld [vmem:[#allocation11 + $0x8] ss:$28 sps:$4 sm:$0xff]   ;;  %v6377_v50 = vld [vmem:[#allocation11 + $0x3c] ss:$28 sps:$4 sm:$0xff]  }
 0x298   : > { %v2000_v54 = vpack.c.bf16 %v6720_v59, %v6716_v57  ;;  %2842 = vmatprep.subr.bf16.mxu0 %v6299_v53  ;;  %2928 = vmatprep.subr.bf16.mxu1 %v6302_v55  ;;  %v6380_v51 = vld [vmem:[#allocation11 + $0x44] ss:$28 sps:$4 sm:$0xff]   ;;  %v6375_v53 = vld [vmem:[#allocation11 + $0x38] ss:$28 sps:$4 sm:$0xff]   ;;  %v6381_v59 = vld [vmem:[#allocation11 + $0x70] ss:$28 sps:$4 sm:$0xff]  }
 0x299   : > { %v6378_v55 = vld [vmem:[#allocation11 + $0x40] ss:$28 sps:$4 sm:$0xff]   ;;  %v6383_v57 = vld [vmem:[#allocation11 + $0x74] ss:$28 sps:$4 sm:$0xff]  }
 0x29a   : > { %2866 = vmatprep.mubr.bf16.mxu0 %v2000_v54  ;;  %2952 = vmatprep.mubr.bf16.mxu1 %v2000_v54  ;;  %v6386_v58 = vld [vmem:[#allocation11 + $0x7c] ss:$28 sps:$4 sm:$0xff]   ;;  %v6392_v54 = vld [vmem:[#allocation11 + $0xb4] ss:$28 sps:$4 sm:$0xff]  }
 0x29b   : > { %2843 = vmatpush1.bf16.msra.mxu0 %v6297_v60  ;;  %2929 = vmatpush1.bf16.msra.mxu1 %v6300_v61  ;;  %v6384_v60 = vld [vmem:[#allocation11 + $0x78] ss:$28 sps:$4 sm:$0xff]   ;;  %v6389_v61 = vld [vmem:[#allocation11 + $0xac] ss:$28 sps:$4 sm:$0xff]  }
 0x29c   : > { %2844 = vmatprep.subr.bf16.mxu0 %v6305_v1  ;;  %2930 = vmatprep.subr.bf16.mxu1 %v6308_v11  ;;  %v6387_v1 = vld [vmem:[#allocation11 + $0xa8] ss:$28 sps:$4 sm:$0xff]  }
 0x29d   : > { %v6395_v11 = vld [vmem:[#allocation11 + $0xe4] ss:$28 sps:$4 sm:$0xff]  }
 0x29f   : > { %2845 = vmatpush1.bf16.msra.mxu0 %v6303_v2  ;;  %2931 = vmatpush1.bf16.msra.mxu1 %v6306_v3  ;;  %v6398_v2 = vld [vmem:[#allocation11 + $0xec] ss:$28 sps:$4 sm:$0xff]   ;;  %v6393_v3 = vld [vmem:[#allocation11 + $0xe0] ss:$28 sps:$4 sm:$0xff]  }
 0x2a0   : > { %2846 = vmatprep.subr.bf16.mxu0 %v6311_v56  ;;  %2932 = vmatprep.subr.bf16.mxu1 %v6314_v4  ;;  %v6396_v56 = vld [vmem:[#allocation11 + $0xe8] ss:$28 sps:$4 sm:$0xff]   ;;  %v6401_v4 = vld [vmem:[#allocation11 + $0x11c] ss:$28 sps:$4 sm:$0xff]  }
 0x2a3   : > { %2847 = vmatpush1.bf16.msra.mxu0 %v6309_v5  ;;  %2933 = vmatpush1.bf16.msra.mxu1 %v6312_v6  ;;  %v6404_v5 = vld [vmem:[#allocation11 + $0x124] ss:$28 sps:$4 sm:$0xff]   ;;  %v6399_v6 = vld [vmem:[#allocation11 + $0x118] ss:$28 sps:$4 sm:$0xff]  }
 0x2a4   : > { %2848 = vmatprep.subr.bf16.mxu0 %v6317_v7  ;;  %2934 = vmatprep.subr.bf16.mxu1 %v6320_v8  ;;  %v6402_v7 = vld [vmem:[#allocation11 + $0x120] ss:$28 sps:$4 sm:$0xff]   ;;  %v6407_v8 = vld [vmem:[#allocation11 + $0x154] ss:$28 sps:$4 sm:$0xff]  }
 0x2a7   : > { %2849 = vmatpush1.bf16.msra.mxu0 %v6315_v9  ;;  %2935 = vmatpush1.bf16.msra.mxu1 %v6318_v10  ;;  %v6410_v9 = vld [vmem:[#allocation11 + $0x15c] ss:$28 sps:$4 sm:$0xff]   ;;  %v6405_v10 = vld [vmem:[#allocation11 + $0x150] ss:$28 sps:$4 sm:$0xff]  }
 0x2a8   : > { %2850 = vmatprep.subr.bf16.mxu0 %v6323_v12  ;;  %2936 = vmatprep.subr.bf16.mxu1 %v6326_v13  ;;  %v6408_v12 = vld [vmem:[#allocation11 + $0x158] ss:$28 sps:$4 sm:$0xff]   ;;  %v6413_v13 = vld [vmem:[#allocation11 + $0x18c] ss:$28 sps:$4 sm:$0xff]  }
 0x2ab   : > { %2851 = vmatpush1.bf16.msra.mxu0 %v6321_v14  ;;  %2937 = vmatpush1.bf16.msra.mxu1 %v6324_v15  ;;  %v6416_v14 = vld [vmem:[#allocation11 + $0x194] ss:$28 sps:$4 sm:$0xff]   ;;  %v6411_v15 = vld [vmem:[#allocation11 + $0x188] ss:$28 sps:$4 sm:$0xff]  }
 0x2ac   : > { %2852 = vmatprep.subr.bf16.mxu0 %v6329_v16  ;;  %2938 = vmatprep.subr.bf16.mxu1 %v6332_v17  ;;  %v6414_v16 = vld [vmem:[#allocation11 + $0x190] ss:$28 sps:$4 sm:$0xff]   ;;  %v6419_v17 = vld [vmem:[#allocation11 + $0x1c4] ss:$28 sps:$4 sm:$0xff]  }
 0x2af   : > { %2853 = vmatpush1.bf16.msra.mxu0 %v6327_v18  ;;  %2939 = vmatpush1.bf16.msra.mxu1 %v6330_v19  ;;  %v6422_v18 = vld [vmem:[#allocation11 + $0x1cc] ss:$28 sps:$4 sm:$0xff]   ;;  %v6417_v19 = vld [vmem:[#allocation11 + $0x1c0] ss:$28 sps:$4 sm:$0xff]  }
 0x2b0   : > { %2854 = vmatprep.subr.bf16.mxu0 %v6335_v20  ;;  %2940 = vmatprep.subr.bf16.mxu1 %v6338_v21  ;;  %v6420_v20 = vld [vmem:[#allocation11 + $0x1c8] ss:$28 sps:$4 sm:$0xff]   ;;  %v6425_v21 = vld [vmem:[#allocation11 + $0x1fc] ss:$28 sps:$4 sm:$0xff]  }
 0x2b3   : > { %2855 = vmatpush1.bf16.msra.mxu0 %v6333_v22  ;;  %2941 = vmatpush1.bf16.msra.mxu1 %v6336_v23  ;;  %v6428_v22 = vld [vmem:[#allocation11 + $0x204] ss:$28 sps:$4 sm:$0xff]   ;;  %v6423_v23 = vld [vmem:[#allocation11 + $0x1f8] ss:$28 sps:$4 sm:$0xff]  }
 0x2b4   : > { %2856 = vmatprep.subr.bf16.mxu0 %v6341_v24  ;;  %2942 = vmatprep.subr.bf16.mxu1 %v6344_v25  ;;  %v6426_v24 = vld [vmem:[#allocation11 + $0x200] ss:$28 sps:$4 sm:$0xff]   ;;  %v6431_v25 = vld [vmem:[#allocation11 + $0x234] ss:$28 sps:$4 sm:$0xff]  }
 0x2b7   : > { %2857 = vmatpush1.bf16.msra.mxu0 %v6339_v26  ;;  %2943 = vmatpush1.bf16.msra.mxu1 %v6342_v27  ;;  %v6434_v26 = vld [vmem:[#allocation11 + $0x23c] ss:$28 sps:$4 sm:$0xff]   ;;  %v6429_v27 = vld [vmem:[#allocation11 + $0x230] ss:$28 sps:$4 sm:$0xff]  }
 0x2b8   : > { %2858 = vmatprep.subr.bf16.mxu0 %v6347_v28  ;;  %2944 = vmatprep.subr.bf16.mxu1 %v6350_v29  ;;  %v6432_v28 = vld [vmem:[#allocation11 + $0x238] ss:$28 sps:$4 sm:$0xff]   ;;  %v6437_v29 = vld [vmem:[#allocation11 + $0x26c] ss:$28 sps:$4 sm:$0xff]  }
 0x2bb   : > { %2859 = vmatpush1.bf16.msra.mxu0 %v6345_v30  ;;  %2945 = vmatpush1.bf16.msra.mxu1 %v6348_v31  ;;  %v6440_v30 = vld [vmem:[#allocation11 + $0x274] ss:$28 sps:$4 sm:$0xff]   ;;  %v6435_v31 = vld [vmem:[#allocation11 + $0x268] ss:$28 sps:$4 sm:$0xff]  }
 0x2bc   : > { %2860 = vmatprep.subr.bf16.mxu0 %v6353_v32  ;;  %2946 = vmatprep.subr.bf16.mxu1 %v6356_v33  ;;  %v6438_v32 = vld [vmem:[#allocation11 + $0x270] ss:$28 sps:$4 sm:$0xff]   ;;  %v6443_v33 = vld [vmem:[#allocation11 + $0x2a4] ss:$28 sps:$4 sm:$0xff]  }
 0x2bf   : > { %2861 = vmatpush1.bf16.msra.mxu0 %v6351_v34  ;;  %2947 = vmatpush1.bf16.msra.mxu1 %v6354_v35  ;;  %v6446_v34 = vld [vmem:[#allocation11 + $0x2ac] ss:$28 sps:$4 sm:$0xff]   ;;  %v6441_v35 = vld [vmem:[#allocation11 + $0x2a0] ss:$28 sps:$4 sm:$0xff]  }
 0x2c0   : > { %2862 = vmatprep.subr.bf16.mxu0 %v6359_v36  ;;  %2948 = vmatprep.subr.bf16.mxu1 %v6362_v37  ;;  %v6444_v36 = vld [vmem:[#allocation11 + $0x2a8] ss:$28 sps:$4 sm:$0xff]   ;;  %v6449_v37 = vld [vmem:[#allocation11 + $0x2dc] ss:$28 sps:$4 sm:$0xff]  }
 0x2c3   : > { %2863 = vmatpush1.bf16.msra.mxu0 %v6357_v38  ;;  %2949 = vmatpush1.bf16.msra.mxu1 %v6360_v41  ;;  %v6452_v38 = vld [vmem:[#allocation11 + $0x2e4] ss:$28 sps:$4 sm:$0xff]   ;;  %v6447_v41 = vld [vmem:[#allocation11 + $0x2d8] ss:$28 sps:$4 sm:$0xff]  }
 0x2c4   : > { %2864 = vmatprep.subr.bf16.mxu0 %v6365_v43  ;;  %2950 = vmatprep.subr.bf16.mxu1 %v6368_v44  ;;  %v6450_v43 = vld [vmem:[#allocation11 + $0x2e0] ss:$28 sps:$4 sm:$0xff]   ;;  %v6455_v44 = vld [vmem:[#allocation11 + $0x314] ss:$28 sps:$4 sm:$0xff]  }
 0x2c7   : > { %2865 = vmatpush1.bf16.msra.mxu0 %v6363_v45  ;;  %2951 = vmatpush1.bf16.msra.mxu1 %v6366_v46  ;;  %v6458_v45 = vld [vmem:[#allocation11 + $0x31c] ss:$28 sps:$4 sm:$0xff]   ;;  %v6453_v46 = vld [vmem:[#allocation11 + $0x310] ss:$28 sps:$4 sm:$0xff]  }
 0x2c8   : > { %4460 = vmatprep.subr.bf16.mxu0 %v6371_v47  ;;  %4546 = vmatprep.subr.bf16.mxu1 %v6374_v48  ;;  %v6456_v47 = vld [vmem:[#allocation11 + $0x318] ss:$28 sps:$4 sm:$0xff]   ;;  %v6461_v48 = vld [vmem:[#allocation11 + $0x34c] ss:$28 sps:$4 sm:$0xff]  }
 0x2ca   : > { %2867 = vmatmul.mubr.bf16.vlgmr.msra.gmra.mrb[4].mxu0 %v7469_v62  ;;  %2953 = vmatmul.mubr.bf16.vlgmr.msra.gmra.mrb[8].mxu1 %v7469_v62  ;;  %v6390_v62 = vld [vmem:[#allocation11 + $0xb0] ss:$28 sps:$4 sm:$0xff]  }
 0x2cb   : > { %4461 = vmatpush1.bf16.msra.mxu0 %v6369_v49  ;;  %4547 = vmatpush1.bf16.msra.mxu1 %v6372_v0  ;;  %v6464_v49 = vld [vmem:[#allocation11 + $0x354] ss:$28 sps:$4 sm:$0xff]   ;;  %v6459_v0 = vld [vmem:[#allocation11 + $0x348] ss:$28 sps:$4 sm:$0xff]  }
 0x2cc   : > { %4462 = vmatprep.subr.bf16.mxu0 %v6377_v50  ;;  %4548 = vmatprep.subr.bf16.mxu1 %v6380_v51  ;;  %v6462_v50 = vld [vmem:[#allocation11 + $0x350] ss:$28 sps:$4 sm:$0xff]   ;;  %v6467_v51 = vld [vmem:[#allocation11 + $0x384] ss:$28 sps:$4 sm:$0xff]  }
 0x2cf   : > { %4463 = vmatpush1.bf16.msra.mxu0 %v6375_v53  ;;  %4549 = vmatpush1.bf16.msra.mxu1 %v6378_v55  ;;  %v6470_v53 = vld [vmem:[#allocation11 + $0x38c] ss:$28 sps:$4 sm:$0xff]   ;;  %v2129_v55 = vld [vmem:[#allocation10] sm:$0xf] }
 0x2d0   : > { %4464 = vmatprep.subr.bf16.mxu0 %v6383_v57  ;;  %4550 = vmatprep.subr.bf16.mxu1 %v6386_v58  ;;  %v2134_v57 = vrot.slane %v2129_v55, %v7450_v40  ;;  %v2142_v58 = vrot.slane %v2129_v55, %v7462_v63 }
 0x2d3   : > { %4465 = vmatpush1.bf16.msra.mxu0 %v6381_v59  ;;  %4551 = vmatpush1.bf16.msra.mxu1 %v6384_v60  ;;  %v2138_v59 = vrot.slane %v2129_v55, %v7453_v42  ;;  %v2146_v60 = vrot.slane %v2129_v55, %v7465_v52  ;;  %v6473_v55 = vld [vmem:[#allocation11 + $0x3bc] ss:$28 sps:$4 sm:$0xff]  }
 0x2d4   : > { %4466 = vmatprep.subr.bf16.mxu0 %v6389_v61  ;;  %4552 = vmatprep.subr.bf16.mxu1 %v6392_v54 }
 0x2d7   : > { %4467 = vmatpush1.bf16.msra.mxu0 %v6387_v1  ;;  %4553 = vmatpush1.bf16.msra.mxu1 %v6390_v62 }
 0x2d8   : > { %4468 = vmatprep.subr.bf16.mxu0 %v6395_v11  ;;  %4554 = vmatprep.subr.bf16.mxu1 %v6398_v2 }
 0x2db   : > { %4469 = vmatpush1.bf16.msra.mxu0 %v6393_v3  ;;  %4555 = vmatpush1.bf16.msra.mxu1 %v6396_v56 }
 0x2dc   : > { %4470 = vmatprep.subr.bf16.mxu0 %v6401_v4  ;;  %4556 = vmatprep.subr.bf16.mxu1 %v6404_v5 }
 0x2df   : > { %4471 = vmatpush1.bf16.msra.mxu0 %v6399_v6  ;;  %4557 = vmatpush1.bf16.msra.mxu1 %v6402_v7 }
 0x2e0   : > { %4472 = vmatprep.subr.bf16.mxu0 %v6407_v8  ;;  %4558 = vmatprep.subr.bf16.mxu1 %v6410_v9 }
 0x2e3   : > { %4473 = vmatpush1.bf16.msra.mxu0 %v6405_v10  ;;  %4559 = vmatpush1.bf16.msra.mxu1 %v6408_v12 }
 0x2e4   : > { %4474 = vmatprep.subr.bf16.mxu0 %v6413_v13  ;;  %4560 = vmatprep.subr.bf16.mxu1 %v6416_v14 }
 0x2e7   : > { %4475 = vmatpush1.bf16.msra.mxu0 %v6411_v15  ;;  %4561 = vmatpush1.bf16.msra.mxu1 %v6414_v16 }
 0x2e8   : > { %4476 = vmatprep.subr.bf16.mxu0 %v6419_v17  ;;  %4562 = vmatprep.subr.bf16.mxu1 %v6422_v18 }
 0x2eb   : > { %4477 = vmatpush1.bf16.msra.mxu0 %v6417_v19  ;;  %4563 = vmatpush1.bf16.msra.mxu1 %v6420_v20 }
 0x2ec   : > { %4478 = vmatprep.subr.bf16.mxu0 %v6425_v21  ;;  %4564 = vmatprep.subr.bf16.mxu1 %v6428_v22 }
 0x2ef   : > { %4479 = vmatpush1.bf16.msra.mxu0 %v6423_v23  ;;  %4565 = vmatpush1.bf16.msra.mxu1 %v6426_v24 }
 0x2f0   : > { %4480 = vmatprep.subr.bf16.mxu0 %v6431_v25  ;;  %4566 = vmatprep.subr.bf16.mxu1 %v6434_v26 }
 0x2f3   : > { %4481 = vmatpush1.bf16.msra.mxu0 %v6429_v27  ;;  %4567 = vmatpush1.bf16.msra.mxu1 %v6432_v28 }
 0x2f4   : > { %4482 = vmatprep.subr.bf16.mxu0 %v6437_v29  ;;  %4568 = vmatprep.subr.bf16.mxu1 %v6440_v30 }
 0x2f7   : > { %4483 = vmatpush1.bf16.msra.mxu0 %v6435_v31  ;;  %4569 = vmatpush1.bf16.msra.mxu1 %v6438_v32 }
 0x2f8   : > { %4484 = vmatprep.subr.bf16.mxu0 %v6443_v33  ;;  %4570 = vmatprep.subr.bf16.mxu1 %v6446_v34 }
 0x2fb   : > { %4485 = vmatpush1.bf16.msra.mxu0 %v6441_v35  ;;  %4571 = vmatpush1.bf16.msra.mxu1 %v6444_v36 }
 0x2fc   : > { %4486 = vmatprep.subr.bf16.mxu0 %v6449_v37  ;;  %4572 = vmatprep.subr.bf16.mxu1 %v6452_v38 }
 0x2ff   : > { %4487 = vmatpush1.bf16.msra.mxu0 %v6447_v41  ;;  %4573 = vmatpush1.bf16.msra.mxu1 %v6450_v43 }
 0x300   : > { %4488 = vmatprep.subr.bf16.mxu0 %v6455_v44  ;;  %4574 = vmatprep.subr.bf16.mxu1 %v6458_v45 }
 0x303   : > { %4489 = vmatpush1.bf16.msra.mxu0 %v6453_v46  ;;  %4575 = vmatpush1.bf16.msra.mxu1 %v6456_v47 }
 0x304   : > { %4490 = vmatprep.subr.bf16.mxu0 %v6461_v48  ;;  %4576 = vmatprep.subr.bf16.mxu1 %v6464_v49 }
 0x307   : > { %4491 = vmatpush1.bf16.msra.mxu0 %v6459_v0  ;;  %4577 = vmatpush1.bf16.msra.mxu1 %v6462_v50  ;;  %v6465_v50 = vld [vmem:[#allocation11 + $0x380] ss:$28 sps:$4 sm:$0xff]  }
 0x308   : > { %4503 = vmatprep.subr.bf16.mxu0 %v6467_v51  ;;  %4589 = vmatprep.subr.bf16.mxu1 %v6470_v53  ;;  %v6468_v51 = vld [vmem:[#allocation11 + $0x388] ss:$28 sps:$4 sm:$0xff]  }
 0x39d   : > { %v2868_v61 = vpop.f32.mrb[4].mxu0  ;;  %v2954_v54 = vpop.f32.mrb[8].mxu1 }
 0x39e   : > { %v5703_v1 = vadd.f32 %v2868_v61, %v2134_v57  ;;  %v5707_v62 = vadd.f32 %v2954_v54, %v2142_v58  ;;  %v2870_v11 = vpop.f32.mrb[5].mxu0  ;;  %v2956_v2 = vpop.f32.mrb[9].mxu1  ;;  %v6482_v61 = vld [vmem:[#allocation11 + $0x3fc] ss:$28 sps:$4 sm:$0xff]   ;;  %v6477_v54 = vld [vmem:[#allocation11 + $0x3f0] ss:$28 sps:$4 sm:$0xff]  }
 0x39f   : > { %v5704_v3 = vadd.f32 %v2870_v11, %v2138_v59  ;;  %v5708_v56 = vadd.f32 %v2956_v2, %v2146_v60  ;;  %v2872_v4 = vpop.f32.mrb[6].mxu0  ;;  %v2958_v5 = vpop.f32.mrb[10].mxu1  ;;  %v6488_v11 = vld [vmem:[#allocation11 + $0x434] ss:$28 sps:$4 sm:$0xff]   ;;  %v6483_v2 = vld [vmem:[#allocation11 + $0x428] ss:$28 sps:$4 sm:$0xff]  }
 0x3a0   : > { %v5396_v6 = vmul.f32 -1.442695, %v5703_v1  ;;  %v5398_v7 = vmul.f32 -1.442695, %v5707_v62  ;;  %v5705_v8 = vadd.f32 %v2872_v4, %v2134_v57  ;;  %v5709_v9 = vadd.f32 %v2958_v5, %v2142_v58  ;;  %v2874_v10 = vpop.f32.mrb[7].mxu0  ;;  %v2960_v12 = vpop.f32.mrb[11].mxu1 }
 0x3a1   : > { %v5397_v13 = vmul.f32 -1.442695, %v5704_v3  ;;  %v5399_v14 = vmul.f32 -1.442695, %v5708_v56  ;;  %v5706_v15 = vadd.f32 %v2874_v10, %v2138_v59  ;;  %v5710_v16 = vadd.f32 %v2960_v12, %v2146_v60  ;;  %v6476_v57 = vld [vmem:[#allocation11 + $0x3c4] ss:$28 sps:$4 sm:$0xff]  }
 0x3a2   : > { %6721 = vpow2.f32 %v5396_v6  ;;  %v5400_v17 = vmul.f32 -1.442695, %v5705_v8  ;;  %v5402_v18 = vmul.f32 -1.442695, %v5709_v9  ;;  %v6471_v58 = vld [vmem:[#allocation11 + $0x3b8] ss:$28 sps:$4 sm:$0xff]  }
 0x3a3   : > { %6723 = vpow2.f32 %v5398_v7  ;;  %v5401_v19 = vmul.f32 -1.442695, %v5706_v15  ;;  %v5403_v20 = vmul.f32 -1.442695, %v5710_v16  ;;  %v6474_v59 = vld [vmem:[#allocation11 + $0x3c0] ss:$28 sps:$4 sm:$0xff]  }
 0x3a4   : > { %6725 = vpow2.f32 %v5397_v13  ;;  %v6479_v60 = vld [vmem:[#allocation11 + $0x3f4] ss:$28 sps:$4 sm:$0xff]   ;;  %v6485_v62 = vld [vmem:[#allocation11 + $0x42c] ss:$28 sps:$4 sm:$0xff]   ;;  %v6491_v56 = vld [vmem:[#allocation11 + $0x464] ss:$28 sps:$4 sm:$0xff]  }
 0x3a5   : > { %6727 = vpow2.f32 %v5399_v14  ;;  %v6480_v1 = vld [vmem:[#allocation11 + $0x3f8] ss:$28 sps:$4 sm:$0xff]   ;;  %v6486_v3 = vld [vmem:[#allocation11 + $0x430] ss:$28 sps:$4 sm:$0xff]   ;;  %v6489_v5 = vld [vmem:[#allocation11 + $0x460] ss:$28 sps:$4 sm:$0xff]  }
 0x3a6   : > { %6729 = vpow2.f32 %v5400_v17  ;;  %v6494_v4 = vld [vmem:[#allocation11 + $0x46c] ss:$28 sps:$4 sm:$0xff]   ;;  %v6497_v7 = vld [vmem:[#allocation11 + $0x49c] ss:$28 sps:$4 sm:$0xff]   ;;  %v6500_v8 = vld [vmem:[#allocation11 + $0x4a4] ss:$28 sps:$4 sm:$0xff]  }
 0x3a7   : > { %6731 = vpow2.f32 %v5402_v18  ;;  %v6492_v6 = vld [vmem:[#allocation11 + $0x468] ss:$28 sps:$4 sm:$0xff]   ;;  %v6495_v9 = vld [vmem:[#allocation11 + $0x498] ss:$28 sps:$4 sm:$0xff]   ;;  %v6498_v10 = vld [vmem:[#allocation11 + $0x4a0] ss:$28 sps:$4 sm:$0xff]  }
 0x3a8   : > { %6733 = vpow2.f32 %v5401_v19  ;;  %v6503_v12 = vld [vmem:[#allocation11 + $0x4d4] ss:$28 sps:$4 sm:$0xff]   ;;  %v6506_v13 = vld [vmem:[#allocation11 + $0x4dc] ss:$28 sps:$4 sm:$0xff]   ;;  %v6509_v16 = vld [vmem:[#allocation11 + $0x50c] ss:$28 sps:$4 sm:$0xff]  }
 0x3a9   : > { %6735 = vpow2.f32 %v5403_v20  ;;  %v6501_v14 = vld [vmem:[#allocation11 + $0x4d0] ss:$28 sps:$4 sm:$0xff]   ;;  %v6504_v15 = vld [vmem:[#allocation11 + $0x4d8] ss:$28 sps:$4 sm:$0xff]   ;;  %v6507_v18 = vld [vmem:[#allocation11 + $0x508] ss:$28 sps:$4 sm:$0xff]  }
 0x3aa   : > { %v6512_v17 = vld [vmem:[#allocation11 + $0x514] ss:$28 sps:$4 sm:$0xff]   ;;  %v6515_v20 = vld [vmem:[#allocation11 + $0x544] ss:$28 sps:$4 sm:$0xff]  }
 0x3ab   : > { %v6510_v19 = vld [vmem:[#allocation11 + $0x510] ss:$28 sps:$4 sm:$0xff]  }
 0x3ac   : > { %v6722_v21 = vpop.eup %6721 }
 0x3ad   : > { %v6724_v22 = vpop.eup %6723  ;;  %v2987_v23 = vadd.f32 1.0, %v6722_v21  ;;  %v6518_v21 = vld [vmem:[#allocation11 + $0x54c] ss:$28 sps:$4 sm:$0xff]  }
 0x3ae   : > { %v6726_v24 = vpop.eup %6725  ;;  %v2989_v25 = vadd.f32 1.0, %v6724_v22  ;;  %v6513_v22 = vld [vmem:[#allocation11 + $0x540] ss:$28 sps:$4 sm:$0xff]  }
 0x3af   : > { %v6728_v26 = vpop.eup %6727  ;;  %6737 = vrcp.f32 %v2987_v23  ;;  %v2988_v27 = vadd.f32 1.0, %v6726_v24  ;;  %v6516_v23 = vld [vmem:[#allocation11 + $0x548] ss:$28 sps:$4 sm:$0xff]   ;;  %v6521_v24 = vld [vmem:[#allocation11 + $0x57c] ss:$28 sps:$4 sm:$0xff]  }
 0x3b0   : > { %v6730_v28 = vpop.eup %6729  ;;  %6739 = vrcp.f32 %v2989_v25  ;;  %v2990_v29 = vadd.f32 1.0, %v6728_v26  ;;  %v6524_v25 = vld [vmem:[#allocation11 + $0x584] ss:$28 sps:$4 sm:$0xff]   ;;  %v6519_v26 = vld [vmem:[#allocation11 + $0x578] ss:$28 sps:$4 sm:$0xff]  }
 0x3b1   : > { %v6732_v30 = vpop.eup %6731  ;;  %6741 = vrcp.f32 %v2988_v27  ;;  %v2991_v31 = vadd.f32 1.0, %v6730_v28  ;;  %v6522_v27 = vld [vmem:[#allocation11 + $0x580] ss:$28 sps:$4 sm:$0xff]   ;;  %v6527_v28 = vld [vmem:[#allocation11 + $0x5b4] ss:$28 sps:$4 sm:$0xff]  }
 0x3b2   : > { %v6734_v32 = vpop.eup %6733  ;;  %6743 = vrcp.f32 %v2990_v29  ;;  %v2993_v33 = vadd.f32 1.0, %v6732_v30  ;;  %v6530_v29 = vld [vmem:[#allocation11 + $0x5bc] ss:$28 sps:$4 sm:$0xff]   ;;  %v6525_v30 = vld [vmem:[#allocation11 + $0x5b0] ss:$28 sps:$4 sm:$0xff]  }
 0x3b3   : > { %v6736_v34 = vpop.eup %6735  ;;  %6745 = vrcp.f32 %v2991_v31  ;;  %v2992_v35 = vadd.f32 1.0, %v6734_v32  ;;  %v6528_v31 = vld [vmem:[#allocation11 + $0x5b8] ss:$28 sps:$4 sm:$0xff]   ;;  %v6533_v32 = vld [vmem:[#allocation11 + $0x5ec] ss:$28 sps:$4 sm:$0xff]  }
 0x3b4   : > { %6747 = vrcp.f32 %v2993_v33  ;;  %v2994_v36 = vadd.f32 1.0, %v6736_v34  ;;  %v6536_v33 = vld [vmem:[#allocation11 + $0x5f4] ss:$28 sps:$4 sm:$0xff]   ;;  %v6531_v34 = vld [vmem:[#allocation11 + $0x5e8] ss:$28 sps:$4 sm:$0xff]  }
 0x3b5   : > { %6749 = vrcp.f32 %v2992_v35  ;;  %v6534_v35 = vld [vmem:[#allocation11 + $0x5f0] ss:$28 sps:$4 sm:$0xff]  }
 0x3b6   : > { %6751 = vrcp.f32 %v2994_v36  ;;  %v6539_v36 = vld [vmem:[#allocation11 + $0x624] ss:$28 sps:$4 sm:$0xff]  }
 0x3b9   : > { %v6738_v37 = vpop.eup %6737 }
 0x3ba   : > { %v6740_v38 = vpop.eup %6739 }
 0x3bb   : > { %v6742_v41 = vpop.eup %6741 }
 0x3bc   : > { %v6744_v43 = vpop.eup %6743 }
 0x3bd   : > { %v6746_v44 = vpop.eup %6745 }
 0x3be   : > { %v6748_v45 = vpop.eup %6747  ;;  %v7477_v46 = vpack.c.bf16 %v6746_v44, %v6738_v37  ;;  %v6542_v37 = vld [vmem:[#allocation11 + $0x62c] ss:$28 sps:$4 sm:$0xff]   ;;  %v6548_v44 = vld [vmem:[#allocation11 + $0x664] ss:$28 sps:$4 sm:$0xff]  }
 0x3bf   : > { %v6750_v47 = vpop.eup %6749  ;;  %v7479_v48 = vpack.c.bf16 %v6748_v45, %v6740_v38  ;;  %v6537_v38 = vld [vmem:[#allocation11 + $0x620] ss:$28 sps:$4 sm:$0xff]   ;;  %v6543_v45 = vld [vmem:[#allocation11 + $0x658] ss:$28 sps:$4 sm:$0xff]  }
 0x3c0   : > { %v6752_v49 = vpop.eup %6751  ;;  %v7481_v0 = vpack.c.bf16 %v6750_v47, %v6742_v41  ;;  %v6540_v41 = vld [vmem:[#allocation11 + $0x628] ss:$28 sps:$4 sm:$0xff]   ;;  %v6546_v47 = vld [vmem:[#allocation11 + $0x660] ss:$28 sps:$4 sm:$0xff]  }
 0x3c1   : > { %v7483_v53 = vpack.c.bf16 %v6752_v49, %v6744_v43  ;;  %v6545_v43 = vld [vmem:[#allocation11 + $0x65c] ss:$28 sps:$4 sm:$0xff]   ;;  %v6551_v49 = vld [vmem:[#allocation11 + $0x694] ss:$28 sps:$4 sm:$0xff]  }
 0x3c2   : > { %4492 = vmatprep.mubr.bf16.mxu0 %v7481_v0  ;;  %4578 = vmatprep.mubr.bf16.mxu1 %v7481_v0 }
 0x3c3   : > { %4493 = vmatmul.mubr.bf16.vlgmr.msra.gmra.mrb[8].mxu0 %v7477_v46  ;;  %4579 = vmatmul.mubr.bf16.vlgmr.msra.gmra.mrb[12].mxu1 %v7477_v46 }
 0x3c4   : > { %4504 = vmatpush1.bf16.msra.mxu0 %v6465_v50  ;;  %4590 = vmatpush1.bf16.msra.mxu1 %v6468_v51  ;;  %v6554_v50 = vld [vmem:[#allocation11 + $0x69c] ss:$28 sps:$4 sm:$0xff]   ;;  %v6549_v51 = vld [vmem:[#allocation11 + $0x690] ss:$28 sps:$4 sm:$0xff]  }
 0x3c5   : > { %4535 = vmatprep.mubr.bf16.mxu0 %v7483_v53  ;;  %4621 = vmatprep.mubr.bf16.mxu1 %v7483_v53 }
 0x3c6   : > { %4505 = vmatprep.subr.bf16.mxu0 %v6473_v55  ;;  %4591 = vmatprep.subr.bf16.mxu1 %v6476_v57  ;;  %v6552_v55 = vld [vmem:[#allocation11 + $0x698] ss:$28 sps:$4 sm:$0xff]   ;;  %v6557_v57 = vld [vmem:[#allocation11 + $0x6cc] ss:$28 sps:$4 sm:$0xff]  }
 0x3c8   : > { %4506 = vmatpush1.bf16.msra.mxu0 %v6471_v58  ;;  %4592 = vmatpush1.bf16.msra.mxu1 %v6474_v59  ;;  %v6560_v58 = vld [vmem:[#allocation11 + $0x6d4] ss:$28 sps:$4 sm:$0xff]   ;;  %v6555_v59 = vld [vmem:[#allocation11 + $0x6c8] ss:$28 sps:$4 sm:$0xff]  }
 0x3c9   : > { %4507 = vmatprep.subr.bf16.mxu0 %v6479_v60  ;;  %4593 = vmatprep.subr.bf16.mxu1 %v6482_v61  ;;  %v6558_v60 = vld [vmem:[#allocation11 + $0x6d0] ss:$28 sps:$4 sm:$0xff]  }
 0x3ca   : > { %v6563_v61 = vld [vmem:[#allocation11 + $0x14] ss:$28 sps:$4 sm:$0xff]  }
 0x3cc   : > { %4508 = vmatpush1.bf16.msra.mxu0 %v6477_v54  ;;  %4594 = vmatpush1.bf16.msra.mxu1 %v6480_v1  ;;  %v6564_v54 = vld [vmem:[#allocation11 + $0x1d8] ss:$28 sps:$4 sm:$0xff]   ;;  %v6561_v1 = vld [vmem:[#allocation11 + $0x10] ss:$28 sps:$4 sm:$0xff]  }
 0x3cd   : > { %4509 = vmatprep.subr.bf16.mxu0 %v6485_v62  ;;  %4595 = vmatprep.subr.bf16.mxu1 %v6488_v11  ;;  %v6565_v62 = vld [vmem:[#allocation11 + $0x18] ss:$28 sps:$4 sm:$0xff]   ;;  %v6568_v11 = vld [vmem:[#allocation11 + $0x4c] ss:$28 sps:$4 sm:$0xff]  }
 0x3d0   : > { %4510 = vmatpush1.bf16.msra.mxu0 %v6483_v2  ;;  %4596 = vmatpush1.bf16.msra.mxu1 %v6486_v3  ;;  %v6569_v2 = vld [vmem:[#allocation11 + $0x210] ss:$28 sps:$4 sm:$0xff]   ;;  %v6566_v3 = vld [vmem:[#allocation11 + $0x48] ss:$28 sps:$4 sm:$0xff]  }
 0x3d1   : > { %4511 = vmatprep.subr.bf16.mxu0 %v6491_v56  ;;  %4597 = vmatprep.subr.bf16.mxu1 %v6494_v4  ;;  %v6570_v56 = vld [vmem:[#allocation11 + $0x50] ss:$28 sps:$4 sm:$0xff]   ;;  %v6573_v4 = vld [vmem:[#allocation11 + $0x84] ss:$28 sps:$4 sm:$0xff]  }
 0x3d4   : > { %4512 = vmatpush1.bf16.msra.mxu0 %v6489_v5  ;;  %4598 = vmatpush1.bf16.msra.mxu1 %v6492_v6  ;;  %v6574_v5 = vld [vmem:[#allocation11 + $0x248] ss:$28 sps:$4 sm:$0xff]   ;;  %v6571_v6 = vld [vmem:[#allocation11 + $0x80] ss:$28 sps:$4 sm:$0xff]  }
 0x3d5   : > { %4513 = vmatprep.subr.bf16.mxu0 %v6497_v7  ;;  %4599 = vmatprep.subr.bf16.mxu1 %v6500_v8  ;;  %v6575_v7 = vld [vmem:[#allocation11 + $0x88] ss:$28 sps:$4 sm:$0xff]   ;;  %v6578_v8 = vld [vmem:[#allocation11 + $0xbc] ss:$28 sps:$4 sm:$0xff]  }
 0x3d8   : > { %4514 = vmatpush1.bf16.msra.mxu0 %v6495_v9  ;;  %4600 = vmatpush1.bf16.msra.mxu1 %v6498_v10  ;;  %v6579_v9 = vld [vmem:[#allocation11 + $0x280] ss:$28 sps:$4 sm:$0xff]   ;;  %v6576_v10 = vld [vmem:[#allocation11 + $0xb8] ss:$28 sps:$4 sm:$0xff]  }
 0x3d9   : > { %4515 = vmatprep.subr.bf16.mxu0 %v6503_v12  ;;  %4601 = vmatprep.subr.bf16.mxu1 %v6506_v13  ;;  %v6580_v12 = vld [vmem:[#allocation11 + $0xc0] ss:$28 sps:$4 sm:$0xff]   ;;  %v6583_v13 = vld [vmem:[#allocation11 + $0xf4] ss:$28 sps:$4 sm:$0xff]  }
 0x3dc   : > { %4516 = vmatpush1.bf16.msra.mxu0 %v6501_v14  ;;  %4602 = vmatpush1.bf16.msra.mxu1 %v6504_v15  ;;  %v6581_v14 = vld [vmem:[#allocation11 + $0xf0] ss:$28 sps:$4 sm:$0xff]   ;;  %v6585_v15 = vld [vmem:[#allocation11 + $0xf8] ss:$28 sps:$4 sm:$0xff]  }
 0x3dd   : > { %4517 = vmatprep.subr.bf16.mxu0 %v6509_v16  ;;  %4603 = vmatprep.subr.bf16.mxu1 %v6512_v17  ;;  %v6588_v16 = vld [vmem:[#allocation11 + $0x12c] ss:$28 sps:$4 sm:$0xff]  }
 0x3de   : > { %v6589_v17 = vld [vmem:[#allocation11 + $0x2f0] ss:$28 sps:$4 sm:$0xff]  }
 0x3e0   : > { %4518 = vmatpush1.bf16.msra.mxu0 %v6507_v18  ;;  %4604 = vmatpush1.bf16.msra.mxu1 %v6510_v19  ;;  %v6586_v18 = vld [vmem:[#allocation11 + $0x128] ss:$28 sps:$4 sm:$0xff]   ;;  %v6590_v19 = vld [vmem:[#allocation11 + $0x130] ss:$28 sps:$4 sm:$0xff]  }
 0x3e1   : > { %4519 = vmatprep.subr.bf16.mxu0 %v6515_v20  ;;  %4605 = vmatprep.subr.bf16.mxu1 %v6518_v21  ;;  %v6593_v20 = vld [vmem:[#allocation11 + $0x164] ss:$28 sps:$4 sm:$0xff]  }
 0x3e2   : > { %v6594_v21 = vld [vmem:[#allocation11 + $0x328] ss:$28 sps:$4 sm:$0xff]  }
 0x3e4   : > { %4520 = vmatpush1.bf16.msra.mxu0 %v6513_v22  ;;  %4606 = vmatpush1.bf16.msra.mxu1 %v6516_v23  ;;  %v6591_v22 = vld [vmem:[#allocation11 + $0x160] ss:$28 sps:$4 sm:$0xff]   ;;  %v6595_v23 = vld [vmem:[#allocation11 + $0x168] ss:$28 sps:$4 sm:$0xff]  }
 0x3e5   : > { %4521 = vmatprep.subr.bf16.mxu0 %v6521_v24  ;;  %4607 = vmatprep.subr.bf16.mxu1 %v6524_v25  ;;  %v6598_v24 = vld [vmem:[#allocation11 + $0x19c] ss:$28 sps:$4 sm:$0xff]  }
 0x3e6   : > { %v6599_v25 = vld [vmem:[#allocation11 + $0x360] ss:$28 sps:$4 sm:$0xff]  }
 0x3e8   : > { %4522 = vmatpush1.bf16.msra.mxu0 %v6519_v26  ;;  %4608 = vmatpush1.bf16.msra.mxu1 %v6522_v27  ;;  %v6596_v26 = vld [vmem:[#allocation11 + $0x198] ss:$28 sps:$4 sm:$0xff]   ;;  %v6600_v27 = vld [vmem:[#allocation11 + $0x1a0] ss:$28 sps:$4 sm:$0xff]  }
 0x3e9   : > { %4523 = vmatprep.subr.bf16.mxu0 %v6527_v28  ;;  %4609 = vmatprep.subr.bf16.mxu1 %v6530_v29  ;;  %v6603_v28 = vld [vmem:[#allocation11 + $0x1d4] ss:$28 sps:$4 sm:$0xff]  }
 0x3ea   : > { %v6604_v29 = vld [vmem:[#allocation11 + $0x558] ss:$28 sps:$4 sm:$0xff]  }
 0x3ec   : > { %4524 = vmatpush1.bf16.msra.mxu0 %v6525_v30  ;;  %4610 = vmatpush1.bf16.msra.mxu1 %v6528_v31  ;;  %v6601_v30 = vld [vmem:[#allocation11 + $0x1d0] ss:$28 sps:$4 sm:$0xff]   ;;  %v6605_v31 = vld [vmem:[#allocation11 + $0x398] ss:$28 sps:$4 sm:$0xff]  }
 0x3ed   : > { %4525 = vmatprep.subr.bf16.mxu0 %v6533_v32  ;;  %4611 = vmatprep.subr.bf16.mxu1 %v6536_v33  ;;  %v6608_v32 = vld [vmem:[#allocation11 + $0x20c] ss:$28 sps:$4 sm:$0xff]  }
 0x3ee   : > { %v6609_v33 = vld [vmem:[#allocation11 + $0x590] ss:$28 sps:$4 sm:$0xff]  }
 0x3f0   : > { %4526 = vmatpush1.bf16.msra.mxu0 %v6531_v34  ;;  %4612 = vmatpush1.bf16.msra.mxu1 %v6534_v35  ;;  %v6606_v34 = vld [vmem:[#allocation11 + $0x208] ss:$28 sps:$4 sm:$0xff]   ;;  %v6610_v35 = vld [vmem:[#allocation11 + $0x3d0] ss:$28 sps:$4 sm:$0xff]  }
 0x3f1   : > { %4527 = vmatprep.subr.bf16.mxu0 %v6539_v36  ;;  %4613 = vmatprep.subr.bf16.mxu1 %v6542_v37  ;;  %v6613_v36 = vld [vmem:[#allocation11 + $0x244] ss:$28 sps:$4 sm:$0xff]  }
 0x3f2   : > { %v6614_v37 = vld [vmem:[#allocation11 + $0x5c8] ss:$28 sps:$4 sm:$0xff]  }
 0x3f4   : > { %4528 = vmatpush1.bf16.msra.mxu0 %v6537_v38  ;;  %4614 = vmatpush1.bf16.msra.mxu1 %v6540_v41  ;;  %v6611_v38 = vld [vmem:[#allocation11 + $0x240] ss:$28 sps:$4 sm:$0xff]   ;;  %v6615_v41 = vld [vmem:[#allocation11 + $0x408] ss:$28 sps:$4 sm:$0xff]  }
 0x3f5   : > { %4529 = vmatprep.subr.bf16.mxu0 %v6545_v43  ;;  %4615 = vmatprep.subr.bf16.mxu1 %v6548_v44  ;;  %v6618_v43 = vld [vmem:[#allocation11 + $0x27c] ss:$28 sps:$4 sm:$0xff]  }
 0x3f6   : > { %v6619_v44 = vld [vmem:[#allocation11 + $0x600] ss:$28 sps:$4 sm:$0xff]  }
 0x3f8   : > { %4530 = vmatpush1.bf16.msra.mxu0 %v6543_v45  ;;  %4616 = vmatpush1.bf16.msra.mxu1 %v6546_v47  ;;  %v6616_v45 = vld [vmem:[#allocation11 + $0x278] ss:$28 sps:$4 sm:$0xff]   ;;  %v6620_v47 = vld [vmem:[#allocation11 + $0x440] ss:$28 sps:$4 sm:$0xff]  }
 0x3f9   : > { %4531 = vmatprep.subr.bf16.mxu0 %v6551_v49  ;;  %4617 = vmatprep.subr.bf16.mxu1 %v6554_v50  ;;  %v6623_v49 = vld [vmem:[#allocation11 + $0x2b4] ss:$28 sps:$4 sm:$0xff]  }
 0x3fa   : > { %v6624_v50 = vld [vmem:[#allocation11 + $0x638] ss:$28 sps:$4 sm:$0xff]  }
 0x3fc   : > { %4532 = vmatpush1.bf16.msra.mxu0 %v6549_v51  ;;  %4618 = vmatpush1.bf16.msra.mxu1 %v6552_v55  ;;  %v6621_v51 = vld [vmem:[#allocation11 + $0x2b0] ss:$28 sps:$4 sm:$0xff]   ;;  %v6625_v55 = vld [vmem:[#allocation11 + $0x478] ss:$28 sps:$4 sm:$0xff]  }
 0x3fd   : > { %4533 = vmatprep.subr.bf16.mxu0 %v6557_v57  ;;  %4619 = vmatprep.subr.bf16.mxu1 %v6560_v58  ;;  %v6628_v57 = vld [vmem:[#allocation11 + $0x2ec] ss:$28 sps:$4 sm:$0xff]  }
 0x3fe   : > { %v6629_v58 = vld [vmem:[#allocation11 + $0x670] ss:$28 sps:$4 sm:$0xff]  }
 0x400   : > { %4534 = vmatpush1.bf16.msra.mxu0 %v6555_v59  ;;  %4620 = vmatpush1.bf16.msra.mxu1 %v6558_v60  ;;  %v6626_v59 = vld [vmem:[#allocation11 + $0x2e8] ss:$28 sps:$4 sm:$0xff]   ;;  %v6630_v60 = vld [vmem:[#allocation11 + $0x4b0] ss:$28 sps:$4 sm:$0xff]  }
 0x401   : > { %4632 = vmatprep.subr.bf16.mxu0 %v6563_v61  ;;  %5647 = vmatprep.subr.bf16.mxu1 %v6564_v54  ;;  %v6633_v61 = vld [vmem:[#allocation11 + $0x324] ss:$28 sps:$4 sm:$0xff]  }
 0x402   : > { %v6634_v54 = vld [vmem:[#allocation11 + $0x6a8] ss:$28 sps:$4 sm:$0xff]  }
 0x403   : > { %4536 = vmatmul.mubr.bf16.vlgmr.msra.gmra.mrb[8].mxu0 %v7479_v48  ;;  %4622 = vmatmul.mubr.bf16.vlgmr.msra.gmra.mrb[12].mxu1 %v7479_v48 }
 0x404   : > { %4633 = vmatpush1.bf16.msra.mxu0 %v6561_v1  ;;  %4664 = vmatprep.mubr.bf16.mxu0 %v7481_v0  ;;  %v6631_v1 = vld [vmem:[#allocation11 + $0x320] ss:$28 sps:$4 sm:$0xff]  }
 0x405   : > { %5648 = vmatpush3.bf16.msra.mxu1 %v6565_v62  ;;  %4750 = vmatprep.mubr.bf16.mxu1 %v7481_v0  ;;  %v6584_v0 = vld [vmem:[#allocation11 + $0x2b8] ss:$28 sps:$4 sm:$0xff]   ;;  %v6635_v62 = vld [vmem:[#allocation11 + $0x4e8] ss:$28 sps:$4 sm:$0xff]  }
 0x406   : > { %4634 = vmatprep.subr.bf16.mxu0 %v6568_v11  ;;  %5649 = vmatprep.subr.bf16.mxu1 %v6569_v2  ;;  %v6638_v11 = vld [vmem:[#allocation11 + $0x35c] ss:$28 sps:$4 sm:$0xff]  }
 0x407   : > { %v6639_v2 = vld [vmem:[#allocation11 + $0x6e0] ss:$28 sps:$4 sm:$0xff]  }
 0x408   : > { %4635 = vmatpush1.bf16.msra.mxu0 %v6566_v3  ;;  %v6636_v3 = vld [vmem:[#allocation11 + $0x358] ss:$28 sps:$4 sm:$0xff]  }
 0x409   : > { %5650 = vmatpush3.bf16.msra.mxu1 %v6570_v56  ;;  %4636 = vmatprep.subr.bf16.mxu0 %v6573_v4  ;;  %v6640_v56 = vld [vmem:[#allocation11 + $0x520] ss:$28 sps:$4 sm:$0xff]   ;;  %v6643_v4 = vld [vmem:[#allocation11 + $0x394] ss:$28 sps:$4 sm:$0xff]  }
 0x40a   : > { %5651 = vmatprep.subr.bf16.mxu1 %v6574_v5  ;;  %v6641_v5 = vld [vmem:[#allocation11 + $0x390] ss:$28 sps:$4 sm:$0xff]  }
 0x40c   : > { %4637 = vmatpush1.bf16.msra.mxu0 %v6571_v6  ;;  %v6646_v6 = vld [vmem:[#allocation11 + $0x3cc] ss:$28 sps:$4 sm:$0xff]  }
 0x40d   : > { %5652 = vmatpush3.bf16.msra.mxu1 %v6575_v7  ;;  %4638 = vmatprep.subr.bf16.mxu0 %v6578_v8  ;;  %v6644_v7 = vld [vmem:[#allocation11 + $0x3c8] ss:$28 sps:$4 sm:$0xff]  }
 0x40e   : > { %5653 = vmatprep.subr.bf16.mxu1 %v6579_v9  ;;  %v6649_v8 = vld [vmem:[#allocation11 + $0x404] ss:$28 sps:$4 sm:$0xff]  }
 0x40f   : > { %v6647_v9 = vld [vmem:[#allocation11 + $0x400] ss:$28 sps:$4 sm:$0xff]  }
 0x410   : > { %4639 = vmatpush1.bf16.msra.mxu0 %v6576_v10  ;;  %v6652_v10 = vld [vmem:[#allocation11 + $0x43c] ss:$28 sps:$4 sm:$0xff]  }
 0x411   : > { %5654 = vmatpush3.bf16.msra.mxu1 %v6580_v12  ;;  %4640 = vmatprep.subr.bf16.mxu0 %v6583_v13  ;;  %v6650_v12 = vld [vmem:[#allocation11 + $0x438] ss:$28 sps:$4 sm:$0xff]  }
 0x412   : > { %5655 = vmatprep.subr.bf16.mxu1 %v6584_v0  ;;  %v6655_v13 = vld [vmem:[#allocation11 + $0x474] ss:$28 sps:$4 sm:$0xff]  }
 0x413   : > { %v6653_v0 = vld [vmem:[#allocation11 + $0x470] ss:$28 sps:$4 sm:$0xff]  }
 0x414   : > { %4641 = vmatpush1.bf16.msra.mxu0 %v6581_v14  ;;  %v6656_v14 = vld [vmem:[#allocation11 + $0x4a8] ss:$28 sps:$4 sm:$0xff]  }
 0x415   : > { %5656 = vmatpush3.bf16.msra.mxu1 %v6585_v15  ;;  %4642 = vmatprep.subr.bf16.mxu0 %v6588_v16  ;;  %v6661_v15 = vld [vmem:[#allocation11 + $0x4e4] ss:$28 sps:$4 sm:$0xff]   ;;  %v6664_v16 = vld [vmem:[#allocation11 + $0x51c] ss:$28 sps:$4 sm:$0xff]  }
 0x416   : > { %5657 = vmatprep.subr.bf16.mxu1 %v6589_v17  ;;  %v6662_v17 = vld [vmem:[#allocation11 + $0x518] ss:$28 sps:$4 sm:$0xff]  }
 0x418   : > { %4643 = vmatpush1.bf16.msra.mxu0 %v6586_v18  ;;  %v6667_v18 = vld [vmem:[#allocation11 + $0x554] ss:$28 sps:$4 sm:$0xff]  }
 0x419   : > { %5658 = vmatpush3.bf16.msra.mxu1 %v6590_v19  ;;  %4644 = vmatprep.subr.bf16.mxu0 %v6593_v20  ;;  %v6665_v19 = vld [vmem:[#allocation11 + $0x550] ss:$28 sps:$4 sm:$0xff]  }
 0x41a   : > { %5659 = vmatprep.subr.bf16.mxu1 %v6594_v21  ;;  %v6670_v20 = vld [vmem:[#allocation11 + $0x58c] ss:$28 sps:$4 sm:$0xff]  }
 0x41b   : > { %v6668_v21 = vld [vmem:[#allocation11 + $0x588] ss:$28 sps:$4 sm:$0xff]  }
 0x41c   : > { %4645 = vmatpush1.bf16.msra.mxu0 %v6591_v22  ;;  %v6673_v22 = vld [vmem:[#allocation11 + $0x5c4] ss:$28 sps:$4 sm:$0xff]  }
 0x41d   : > { %5660 = vmatpush3.bf16.msra.mxu1 %v6595_v23  ;;  %4646 = vmatprep.subr.bf16.mxu0 %v6598_v24  ;;  %v6671_v23 = vld [vmem:[#allocation11 + $0x5c0] ss:$28 sps:$4 sm:$0xff]  }
 0x41e   : > { %5661 = vmatprep.subr.bf16.mxu1 %v6599_v25  ;;  %v6676_v24 = vld [vmem:[#allocation11 + $0x5fc] ss:$28 sps:$4 sm:$0xff]  }
 0x41f   : > { %v6674_v25 = vld [vmem:[#allocation11 + $0x5f8] ss:$28 sps:$4 sm:$0xff]  }
 0x420   : > { %4647 = vmatpush1.bf16.msra.mxu0 %v6596_v26  ;;  %v6679_v26 = vld [vmem:[#allocation11 + $0x634] ss:$28 sps:$4 sm:$0xff]  }
 0x421   : > { %5662 = vmatpush3.bf16.msra.mxu1 %v6600_v27  ;;  %4648 = vmatprep.subr.bf16.mxu0 %v6603_v28  ;;  %v6677_v27 = vld [vmem:[#allocation11 + $0x630] ss:$28 sps:$4 sm:$0xff]  }
 0x422   : > { %5669 = vmatprep.subr.bf16.mxu1 %v6604_v29  ;;  %v6682_v28 = vld [vmem:[#allocation11 + $0x66c] ss:$28 sps:$4 sm:$0xff]  }
 0x423   : > { %v6680_v29 = vld [vmem:[#allocation11 + $0x668] ss:$28 sps:$4 sm:$0xff]  }
 0x424   : > { %4751 = vmatmul.mubr.bf16.vlgmr.msra.gmra.mrb[16].mxu1 %v7477_v46  ;;  %4649 = vmatpush1.bf16.msra.mxu0 %v6601_v30  ;;  %v6685_v30 = vld [vmem:[#allocation11 + $0x6a4] ss:$28 sps:$4 sm:$0xff]  }
 0x425   : > { %5670 = vmatpush3.bf16.msra.mxu1 %v6605_v31  ;;  %4791 = vmatprep.mubr.bf16.mxu1 %v7483_v53  ;;  %v6683_v31 = vld [vmem:[#allocation11 + $0x6a0] ss:$28 sps:$4 sm:$0xff]  }
 0x426   : > { %4650 = vmatprep.subr.bf16.mxu0 %v6608_v32  ;;  %5671 = vmatprep.subr.bf16.mxu1 %v6609_v33  ;;  %v6688_v32 = vld [vmem:[#allocation11 + $0x6dc] ss:$28 sps:$4 sm:$0xff]  }
 0x427   : > { %v6686_v33 = vld [vmem:[#allocation11 + $0x6d8] ss:$28 sps:$4 sm:$0xff]  }
 0x428   : > { %4651 = vmatpush1.bf16.msra.mxu0 %v6606_v34  ;;  %v7501_v34 = vld [vmem:[#allocation13] sm:$0x7f] }
 0x429   : > { %5672 = vmatpush3.bf16.msra.mxu1 %v6610_v35  ;;  %4652 = vmatprep.subr.bf16.mxu0 %v6613_v36  ;;  %v3276_v35 = vrot.slane %v7501_v34, %v7450_v40  ;;  %v3284_v36 = vrot.slane %v7501_v34, %v7462_v63 }
 0x42a   : > { %5673 = vmatprep.subr.bf16.mxu1 %v6614_v37  ;;  %v3280_v37 = vrot.slane %v7501_v34, %v7453_v42 }
 0x42c   : > { %4653 = vmatpush1.bf16.msra.mxu0 %v6611_v38  ;;  %v3288_v38 = vrot.slane %v7501_v34, %v7465_v52 }
 0x42d   : > { %5674 = vmatpush3.bf16.msra.mxu1 %v6615_v41  ;;  %4654 = vmatprep.subr.bf16.mxu0 %v6618_v43 }
 0x42e   : > { %5675 = vmatprep.subr.bf16.mxu1 %v6619_v44 }
 0x430   : > { %4655 = vmatpush1.bf16.msra.mxu0 %v6616_v45 }
 0x431   : > { %5676 = vmatpush3.bf16.msra.mxu1 %v6620_v47  ;;  %4656 = vmatprep.subr.bf16.mxu0 %v6623_v49 }
 0x432   : > { %5677 = vmatprep.subr.bf16.mxu1 %v6624_v50 }
 0x434   : > { %4657 = vmatpush1.bf16.msra.mxu0 %v6621_v51 }
 0x435   : > { %5678 = vmatpush3.bf16.msra.mxu1 %v6625_v55  ;;  %4658 = vmatprep.subr.bf16.mxu0 %v6628_v57 }
 0x436   : > { %5679 = vmatprep.subr.bf16.mxu1 %v6629_v58 }
 0x438   : > { %4659 = vmatpush1.bf16.msra.mxu0 %v6626_v59 }
 0x439   : > { %5680 = vmatpush3.bf16.msra.mxu1 %v6630_v60  ;;  %4660 = vmatprep.subr.bf16.mxu0 %v6633_v61 }
 0x43a   : > { %5681 = vmatprep.subr.bf16.mxu1 %v6634_v54 }
 0x43c   : > { %4661 = vmatpush1.bf16.msra.mxu0 %v6631_v1 }
 0x43d   : > { %5682 = vmatpush3.bf16.msra.mxu1 %v6635_v62  ;;  %4662 = vmatprep.subr.bf16.mxu0 %v6638_v11 }
 0x43e   : > { %5683 = vmatprep.subr.bf16.mxu1 %v6639_v2 }
 0x440   : > { %4663 = vmatpush1.bf16.msra.mxu0 %v6636_v3 }
 0x441   : > { %5684 = vmatpush3.bf16.msra.mxu1 %v6640_v56  ;;  %4675 = vmatprep.subr.bf16.mxu0 %v6643_v4 }
 0x443   : > { %4665 = vmatmul.mubr.bf16.vlgmr.msra.gmra.mrb[12].mxu0 %v7477_v46  ;;  %v6658_v46 = vld [vmem:[#allocation11 + $0x4ac] ss:$28 sps:$4 sm:$0xff]  }
 0x444   : > { %4792 = vmatmul.mubr.bf16.vlgmr.msra.gmra.mrb[20].mxu1 %v7479_v48  ;;  %4676 = vmatpush1.bf16.msra.mxu0 %v6641_v5 }
 0x445   : > { %4707 = vmatprep.mubr.bf16.mxu0 %v7483_v53  ;;  %4677 = vmatprep.subr.bf16.mxu0 %v6646_v6  ;;  %v6659_v53 = vld [vmem:[#allocation11 + $0x4e0] ss:$28 sps:$4 sm:$0xff]  }
 0x448   : > { %4678 = vmatpush1.bf16.msra.mxu0 %v6644_v7 }
 0x449   : > { %4679 = vmatprep.subr.bf16.mxu0 %v6649_v8 }
 0x44c   : > { %4680 = vmatpush1.bf16.msra.mxu0 %v6647_v9 }
 0x44d   : > { %4681 = vmatprep.subr.bf16.mxu0 %v6652_v10 }
 0x450   : > { %4682 = vmatpush1.bf16.msra.mxu0 %v6650_v12 }
 0x451   : > { %4683 = vmatprep.subr.bf16.mxu0 %v6655_v13 }
 0x454   : > { %4684 = vmatpush1.bf16.msra.mxu0 %v6653_v0 }
 0x455   : > { %4685 = vmatprep.subr.bf16.mxu0 %v6658_v46 }
 0x458   : > { %4686 = vmatpush1.bf16.msra.mxu0 %v6656_v14 }
 0x459   : > { %4687 = vmatprep.subr.bf16.mxu0 %v6661_v15 }
 0x45c   : > { %4688 = vmatpush1.bf16.msra.mxu0 %v6659_v53 }
 0x45d   : > { %4689 = vmatprep.subr.bf16.mxu0 %v6664_v16 }
 0x460   : > { %4690 = vmatpush1.bf16.msra.mxu0 %v6662_v17 }
 0x461   : > { %4691 = vmatprep.subr.bf16.mxu0 %v6667_v18 }
 0x464   : > { %4692 = vmatpush1.bf16.msra.mxu0 %v6665_v19 }
 0x465   : > { %4693 = vmatprep.subr.bf16.mxu0 %v6670_v20 }
 0x468   : > { %4694 = vmatpush1.bf16.msra.mxu0 %v6668_v21 }
 0x469   : > { %4695 = vmatprep.subr.bf16.mxu0 %v6673_v22 }
 0x46c   : > { %4696 = vmatpush1.bf16.msra.mxu0 %v6671_v23 }
 0x46d   : > { %4697 = vmatprep.subr.bf16.mxu0 %v6676_v24 }
 0x470   : > { %4698 = vmatpush1.bf16.msra.mxu0 %v6674_v25 }
 0x471   : > { %4699 = vmatprep.subr.bf16.mxu0 %v6679_v26 }
 0x474   : > { %4700 = vmatpush1.bf16.msra.mxu0 %v6677_v27 }
 0x475   : > { %4701 = vmatprep.subr.bf16.mxu0 %v6682_v28 }
 0x478   : > { %4702 = vmatpush1.bf16.msra.mxu0 %v6680_v29 }
 0x479   : > { %4703 = vmatprep.subr.bf16.mxu0 %v6685_v30  ;;  %v3299_v30 = vsub.s32 6, %v7447_v39 }
 0x47c   : > { %4704 = vmatpush1.bf16.msra.mxu0 %v6683_v31  ;;  %v3300_v31 = vrot.slane %v7501_v34, %v3299_v30 }
 0x47d   : > { %4705 = vmatprep.subr.bf16.mxu0 %v6688_v32 }
 0x480   : > { %4706 = vmatpush1.bf16.msra.mxu0 %v6686_v33 }
 0x483   : > { %4708 = vmatmul.mubr.bf16.vlgmr.msra.gmra.mrb[12].mxu0 %v7479_v48 }
 0x4d6   : > { %v4537_v41 = vpop.f32.mrb[8].mxu0  ;;  %v4623_v43 = vpop.f32.mrb[12].mxu1 }
 0x4d7   : > { %v5711_v44 = vadd.f32 %v4537_v41, %v3276_v35  ;;  %v5715_v45 = vadd.f32 %v4623_v43, %v3284_v36  ;;  %v4539_v47 = vpop.f32.mrb[9].mxu0  ;;  %v4625_v48 = vpop.f32.mrb[13].mxu1 }
 0x4d8   : > { %v5712_v49 = vadd.f32 %v4539_v47, %v3280_v37  ;;  %v5716_v50 = vadd.f32 %v4625_v48, %v3288_v38  ;;  %v4541_v51 = vpop.f32.mrb[10].mxu0  ;;  %v4627_v55 = vpop.f32.mrb[14].mxu1 }
 0x4d9   : > { %v5628_v40 = vmul.f32 -1.442695, %v5711_v44  ;;  %v5630_v57 = vmul.f32 -1.442695, %v5715_v45  ;;  %v5713_v58 = vadd.f32 %v4541_v51, %v3276_v35  ;;  %v5717_v63 = vadd.f32 %v4627_v55, %v3284_v36  ;;  %v4543_v59 = vpop.f32.mrb[11].mxu0  ;;  %v4629_v60 = vpop.f32.mrb[15].mxu1 }
 0x4da   : > { %v5629_v42 = vmul.f32 -1.442695, %v5712_v49  ;;  %v5631_v61 = vmul.f32 -1.442695, %v5716_v50  ;;  %v5714_v54 = vadd.f32 %v4543_v59, %v3280_v37  ;;  %v5718_v52 = vadd.f32 %v4629_v60, %v3288_v38 }
 0x4db   : > { %6753 = vpow2.f32 %v5628_v40  ;;  %v5635_v1 = vmul.f32 -1.442695, %v5713_v58  ;;  %v5637_v62 = vmul.f32 -1.442695, %v5717_v63  ;;  %v3291_v58 = vsub.s32 4, %v7447_v39 }
 0x4dc   : > { %6755 = vpow2.f32 %v5630_v57  ;;  %v5636_v11 = vmul.f32 -1.442695, %v5714_v54  ;;  %v5638_v2 = vmul.f32 -1.442695, %v5718_v52  ;;  %v3295_v63 = vsub.s32 5, %v7447_v39 }
 0x4dd   : > { %6757 = vpow2.f32 %v5629_v42  ;;  %v3292_v59 = vrot.slane %v7501_v34, %v3291_v58 }
 0x4de   : > { %6759 = vpow2.f32 %v5631_v61  ;;  %v3296_v60 = vrot.slane %v7501_v34, %v3295_v63 }
 0x4df   : > { %6761 = vpow2.f32 %v5635_v1 }
 0x4e0   : > { %6763 = vpow2.f32 %v5637_v62 }
 0x4e1   : > { %6765 = vpow2.f32 %v5636_v11 }
 0x4e2   : > { %6767 = vpow2.f32 %v5638_v2 }
 0x4e5   : > { %v6754_v3 = vpop.eup %6753 }
 0x4e6   : > { %v6756_v56 = vpop.eup %6755  ;;  %v4842_v4 = vadd.f32 1.0, %v6754_v3 }
 0x4e7   : > { %v6758_v5 = vpop.eup %6757  ;;  %v4844_v6 = vadd.f32 1.0, %v6756_v56 }
 0x4e8   : > { %v6760_v7 = vpop.eup %6759  ;;  %6769 = vrcp.f32 %v4842_v4  ;;  %v4843_v8 = vadd.f32 1.0, %v6758_v5 }
 0x4e9   : > { %v6762_v9 = vpop.eup %6761  ;;  %6771 = vrcp.f32 %v4844_v6  ;;  %v4845_v10 = vadd.f32 1.0, %v6760_v7 }
 0x4ea   : > { %v6764_v12 = vpop.eup %6763  ;;  %6773 = vrcp.f32 %v4843_v8  ;;  %v4849_v13 = vadd.f32 1.0, %v6762_v9 }
 0x4eb   : > { %v6766_v0 = vpop.eup %6765  ;;  %6775 = vrcp.f32 %v4845_v10  ;;  %v4851_v46 = vadd.f32 1.0, %v6764_v12 }
 0x4ec   : > { %v6768_v14 = vpop.eup %6767  ;;  %6777 = vrcp.f32 %v4849_v13  ;;  %v4850_v15 = vadd.f32 1.0, %v6766_v0 }
 0x4ed   : > { %6779 = vrcp.f32 %v4851_v46  ;;  %v4852_v53 = vadd.f32 1.0, %v6768_v14 }
 0x4ee   : > { %6781 = vrcp.f32 %v4850_v15 }
 0x4ef   : > { %6783 = vrcp.f32 %v4852_v53 }
 0x4f2   : > { %v6770_v16 = vpop.eup %6769 }
 0x4f3   : > { %v6772_v17 = vpop.eup %6771  ;;  %4884 = vst [vmem:[%s7513_s8] sm:$0xff] %v6770_v16 }
 0x4f4   : > { %v6774_v18 = vpop.eup %6773  ;;  %4886 = vst [vmem:[%s7513_s8 + $0x10] sm:$0xff] %v6772_v17 }
 0x4f5   : > { %v6776_v19 = vpop.eup %6775  ;;  %4885 = vst [vmem:[%s7513_s8 + $0x8] sm:$0xff] %v6774_v18 }
 0x4f6   : > { %v6778_v20 = vpop.eup %6777  ;;  %4887 = vst [vmem:[%s7513_s8 + $0x18] sm:$0xff] %v6776_v19 }
 0x4f7   : > { %v6780_v21 = vpop.eup %6779  ;;  %4891 = vst [vmem:[%s7513_s8 + $0x38] sm:$0xff] %v6778_v20  ;;  %v5663_v22 = vpop.f32.mrb[16].mxu1 }
 0x4f8   : > { %v6782_v23 = vpop.eup %6781  ;;  %4893 = vst [vmem:[%s7513_s8 + $0x48] sm:$0xff] %v6780_v21  ;;  %v5664_v24 = vpop.f32.mrb[17].mxu1 }
 0x4f9   : > { %v6784_v25 = vpop.eup %6783  ;;  %4892 = vst [vmem:[%s7513_s8 + $0x40] sm:$0xff] %v6782_v23  ;;  %v5665_v26 = vadd.f32 %v5664_v24, %v5663_v22  ;;  %v5666_v27 = vpop.f32.mrb[18].mxu1 }
 0x4fa   : > { %4894 = vst [vmem:[%s7513_s8 + $0x50] sm:$0xff] %v6784_v25  ;;  %v5667_v28 = vpop.f32.mrb[19].mxu1 }
 0x4fb   : > { %v5668_v29 = vadd.f32 %v5667_v28, %v5666_v27  ;;  %v4753_v35 = vadd.f32 %v5665_v26, %v3300_v31 }
 0x4fd   : > { %v4756_v41 = vadd.f32 %v5668_v29, %v3300_v31 }
 0x517   : > { %v5685_v32 = vpop.f32.mrb[20].mxu1 }
 0x518   : > { %v5686_v33 = vpop.f32.mrb[21].mxu1 }
 0x519   : > { %v5687_v36 = vadd.f32 %v5686_v33, %v5685_v32  ;;  %v5688_v37 = vpop.f32.mrb[22].mxu1 }
 0x51a   : > { %v5689_v38 = vpop.f32.mrb[23].mxu1 }
 0x51b   : > { %v4794_v43 = vadd.f32 %v5687_v36, %v4753_v35  ;;  %v5690_v44 = vadd.f32 %v5689_v38, %v5688_v37 }
 0x51d   : > { %v5634_v45 = vmul.f32 -1.442695, %v4794_v43  ;;  %v4797_v47 = vadd.f32 %v5690_v44, %v4756_v41 }
 0x51f   : > { %6785 = vpow2.f32 %v5634_v45  ;;  %v5641_v48 = vmul.f32 -1.442695, %v4797_v47 }
 0x521   : > { %6787 = vpow2.f32 %v5641_v48 }
 0x529   : > { %v6786_v49 = vpop.eup %6785 }
 0x52a   : > { %v4848_v50 = vadd.f32 1.0, %v6786_v49 }
 0x52b   : > { %v6788_v51 = vpop.eup %6787 }
 0x52c   : > { %6789 = vrcp.f32 %v4848_v50  ;;  %v4855_v55 = vadd.f32 1.0, %v6788_v51 }
 0x52e   : > { %6791 = vrcp.f32 %v4855_v55 }
 0x536   : > { %v6790_v40 = vpop.eup %6789 }
 0x537   : > { %4890 = vst.msk [vmem:[%s7513_s8 + $0x30] sm:$0xff] %vm1601_vm0, %v6790_v40 }
 0x538   : > { %v6792_v57 = vpop.eup %6791 }
 0x539   : > { %4897 = vst.msk [vmem:[%s7513_s8 + $0x68] sm:$0xff] %vm1601_vm0, %v6792_v57 }
 0x556   : > { %v4709_v42 = vpop.f32.mrb[12].mxu0 }
 0x557   : > { %v5719_v61 = vadd.f32 %v4709_v42, %v3292_v59  ;;  %v4711_v54 = vpop.f32.mrb[13].mxu0 }
 0x558   : > { %v5720_v52 = vadd.f32 %v4711_v54, %v3296_v60  ;;  %v4713_v1 = vpop.f32.mrb[14].mxu0 }
 0x559   : > { %v5632_v62 = vmul.f32 -1.442695, %v5719_v61  ;;  %v5721_v11 = vadd.f32 %v4713_v1, %v3292_v59  ;;  %v4715_v2 = vpop.f32.mrb[15].mxu0 }
 0x55a   : > { %v5633_v3 = vmul.f32 -1.442695, %v5720_v52  ;;  %v5722_v56 = vadd.f32 %v4715_v2, %v3296_v60 }
 0x55b   : > { %6793 = vpow2.f32 %v5632_v62  ;;  %v5639_v4 = vmul.f32 -1.442695, %v5721_v11 }
 0x55c   : > { %6795 = vpow2.f32 %v5633_v3  ;;  %v5640_v5 = vmul.f32 -1.442695, %v5722_v56 }
 0x55d   : > { %6797 = vpow2.f32 %v5639_v4 }
 0x55e   : > { %6799 = vpow2.f32 %v5640_v5 }
 0x565   : > { %v6794_v39 = vpop.eup %6793 }
 0x566   : > { %v6796_v34 = vpop.eup %6795  ;;  %v4846_v6 = vadd.f32 1.0, %v6794_v39 }
 0x567   : > { %v6798_v7 = vpop.eup %6797  ;;  %v4847_v8 = vadd.f32 1.0, %v6796_v34 }
 0x568   : > { %v6800_v9 = vpop.eup %6799  ;;  %6801 = vrcp.f32 %v4846_v6  ;;  %v4853_v10 = vadd.f32 1.0, %v6798_v7 }
 0x569   : > { %6803 = vrcp.f32 %v4847_v8  ;;  %v4854_v12 = vadd.f32 1.0, %v6800_v9 }
 0x56a   : > { %6805 = vrcp.f32 %v4853_v10 }
 0x56b   : > { %6807 = vrcp.f32 %v4854_v12 }
 0x572   : > { %v6802_v13 = vpop.eup %6801 }
 0x573   : > { %v6804_v0 = vpop.eup %6803  ;;  %4888 = vst [vmem:[%s7513_s8 + $0x20] sm:$0xff] %v6802_v13 }
 0x574   : > { %v6806_v46 = vpop.eup %6805  ;;  %4889 = vst [vmem:[%s7513_s8 + $0x28] sm:$0xff] %v6804_v0 }
 0x575   : > { %v6808_v14 = vpop.eup %6807  ;;  %4895 = vst [vmem:[%s7513_s8 + $0x58] sm:$0xff] %v6806_v46 }
 0x576   : > { %4896 = vst [vmem:[%s7513_s8 + $0x60] sm:$0xff] %v6808_v14 }
 0x577   : > { %7020 = shalt.err (!%p7017_p8)
}
 0x578   : > { %s7021_s9 = scalar_lea.hbm %s7539_s16, 1792  ;;  %s7025_s10 = scalar_lea.hbm %s7595_s7, 3584 }
 0x579   : > { %p7022_p4 = scmp.ne.s32.totalorder %s7539_s16, %s7021_s9  ;;  %p7026_p0 = scmp.lt.u32.totalorder %s7539_s16, %s7595_s7 }
 0x57a   : > { %p7027_p6 = scmp.lt.u32.totalorder %s7025_s10, %s7021_s9  ;;  %p7029_p5 = scmp.lt.u32.totalorder %s7021_s9, %s7539_s16 }
 0x57b   : > { %p7023_p10 = pnand %p7022_p4, %p7616_p9 }
 0x57c   : > { %p7028_p7 = por %p7027_p6, %p7026_p0 }
 0x57d   : > { %p7024_p11 = pneg %p7023_p10 }
 0x57e   : > { %p7030_p12 = por %p7029_p5, %p7028_p7 }
 0x580   : > { %p7031_p13 = pnand %p7030_p12, %p7024_p11 }
 0x582   : > { %7034 = shalt.err (!%p7031_p13)
}
 0x583   : > { %s7102_s14 = smov 896   ;;  %s7103_s15 = smov 56  }
 0x584   : > { %5793 = dma.vmem_to_hbm [thread:$0]  (%p7616_p9), %s7542_s21, 1792, %s7539_s16, %s4899_s30, %s7102_s14, %s7102_s14, %s7103_s15  }
 0x585 PF: > { %s4928_s28 = sand.u32 1, %s7073_s24   ;;  %p7617_p1 = scmp.ne.s32.totalorder %s7607_s23, 0 }
 0x586   : > { %p7618_p3 = scmp.ge.s32.totalorder %s7085_s27, 2  ;;  %s4929_s12 = scalar_lea.sflag [#allocation4], %s4928_s28 }
 0x588   : > { %p5819_p2 = pnand %p7618_p3, %p7617_p1 }
 0x58a   : > { %7068 = dma.done.wait (!%p5819_p2), %s4929_s12, 1792  }
 0x58b   : > { %7070 = vsyncadd (!%p5819_p2), %s4929_s12, 4294965504  ;;  %p23_p8 = scmp.ge.s32.totalorder %s7320_s11, 4   ;;  %s7619_s24 = smov %s7077_s25 }
 0x58c   : > { %s7620_s25 = smov %s7081_s26  ;;  %s7621_s26 = smov %s7331_s18 }
 0x58d   : > { %s7622_s27 = smov %s7320_s11  ;;  %25 = sbr.rel (!%p23_p8) target bundleno = 10 (0xa), region = 117 }
 0x594   :  { %4934 = vsyncpa [#allocation3], 1 }
 0x595   :  { %4936 = vsyncpa [#allocation3 + $0x1], 1 }
 0x596   :  { %4937 = vsyncpa [#allocation6], 1 }
 0x597   :  { %4938 = vsyncpa [#allocation9], 1 }
 0x598   :  { %4939 = vsyncpa [#allocation12], 1 }
 0x599   :  { %4940 = vsyncpa [#allocation4], 1 }
 0x59a   :  { %4942 = vsyncpa [#allocation4 + $0x1], 1 }

</bundles_post_ra>
